<compile_context>
chip_gen: v5e
topology: v5e:2x2
jax: 0.10.0
libtpu: 0.0.40
codegen_flags: <defaults>
</compile_context>

<pallas_src>
import functools

import jax
import jax.numpy as jnp
from jax.experimental import pallas as pl
from jax.experimental.pallas import tpu as pltpu


def _bn_kernel(x_ref, g_ref, b_ref, o_ref, *, eps):
    # x_ref / o_ref: (N, tc, HW)   g_ref / b_ref: (tc, 1)
    x = x_ref[...].astype(jnp.float32)
    n_red = x.shape[0] * x.shape[2]          # N * H * W (compile-time constant)
    inv_n = 1.0 / float(n_red)

    # Single sweep over the tile: sum and sum-of-squares (f32 accumulation).
    s1 = jnp.sum(x, axis=(0, 2), keepdims=True)        # (1, tc, 1)
    s2 = jnp.sum(x * x, axis=(0, 2), keepdims=True)    # (1, tc, 1)
    mean = s1 * inv_n
    var = jnp.maximum(s2 * inv_n - mean * mean, 0.0)   # biased batch variance
    inv_std = jax.lax.rsqrt(var + eps)                 # EUP rsqrt

    # Fold affine into per-channel scale/shift: y = x * scale + shift.
    g = g_ref[...].astype(jnp.float32)[None, :, :]     # (1, tc, 1)
    b = b_ref[...].astype(jnp.float32)[None, :, :]
    scale = g * inv_std
    shift = b - mean * scale
    o_ref[...] = (x * scale + shift).astype(o_ref.dtype)


def _choose_tc(C, N, HW, itemsize, budget_bytes):
    """Largest channel tile that divides C, obeys the (8,128) rule, fits the
    VMEM budget (double-buffered in + out blocks) and keeps >=2 grid steps."""
    legal = [d for d in range(1, C + 1)
             if C % d == 0 and (d % 8 == 0 or d == C)]
    fits = [d for d in legal if 4 * N * d * HW * itemsize <= budget_bytes]
    multi = [d for d in fits if C // d >= 2]
    if multi:
        return max(multi)
    if fits:
        return max(fits)
    return min(legal)


def batchnorm2d(x_nchw, gamma, beta, *, eps=1e-3,
                tile_budget_bytes=32 * 1024 * 1024,
                vmem_limit_bytes=48 * 1024 * 1024):
    """BatchNorm2d forward using batch statistics (PyTorch training-mode forward)."""
    # TODO(synk): running_mean / running_var updates (momentum=0.01) are not
    # produced; only the normalized output is computed.
    N, C, H, W = x_nchw.shape
    HW = H * W
    itemsize = jnp.dtype(x_nchw.dtype).itemsize

    tc = _choose_tc(C, N, HW, itemsize, tile_budget_bytes)

    x3 = x_nchw.reshape(N, C, HW)        # free reshape on contiguous NCHW
    g = gamma.reshape(C, 1)
    b = beta.reshape(C, 1)

    out = pl.pallas_call(
        functools.partial(_bn_kernel, eps=eps),
        out_shape=jax.ShapeDtypeStruct((N, C, HW), x_nchw.dtype),
        grid=(C // tc,),
        in_specs=[
            pl.BlockSpec((N, tc, HW), lambda i: (0, i, 0)),
            pl.BlockSpec((tc, 1), lambda i: (i, 0)),
            pl.BlockSpec((tc, 1), lambda i: (i, 0)),
        ],
        out_specs=pl.BlockSpec((N, tc, HW), lambda i: (0, i, 0)),
        compiler_params=pltpu.CompilerParams(
            dimension_semantics=("parallel",),
            vmem_limit_bytes=vmem_limit_bytes,
        ),
    )(x3, g, b)

    return out.reshape(N, C, H, W)


if __name__ == "__main__":
    # Shape from the original module: x181 = torch.randn([1, 480, 28, 28]).
    N, C, H, W = 1, 480, 28, 28
    key = jax.random.PRNGKey(0)
    kx, kg, kb = jax.random.split(key, 3)

    x = jax.random.normal(kx, (N, C, H, W), dtype=jnp.float32)
    gamma = jax.random.normal(kg, (C,), dtype=jnp.float32)  # deterministic affine weight
    beta = jax.random.normal(kb, (C,), dtype=jnp.float32)   # deterministic affine bias

    y = batchnorm2d(x, gamma, beta, eps=1e-3)
    jax.block_until_ready(y)

    # Pure-JAX reference of training-mode BatchNorm2d (biased batch variance).
    mean = jnp.mean(x, axis=(0, 2, 3), keepdims=True)
    var = jnp.mean((x - mean) ** 2, axis=(0, 2, 3), keepdims=True)
    ref = (x - mean) / jnp.sqrt(var + 1e-3) * gamma.reshape(1, C, 1, 1) \
          + beta.reshape(1, C, 1, 1)
    max_err = float(jnp.max(jnp.abs(y - ref)))
    assert jnp.allclose(y, ref, atol=2e-3, rtol=2e-3), max_err

    print("KERNEL_OK")
</pallas_src>

<mosaic_0001>
module attributes {stable_mosaic.version = 11 : i64} {
  func.func @_bn_kernel(%arg0: i32, %arg1: memref<1x240x784xf32, #tpu.memory_space<vmem>>, %arg2: memref<240x1xf32, #tpu.memory_space<vmem>>, %arg3: memref<240x1xf32, #tpu.memory_space<vmem>>, %arg4: memref<1x240x784xf32, #tpu.memory_space<vmem>>) attributes {dimension_semantics = [#tpu.dimension_semantics<parallel>], iteration_bounds = array<i64: 2>, scalar_prefetch = 0 : i64, scratch_operands = 0 : i64, tpu.core_type = #tpu.core_type<tc>, window_params = [{transform_indices = @transform_0, window_bounds = array<i64: 1, 240, 784>}, {transform_indices = @transform_1, window_bounds = array<i64: 240, 1>}, {transform_indices = @transform_2, window_bounds = array<i64: 240, 1>}, {transform_indices = @transform_3, window_bounds = array<i64: 1, 240, 784>}]} {
    %c0 = arith.constant 0 : index
    %c0_0 = arith.constant 0 : index
    %c0_1 = arith.constant 0 : index
    %0 = vector.load %arg1[%c0, %c0_0, %c0_1] : memref<1x240x784xf32, #tpu.memory_space<vmem>>, vector<1x240x784xf32>
    %cst = arith.constant dense<0.000000e+00> : vector<240xf32>
    %1 = vector.multi_reduction <add>, %0, %cst [0, 2] : vector<1x240x784xf32> to vector<240xf32>
    %2 = vector.shape_cast %1 : vector<240xf32> to vector<1x240x1xf32>
    %3 = arith.mulf %0, %0 : vector<1x240x784xf32>
    %cst_2 = arith.constant dense<0.000000e+00> : vector<240xf32>
    %4 = vector.multi_reduction <add>, %3, %cst_2 [0, 2] : vector<1x240x784xf32> to vector<240xf32>
    %5 = vector.shape_cast %4 : vector<240xf32> to vector<1x240x1xf32>
    %cst_3 = arith.constant 0.00127551018 : f32
    %6 = vector.broadcast %cst_3 : f32 to vector<1x240x1xf32>
    %7 = arith.mulf %2, %6 : vector<1x240x1xf32>
    %cst_4 = arith.constant 0.00127551018 : f32
    %8 = vector.broadcast %cst_4 : f32 to vector<1x240x1xf32>
    %9 = arith.mulf %5, %8 : vector<1x240x1xf32>
    %10 = arith.mulf %7, %7 : vector<1x240x1xf32>
    %11 = arith.subf %9, %10 : vector<1x240x1xf32>
    %cst_5 = arith.constant 0.000000e+00 : f32
    %12 = vector.broadcast %cst_5 : f32 to vector<1x240x1xf32>
    %13 = arith.maximumf %11, %12 : vector<1x240x1xf32>
    %cst_6 = arith.constant 1.000000e-03 : f32
    %14 = vector.broadcast %cst_6 : f32 to vector<1x240x1xf32>
    %15 = arith.addf %13, %14 : vector<1x240x1xf32>
    %16 = math.rsqrt %15 : vector<1x240x1xf32>
    %c0_7 = arith.constant 0 : index
    %c0_8 = arith.constant 0 : index
    %17 = vector.load %arg2[%c0_7, %c0_8] : memref<240x1xf32, #tpu.memory_space<vmem>>, vector<240x1xf32>
    %18 = vector.shape_cast %17 : vector<240x1xf32> to vector<1x240x1xf32>
    %c0_9 = arith.constant 0 : index
    %c0_10 = arith.constant 0 : index
    %19 = vector.load %arg3[%c0_9, %c0_10] : memref<240x1xf32, #tpu.memory_space<vmem>>, vector<240x1xf32>
    %20 = vector.shape_cast %19 : vector<240x1xf32> to vector<1x240x1xf32>
    %21 = arith.mulf %18, %16 : vector<1x240x1xf32>
    %22 = arith.mulf %7, %21 : vector<1x240x1xf32>
    %23 = arith.subf %20, %22 : vector<1x240x1xf32>
    %24 = vector.broadcast %21 : vector<1x240x1xf32> to vector<1x240x784xf32>
    %25 = arith.mulf %0, %24 : vector<1x240x784xf32>
    %26 = vector.broadcast %23 : vector<1x240x1xf32> to vector<1x240x784xf32>
    %27 = arith.addf %25, %26 : vector<1x240x784xf32>
    %c0_11 = arith.constant 0 : index
    %c0_12 = arith.constant 0 : index
    %c0_13 = arith.constant 0 : index
    %28 = vector.load %arg4[%c0_11, %c0_12, %c0_13] : memref<1x240x784xf32, #tpu.memory_space<vmem>>, vector<1x240x784xf32>
    tpu.vector_store %arg4[%c0_11, %c0_12, %c0_13], %27 {strides = array<i32>} : memref<1x240x784xf32, #tpu.memory_space<vmem>>, vector<1x240x784xf32>,
    return
  }
  func.func @transform_0(%arg0: i32) -> (i32, i32, i32) {
    %c0_i32 = arith.constant 0 : i32
    %c0_i32_0 = arith.constant 0 : i32
    %c0_i32_1 = arith.constant 0 : i32
    return %c0_i32, %arg0, %c0_i32_0 : i32, i32, i32
  }
  func.func @transform_1(%arg0: i32) -> (i32, i32) {
    %c0_i32 = arith.constant 0 : i32
    %c0_i32_0 = arith.constant 0 : i32
    return %arg0, %c0_i32 : i32, i32
  }
  func.func @transform_2(%arg0: i32) -> (i32, i32) {
    %c0_i32 = arith.constant 0 : i32
    %c0_i32_0 = arith.constant 0 : i32
    return %arg0, %c0_i32 : i32, i32
  }
  func.func @transform_3(%arg0: i32) -> (i32, i32, i32) {
    %c0_i32 = arith.constant 0 : i32
    %c0_i32_0 = arith.constant 0 : i32
    %c0_i32_1 = arith.constant 0 : i32
    return %c0_i32, %arg0, %c0_i32_0 : i32, i32, i32
  }
}

</mosaic_0001>

<bundles_post_ra>
// kernel: tpu_custom_call.1
= control target key start
LH: loop header
LB: loop body
LE: loop exit
PB: predicated region body
PF: predicated region fallthrough
CT: control target
= control target key end

     0   :  { %s3149_s12 = smov 0   ;;  %s6223_s0 = inlined_call_operand.vmem [shape: f32[1,480,784], index: 0, kind: input, shape index: {}]   ;;  %s6224_s1 = inlined_call_operand.vmem [shape: f32[480,1], index: 1, kind: input, shape index: {}]   ;;  %s6225_s2 = inlined_call_operand.vmem [shape: f32[480,1], index: 2, kind: input, shape index: {}]   ;;  %s6226_s3 = inlined_call_operand.vmem [shape: f32[1,480,784], index: 3, kind: output, shape index: {}]  }
   0x1 LB: > { %s2826_s13 = sadd.s32 4294967295, %s3126_s12   ;;  %p2830_p0 = scmp.ge.s32.totalorder %s3126_s12, 1  ;;  %s3126_s12 = sphi %s3149_s12, %s13_s12  }
   0x2   : > { %p161_p1 = scmp.lt.s32.totalorder %s3126_s12, 3 }
   0x4   : > { %p162_p2 = pnand %p2830_p0, %p161_p1 }
   0x6   : > { %165 = sbr.rel (%p162_p2) target bundleno = 753 (0x2f1), region = 32 }
   0xb   : > { %s197_s14 = smul.u32 30, %s2826_s13  ;;  %vm438_vm0 = vcmask 130048  }
   0xd   : > { %p198_p3 = scmp.lt.s32.totalorder %s197_s14, 59 }
   0xf   : > { %s6811_s14 = smov (!%p198_p3, %s197_s14), 59 }
  0x10   : > { %s2837_s15 = smul.u32 56, %s6811_s14  ;;  %s2832_s19 = sshll.u32 %s6811_s14, 3 }
  0x11   : > { %s4795_s22 = scalar_lea.vmem %s6224_s1, %s2832_s19  ;;  %s5395_s25 = scalar_lea.vmem %s6225_s2, %s2832_s19 }
  0x12   : > { %s3165_s18 = scalar_lea.vmem %s6223_s0, %s2837_s15  ;;  %s5556_s28 = scalar_lea.vmem %s6226_s3, %s2837_s15 }
  0x13   : > { %v3168_v0 = vld [vmem:[%s3165_s18 + $0xe0] sm:$0xff]  ;;  %v3171_v1 = vld [vmem:[%s3165_s18 + $0xe8] sm:$0xff]  ;;  %v3174_v2 = vld [vmem:[%s3165_s18 + $0xf0] sm:$0xff] }
  0x14   : > { %v470_v3 = vadd.f32 %v3171_v1, %v3168_v0  ;;  %v3179_v4 = vld [vmem:[%s3165_s18 + $0xf8] sm:$0xff]  ;;  %v3182_v5 = vld [vmem:[%s3165_s18 + $0x70] sm:$0xff]  ;;  %v3188_v7 = vld [vmem:[%s3165_s18 + $0x100] sm:$0xff] }
  0x15   : > { %v3185_v6 = vld [vmem:[%s3165_s18 + $0x78] sm:$0xff]  ;;  %6412 = vst [vmem:[#allocation2_spill] sm:$0xff] %v3188_v7  ;;  %v3192_v9 = vld [vmem:[%s3165_s18 + $0x80] sm:$0xff]  ;;  %v3197_v11 = vld [vmem:[%s3165_s18 + $0x108] sm:$0xff] }
  0x16   : > { %v471_v8 = vadd.f32 %v470_v3, %v3174_v2  ;;  %v452_v10 = vadd.f32 %v3185_v6, %v3182_v5  ;;  %6413 = vst [vmem:[#allocation3_spill] sm:$0xff] %v3197_v11  ;;  %v3200_v12 = vld [vmem:[%s3165_s18 + $0x88] sm:$0xff]  ;;  %v3203_v13 = vld [vmem:[%s3165_s18] sm:$0xff]  ;;  %v3206_v14 = vld [vmem:[%s3165_s18 + $0x110] sm:$0xff] }
  0x17   : > { %v3211_v17 = vld [vmem:[%s3165_s18 + $0x8] sm:$0xff]  ;;  %v3214_v18 = vld [vmem:[%s3165_s18 + $0x10] sm:$0xff]  ;;  %v3220_v20 = vld [vmem:[%s3165_s18 + $0xa0] sm:$0xff]  ;;  %v475_v28 = vsel %vm438_vm0, %v3206_v14, 0.0 }
  0x18   : > { %v472_v15 = vadd.f32 %v471_v8, %v3179_v4  ;;  %v453_v16 = vadd.f32 %v452_v10, %v3192_v9  ;;  %v3217_v19 = vld [vmem:[%s3165_s18 + $0x90] sm:$0xff]  ;;  %v3223_v21 = vld [vmem:[%s3165_s18 + $0x18] sm:$0xff]  ;;  %v433_v22 = vadd.f32 %v3211_v17, %v3203_v13  ;;  %v3233_v26 = vld [vmem:[%s3165_s18 + $0x120] sm:$0xff]  ;;  %v457_v39 = vsel %vm438_vm0, %v3220_v20, 0.0 }
  0x19   : > { %v3230_v25 = vld [vmem:[%s3165_s18 + $0x118] sm:$0xff]  ;;  %v3236_v27 = vld [vmem:[%s3165_s18 + $0x128] sm:$0xff]  ;;  %v3244_v30 = vld [vmem:[%s3165_s18 + $0x20] sm:$0xff] }
  0x1a   : > { %v473_v23 = vadd.f32 %v472_v15, %v3188_v7  ;;  %v454_v24 = vadd.f32 %v453_v16, %v3200_v12  ;;  %v3241_v29 = vld [vmem:[%s3165_s18 + $0x98] sm:$0xff]  ;;  %v434_v31 = vadd.f32 %v433_v22, %v3214_v18  ;;  %v479_v32 = vadd.f32 %v3233_v26, %v3230_v25  ;;  %v3252_v35 = vld [vmem:[%s3165_s18 + $0x28] sm:$0xff]  ;;  %v3255_v36 = vld [vmem:[%s3165_s18 + $0x130] sm:$0xff] }
  0x1b   : > { %v3258_v37 = vld [vmem:[%s3165_s18 + $0xa8] sm:$0xff]  ;;  %v3261_v38 = vld [vmem:[%s3165_s18 + $0xb0] sm:$0xff]  ;;  %v3270_v42 = vld [vmem:[%s3165_s18 + $0x138] sm:$0xff] }
  0x1c   : > { %v474_v33 = vadd.f32 %v473_v23, %v3197_v11  ;;  %v455_v34 = vadd.f32 %v454_v24, %v3217_v19  ;;  %v3266_v40 = vld [vmem:[%s3165_s18 + $0x30] sm:$0xff]  ;;  %v435_v41 = vadd.f32 %v434_v31, %v3223_v21  ;;  %v480_v43 = vadd.f32 %v479_v32, %v3236_v27  ;;  %v3274_v44 = vld [vmem:[%s3165_s18 + $0xb8] sm:$0xff]  ;;  %v3280_v48 = vld [vmem:[%s3165_s18 + $0x140] sm:$0xff] }
  0x1d   : > { %6414 = vst [vmem:[#allocation4_spill] sm:$0xff] %v3274_v44  ;;  %v461_v45 = vadd.f32 %v3261_v38, %v3258_v37  ;;  %v3283_v49 = vld [vmem:[%s3165_s18 + $0xc0] sm:$0xff]  ;;  %v3286_v50 = vld [vmem:[%s3165_s18 + $0x38] sm:$0xff]  ;;  %v3290_v52 = vld [vmem:[%s3165_s18 + $0x148] sm:$0xff]  ;;  %v439_v58 = vsel %vm438_vm0, %v3266_v40, 0.0 }
  0x1e   : > { %v476_v46 = vadd.f32 %v475_v28, %v474_v33  ;;  %v456_v47 = vadd.f32 %v455_v34, %v3241_v29  ;;  %6415 = vst [vmem:[#allocation5_spill] sm:$0xff] %v3283_v49  ;;  %v436_v51 = vadd.f32 %v435_v41, %v3244_v30  ;;  %v481_v53 = vadd.f32 %v480_v43, %v3255_v36  ;;  %v3295_v55 = vld [vmem:[%s3165_s18 + $0x40] sm:$0xff]  ;;  %v3298_v56 = vld [vmem:[%s3165_s18 + $0x48] sm:$0xff]  ;;  %v3306_v60 = vld [vmem:[%s3165_s18 + $0xd8] sm:$0xff] }
  0x1f   : > { %v462_v54 = vadd.f32 %v461_v45, %v3274_v44  ;;  %v3303_v59 = vld [vmem:[%s3165_s18 + $0xc8] sm:$0xff]  ;;  %6417 = vst [vmem:[#allocation7_spill] sm:$0xff] %v3306_v60  ;;  %v3309_v61 = vld [vmem:[%s3165_s18 + $0x50] sm:$0xff]  ;;  %v443_v62 = vadd.f32 %v3295_v55, %v3286_v50  ;;  %v3317_v10 = vld [vmem:[%s3165_s18 + $0x1c0] sm:$0xff]  ;;  %v484_v22 = vsel %vm438_vm0, %v3290_v52, 0.0 }
  0x20   : > { %477 = vadd.xlane.f32.xlu2 %v476_v46  ;;  %v458_v57 = vadd.f32 %v457_v39, %v456_v47  ;;  %6416 = vst [vmem:[#allocation6_spill] sm:$0xff] %v3303_v59  ;;  %v437_v63 = vadd.f32 %v436_v51, %v3252_v35  ;;  %v482_v3 = vadd.f32 %v481_v53, %v3270_v42  ;;  %v3320_v15 = vld [vmem:[%s3165_s18 + $0x1c8] sm:$0xff]  ;;  %v3323_v16 = vld [vmem:[%s3165_s18 + $0x1d0] sm:$0xff]  ;;  %v3331_v24 = vld [vmem:[%s3165_s18 + $0x58] sm:$0xff]  ;;  %v466_v46 = vsel %vm438_vm0, %v3306_v60, 0.0 }
  0x21   : > { %v463_v8 = vadd.f32 %v462_v54, %v3283_v49  ;;  %6418 = vst [vmem:[#allocation8_spill] sm:$0xff] %v3317_v10  ;;  %v3328_v23 = vld [vmem:[%s3165_s18 + $0xd0] sm:$0xff]  ;;  %v444_v28 = vadd.f32 %v443_v62, %v3298_v56  ;;  %v506_v31 = vadd.f32 %v3320_v15, %v3317_v10  ;;  %v3339_v39 = vld [vmem:[%s3165_s18 + $0x60] sm:$0xff]  ;;  %v3342_v41 = vld [vmem:[%s3165_s18 + $0x1d8] sm:$0xff] }
  0x22   : > { %6419 = vst [vmem:[#allocation9_spill] sm:$0xff] %v3320_v15  ;;  %459 = vadd.xlane.f32.xlu1 %v458_v57  ;;  %v440_v32 = vadd.f32 %v439_v58, %v437_v63  ;;  %v483_v33 = vadd.f32 %v482_v3, %v3280_v48  ;;  %v3345_v43 = vld [vmem:[%s3165_s18 + $0x188] sm:$0xff]  ;;  %v3348_v45 = vld [vmem:[%s3165_s18 + $0x190] sm:$0xff]  ;;  %v3357_v53 = vld [vmem:[%s3165_s18 + $0x1e0] sm:$0xff] }
  0x23   : > { %6420 = vst [vmem:[#allocation10_spill] sm:$0xff] %v3323_v16  ;;  %v464_v34 = vadd.f32 %v463_v8, %v3303_v59  ;;  %v3353_v47 = vld [vmem:[%s3165_s18 + $0x68] sm:$0xff]  ;;  %v445_v51 = vadd.f32 %v444_v28, %v3309_v61  ;;  %v507_v54 = vadd.f32 %v506_v31, %v3323_v16  ;;  %v3361_v57 = vld [vmem:[%s3165_s18 + $0x198] sm:$0xff]  ;;  %v497_v58 = vadd.f32 %v3348_v45, %v3345_v43  ;;  %v3370_v8 = vld [vmem:[%s3165_s18 + $0x1a0] sm:$0xff] }
  0x24   : > { %6421 = vst [vmem:[#allocation11_spill] sm:$0xff] %v3328_v23  ;;  %441 = vadd.xlane.f32.xlu0 %v440_v32  ;;  %v485_v62 = vadd.f32 %v484_v22, %v483_v33  ;;  %v3367_v3 = vld [vmem:[%s3165_s18 + $0x1e8] sm:$0xff]  ;;  %v3373_v28 = vld [vmem:[%s3165_s18 + $0x150] sm:$0xff]  ;;  %v3382_v22 = vld [vmem:[%s3165_s18 + $0x158] sm:$0xff] }
  0x25   : > { %6422 = vst [vmem:[#allocation12_spill] sm:$0xff] %v3342_v41  ;;  %v465_v63 = vadd.f32 %v464_v34, %v3328_v23  ;;  %v446_v31 = vadd.f32 %v445_v51, %v3331_v24  ;;  %v3377_v16 = vld [vmem:[%s3165_s18 + $0x1f0] sm:$0xff]  ;;  %v498_v32 = vadd.f32 %v497_v58, %v3361_v57  ;;  %v3385_v33 = vld [vmem:[%s3165_s18 + $0x160] sm:$0xff]  ;;  %v3390_v51 = vld [vmem:[%s3165_s18 + $0x1a8] sm:$0xff] }
  0x26   : > { %6423 = vst [vmem:[#allocation13_spill] sm:$0xff] %v3345_v43  ;;  %v448_v43 = vsel %vm438_vm0, %v3353_v47, 0.0  ;;  %v3393_v23 = vld [vmem:[%s3165_s18 + $0x1b8] sm:$0xff]  ;;  %v3396_v59 = vld [vmem:[%s3165_s18 + $0x168] sm:$0xff]  ;;  %v3429_v10 = vld [vmem:[%s3165_s18 + $0x230] sm:$0xff] }
  0x27   : > { %6424 = vst [vmem:[#allocation14_spill] sm:$0xff] %v3348_v45  ;;  %v508_v45 = vadd.f32 %v507_v54, %v3342_v41  ;;  %v467_v34 = vadd.f32 %v466_v46, %v465_v63  ;;  %v488_v54 = vadd.f32 %v3382_v22, %v3373_v28  ;;  %v447_v58 = vadd.f32 %v446_v31, %v3339_v39  ;;  %v3404_v63 = vld [vmem:[%s3165_s18 + $0x268] sm:$0xff]  ;;  %v3407_v41 = vld [vmem:[%s3165_s18 + $0x270] sm:$0xff]  ;;  %v3410_v15 = vld [vmem:[%s3165_s18 + $0x278] sm:$0xff] }
  0x28   : > { %6425 = vst [vmem:[#allocation15_spill] sm:$0xff] %v3357_v53  ;;  %486 = vadd.xlane.f32.xlu2 %v485_v62  ;;  %v499_v46 = vadd.f32 %v498_v32, %v3370_v8  ;;  %v511_v62 = vsel %vm438_vm0, %v3377_v16, 0.0  ;;  %v3418_v31 = vld [vmem:[%s3165_s18 + $0x170] sm:$0xff]  ;;  %v533_v32 = vadd.f32 %v3407_v41, %v3404_v63  ;;  %v3432_v60 = vld [vmem:[%s3165_s18 + $0x238] sm:$0xff]  ;;  %v3584_v49 = vld [vmem:[%s3165_s18 + $0x300] sm:$0xff] }
  0x29   : > { %6426 = vst [vmem:[#allocation16_spill] sm:$0xff] %v3361_v57  ;;  %v509_v57 = vadd.f32 %v508_v45, %v3357_v53  ;;  %v489_v45 = vadd.f32 %v488_v54, %v3385_v33  ;;  %v502_v54 = vsel %vm438_vm0, %v3393_v23, 0.0  ;;  %v3755_v11 = vld [vmem:[%s3165_s18 + $0x518] sm:$0xff]  ;;  %v3825_v7 = vld [vmem:[%s3165_s18 + $0x4a8] sm:$0xff] }
  0x2a   : > { %6427 = vst [vmem:[#allocation17_spill] sm:$0xff] %v3367_v3  ;;  %468 = vadd.xlane.f32.xlu1 %v467_v34  ;;  %v500_v53 = vadd.f32 %v499_v46, %v3390_v51  ;;  %v534_v34 = vadd.f32 %v533_v32, %v3410_v15  ;;  %v524_v46 = vadd.f32 %v3432_v60, %v3429_v10  ;;  %v3461_v32 = vld [vmem:[%s3165_s18 + $0x290] sm:$0xff] }
  0x2b   : > { %6428 = vst [vmem:[#allocation18_spill] sm:$0xff] %v3370_v8  ;;  %v510_v8 = vadd.f32 %v509_v57, %v3367_v3  ;;  %v490_v57 = vadd.f32 %v489_v45, %v3396_v59  ;;  %v3457_v3 = vld [vmem:[%s3165_s18 + $0x1f8] sm:$0xff] }
  0x2c   : > { %6429 = vst [vmem:[#allocation19_spill] sm:$0xff] %v3373_v28  ;;  %v449_v28 = vadd.f32 %v448_v43, %v447_v58  ;;  %v3440_v43 = vld [vmem:[%s3165_s18 + $0x180] sm:$0xff] }
  0x2d   : > { %6430 = vst [vmem:[#allocation20_spill] sm:$0xff] %v3377_v16  ;;  %v3426_v16 = vld [vmem:[%s3165_s18 + $0x280] sm:$0xff]  ;;  %v491_v45 = vadd.f32 %v490_v57, %v3418_v31  ;;  %v3474_v57 = vld [vmem:[%s3165_s18 + $0x298] sm:$0xff] }
  0x2e   : > { %6431 = vst [vmem:[#allocation21_spill] sm:$0xff] %v3382_v22  ;;  %v3415_v22 = vld [vmem:[%s3165_s18 + $0x1b0] sm:$0xff]  ;;  %v3445_v58 = vld [vmem:[%s3165_s18 + $0x240] sm:$0xff]  ;;  %450 = vadd.xlane.f32.xlu0 %v449_v28  ;;  %v493_v28 = vsel %vm438_vm0, %v3440_v43, 0.0 }
  0x2f   : > { %6432 = vst [vmem:[#allocation22_spill] sm:$0xff] %v3385_v33  ;;  %v501_v33 = vadd.f32 %v500_v53, %v3415_v22  ;;  %v3466_v53 = vld [vmem:[%s3165_s18 + $0x200] sm:$0xff] }
  0x30   : > { %6433 = vst [vmem:[#allocation23_spill] sm:$0xff] %v3390_v51  ;;  %v3451_v51 = vld [vmem:[%s3165_s18 + $0x288] sm:$0xff] }
  0x31   : > { %6434 = vst [vmem:[#allocation24_spill] sm:$0xff] %v3393_v23  ;;  %v3454_v23 = vld [vmem:[%s3165_s18 + $0x248] sm:$0xff] }
  0x32   : > { %6435 = vst [vmem:[#allocation25_spill] sm:$0xff] %v3396_v59  ;;  %v3497_v59 = vld [vmem:[%s3165_s18 + $0x258] sm:$0xff] }
  0x33   : > { %6436 = vst [vmem:[#allocation26_spill] sm:$0xff] %v3404_v63  ;;  %v512_v63 = vadd.f32 %v511_v62, %v510_v8  ;;  %v525_v8 = vadd.f32 %v524_v46, %v3445_v58  ;;  %v3469_v62 = vld [vmem:[%s3165_s18 + $0x208] sm:$0xff] }
  0x34   : > { %6437 = vst [vmem:[#allocation27_spill] sm:$0xff] %v3407_v41  ;;  %v3437_v41 = vld [vmem:[%s3165_s18 + $0x178] sm:$0xff] }
  0x35   : > { %6438 = vst [vmem:[#allocation28_spill] sm:$0xff] %v3410_v15  ;;  %v3477_v15 = vld [vmem:[%s3165_s18 + $0x250] sm:$0xff]  ;;  %v492_v46 = vadd.f32 %v491_v45, %v3437_v41  ;;  %513 = vadd.xlane.f32.xlu2 %v512_v63  ;;  %v3503_v45 = vld [vmem:[%s3165_s18 + $0x218] sm:$0xff]  ;;  %v538_v63 = vsel %vm438_vm0, %v3474_v57, 0.0 }
  0x36   : > { %6439 = vst [vmem:[#allocation29_spill] sm:$0xff] %v3415_v22  ;;  %v3516_v22 = vld [vmem:[%s3165_s18 + $0x2d8] sm:$0xff] }
  0x37   : > { %6440 = vst [vmem:[#allocation30_spill] sm:$0xff] %v3418_v31  ;;  %v3480_v31 = vld [vmem:[%s3165_s18 + $0x210] sm:$0xff] }
  0x38   : > { %6441 = vst [vmem:[#allocation31_spill] sm:$0xff] %v3426_v16 }
  0x39   : > { %6442 = vst [vmem:[#allocation32_spill] sm:$0xff] %v3429_v10  ;;  %v503_v10 = vadd.f32 %v502_v54, %v501_v33  ;;  %v526_v33 = vadd.f32 %v525_v8, %v3454_v23  ;;  %v3488_v54 = vld [vmem:[%s3165_s18 + $0x310] sm:$0xff] }
  0x3a   : > { %6443 = vst [vmem:[#allocation33_spill] sm:$0xff] %v3432_v60  ;;  %v535_v60 = vadd.f32 %v534_v34, %v3426_v16  ;;  %v515_v34 = vadd.f32 %v3466_v53, %v3457_v3  ;;  %v3491_v16 = vld [vmem:[%s3165_s18 + $0x318] sm:$0xff] }
  0x3b   : > { %6444 = vst [vmem:[#allocation34_spill] sm:$0xff] %v3437_v41  ;;  %v560_v8 = vadd.f32 %v3491_v16, %v3488_v54  ;;  %v3513_v41 = vld [vmem:[%s3165_s18 + $0x328] sm:$0xff]  ;;  %504 = vadd.xlane.f32.xlu1 %v503_v10 }
  0x3c   : > { %6445 = vst [vmem:[#allocation35_spill] sm:$0xff] %v3440_v43  ;;  %v3494_v43 = vld [vmem:[%s3165_s18 + $0x320] sm:$0xff] }
  0x3d   : > { %6446 = vst [vmem:[#allocation36_spill] sm:$0xff] %v3445_v58  ;;  %v536_v58 = vadd.f32 %v535_v60, %v3451_v51  ;;  %v516_v60 = vadd.f32 %v515_v34, %v3469_v62  ;;  %v3519_v34 = vld [vmem:[%s3165_s18 + $0x2e0] sm:$0xff] }
  0x3e   : > { %6447 = vst [vmem:[#allocation37_spill] sm:$0xff] %v3451_v51  ;;  %v527_v51 = vadd.f32 %v526_v33, %v3477_v15  ;;  %v551_v33 = vadd.f32 %v3519_v34, %v3516_v22 }
  0x3f   : > { %6448 = vst [vmem:[#allocation38_spill] sm:$0xff] %v3454_v23  ;;  %v537_v23 = vadd.f32 %v536_v58, %v3461_v32  ;;  %v517_v58 = vadd.f32 %v516_v60, %v3480_v31  ;;  %v3544_v60 = vld [vmem:[%s3165_s18 + $0x2a0] sm:$0xff] }
  0x40   : > { %6449 = vst [vmem:[#allocation39_spill] sm:$0xff] %v3457_v3  ;;  %v494_v3 = vadd.f32 %v493_v28, %v492_v46  ;;  %v3525_v28 = vld [vmem:[%s3165_s18 + $0x228] sm:$0xff]  ;;  %v561_v46 = vadd.f32 %v560_v8, %v3494_v43 }
  0x41   : > { %6450 = vst [vmem:[#allocation40_spill] sm:$0xff] %v3461_v32  ;;  %v3541_v32 = vld [vmem:[%s3165_s18 + $0x2f0] sm:$0xff]  ;;  %v539_v8 = vadd.f32 %v538_v63, %v537_v23  ;;  %v520_v23 = vsel %vm438_vm0, %v3525_v28, 0.0  ;;  %v3561_v63 = vld [vmem:[%s3165_s18 + $0x340] sm:$0xff] }
  0x42   : > { %6451 = vst [vmem:[#allocation41_spill] sm:$0xff] %v3466_v53  ;;  %v3500_v53 = vld [vmem:[%s3165_s18 + $0x260] sm:$0xff]  ;;  %495 = vadd.xlane.f32.xlu0 %v494_v3 }
  0x43   : > { %6452 = vst [vmem:[#allocation42_spill] sm:$0xff] %v3469_v62  ;;  %v528_v62 = vadd.f32 %v527_v51, %v3497_v59  ;;  %v529_v10 = vsel %vm438_vm0, %v3500_v53, 0.0  ;;  %540 = vadd.xlane.f32.xlu2 %v539_v8 }
  0x44   : > { %6453 = vst [vmem:[#allocation43_spill] sm:$0xff] %v3474_v57  ;;  %v3581_v57 = vld [vmem:[%s3165_s18 + $0x3c8] sm:$0xff] }
  0x45   : > { %6454 = vst [vmem:[#allocation44_spill] sm:$0xff] %v3477_v15  ;;  %v3538_v15 = vld [vmem:[%s3165_s18 + $0x330] sm:$0xff] }
  0x46   : > { %6455 = vst [vmem:[#allocation45_spill] sm:$0xff] %v3480_v31  ;;  %v3548_v31 = vld [vmem:[%s3165_s18 + $0x338] sm:$0xff] }
  0x47   : > { %6456 = vst [vmem:[#allocation46_spill] sm:$0xff] %v3488_v54  ;;  %v3530_v54 = vld [vmem:[%s3165_s18 + $0x2e8] sm:$0xff] }
  0x48   : > { %6457 = vst [vmem:[#allocation47_spill] sm:$0xff] %v3491_v16  ;;  %v3522_v16 = vld [vmem:[%s3165_s18 + $0x220] sm:$0xff]  ;;  %v552_v51 = vadd.f32 %v551_v33, %v3530_v54  ;;  %v530_v33 = vadd.f32 %v529_v10, %v528_v62  ;;  %v3587_v62 = vld [vmem:[%s3165_s18 + $0x308] sm:$0xff] }
  0x49   : > { %6458 = vst [vmem:[#allocation48_spill] sm:$0xff] %v3494_v43  ;;  %v518_v43 = vadd.f32 %v517_v58, %v3503_v45  ;;  %v3564_v58 = vld [vmem:[%s3165_s18 + $0x2f8] sm:$0xff]  ;;  %v3590_v10 = vld [vmem:[%s3165_s18 + $0x2c0] sm:$0xff] }
  0x4a   : > { %6459 = vst [vmem:[#allocation49_spill] sm:$0xff] %v3497_v59  ;;  %v3556_v59 = vld [vmem:[%s3165_s18 + $0x2b0] sm:$0xff]  ;;  %v553_v3 = vadd.f32 %v552_v51, %v3541_v32  ;;  %531 = vadd.xlane.f32.xlu1 %v530_v33 }
  0x4b   : > { %6460 = vst [vmem:[#allocation50_spill] sm:$0xff] %v3500_v53  ;;  %v3578_v53 = vld [vmem:[%s3165_s18 + $0x3c0] sm:$0xff] }
  0x4c   : > { %6461 = vst [vmem:[#allocation51_spill] sm:$0xff] %v3503_v45  ;;  %v3567_v45 = vld [vmem:[%s3165_s18 + $0x2b8] sm:$0xff] }
  0x4d   : > { %6462 = vst [vmem:[#allocation52_spill] sm:$0xff] %v3513_v41 }
  0x4e   : > { %6463 = vst [vmem:[#allocation53_spill] sm:$0xff] %v3516_v22  ;;  %v3553_v22 = vld [vmem:[%s3165_s18 + $0x2a8] sm:$0xff] }
  0x4f   : > { %6464 = vst [vmem:[#allocation54_spill] sm:$0xff] %v3519_v34  ;;  %v562_v34 = vadd.f32 %v561_v46, %v3513_v41  ;;  %v542_v46 = vadd.f32 %v3553_v22, %v3544_v60 }
  0x50   : > { %6465 = vst [vmem:[#allocation55_spill] sm:$0xff] %v3522_v16 }
  0x51   : > { %6466 = vst [vmem:[#allocation56_spill] sm:$0xff] %v3525_v28  ;;  %v563_v41 = vadd.f32 %v562_v34, %v3538_v15  ;;  %v3575_v28 = vld [vmem:[%s3165_s18 + $0x3b8] sm:$0xff] }
  0x52   : > { %6467 = vst [vmem:[#allocation57_spill] sm:$0xff] %v3530_v54  ;;  %v519_v54 = vadd.f32 %v518_v43, %v3522_v16  ;;  %v543_v43 = vadd.f32 %v542_v46, %v3556_v59  ;;  %v587_v34 = vadd.f32 %v3578_v53, %v3575_v28  ;;  %v3606_v46 = vld [vmem:[%s3165_s18 + $0x388] sm:$0xff]  ;;  %v3752_v16 = vld [vmem:[%s3165_s18 + $0x510] sm:$0xff] }
  0x53   : > { %6468 = vst [vmem:[#allocation58_spill] sm:$0xff] %v3538_v15  ;;  %v564_v51 = vadd.f32 %v563_v41, %v3548_v31  ;;  %v3603_v15 = vld [vmem:[%s3165_s18 + $0x380] sm:$0xff] }
  0x54   : > { %6469 = vst [vmem:[#allocation59_spill] sm:$0xff] %v3541_v32  ;;  %v3600_v32 = vld [vmem:[%s3165_s18 + $0x3d0] sm:$0xff]  ;;  %v544_v41 = vadd.f32 %v543_v43, %v3567_v45  ;;  %v588_v8 = vadd.f32 %v587_v34, %v3581_v57  ;;  %v556_v43 = vsel %vm438_vm0, %v3587_v62, 0.0 }
  0x55   : > { %6470 = vst [vmem:[#allocation60_spill] sm:$0xff] %v3544_v60  ;;  %v554_v60 = vadd.f32 %v553_v3, %v3564_v58  ;;  %v578_v3 = vadd.f32 %v3606_v46, %v3603_v15  ;;  %v3631_v34 = vld [vmem:[%s3165_s18 + $0x2d0] sm:$0xff] }
  0x56   : > { %6471 = vst [vmem:[#allocation61_spill] sm:$0xff] %v3548_v31  ;;  %v3626_v31 = vld [vmem:[%s3165_s18 + $0x348] sm:$0xff]  ;;  %v589_v33 = vadd.f32 %v588_v8, %v3600_v32 }
  0x57   : > { %6472 = vst [vmem:[#allocation62_spill] sm:$0xff] %v3553_v22  ;;  %v565_v22 = vsel %vm438_vm0, %v3561_v63, 0.0 }
  0x58   : > { %6473 = vst [vmem:[#allocation63_spill] sm:$0xff] %v3556_v59  ;;  %v521_v59 = vadd.f32 %v520_v23, %v519_v54  ;;  %v3620_v54 = vld [vmem:[%s3165_s18 + $0x3d8] sm:$0xff] }
  0x59   : > { %6474 = vst [vmem:[#allocation64_spill] sm:$0xff] %v3561_v63  ;;  %v3623_v23 = vld [vmem:[%s3165_s18 + $0x398] sm:$0xff]  ;;  %v3649_v63 = vld [vmem:[%s3165_s18 + $0x360] sm:$0xff] }
  0x5a   : > { %6475 = vst [vmem:[#allocation65_spill] sm:$0xff] %v3564_v58  ;;  %v555_v58 = vadd.f32 %v554_v60, %v3584_v49  ;;  %522 = vadd.xlane.f32.xlu0 %v521_v59  ;;  %v547_v59 = vsel %vm438_vm0, %v3631_v34, 0.0 }
  0x5b   : > { %6476 = vst [vmem:[#allocation66_spill] sm:$0xff] %v3567_v45  ;;  %v566_v45 = vadd.f32 %v565_v22, %v564_v51  ;;  %v3657_v51 = vld [vmem:[%s3165_s18 + $0x460] sm:$0xff] }
  0x5c   : > { %6477 = vst [vmem:[#allocation67_spill] sm:$0xff] %v3575_v28  ;;  %v3614_v28 = vld [vmem:[%s3165_s18 + $0x390] sm:$0xff] }
  0x5d   : > { %6478 = vst [vmem:[#allocation68_spill] sm:$0xff] %v3578_v53  ;;  %v3609_v53 = vld [vmem:[%s3165_s18 + $0x2c8] sm:$0xff]  ;;  %v579_v60 = vadd.f32 %v578_v3, %v3614_v28  ;;  %v590_v3 = vadd.f32 %v589_v33, %v3620_v54  ;;  %567 = vadd.xlane.f32.xlu2 %v566_v45 }
  0x5e   : > { %6479 = vst [vmem:[#allocation69_spill] sm:$0xff] %v3581_v57  ;;  %v545_v57 = vadd.f32 %v544_v41, %v3590_v10  ;;  %v3674_v33 = vld [vmem:[%s3165_s18 + $0x368] sm:$0xff] }
  0x5f   : > { %6480 = vst [vmem:[#allocation70_spill] sm:$0xff] %v3584_v49  ;;  %v3643_v49 = vld [vmem:[%s3165_s18 + $0x3e0] sm:$0xff]  ;;  %v580_v22 = vadd.f32 %v579_v60, %v3623_v23 }
  0x60   : > { %6481 = vst [vmem:[#allocation71_spill] sm:$0xff] %v3587_v62  ;;  %v3646_v62 = vld [vmem:[%s3165_s18 + $0x3a0] sm:$0xff]  ;;  %v546_v8 = vadd.f32 %v545_v57, %v3609_v53  ;;  %v3671_v57 = vld [vmem:[%s3165_s18 + $0x3a8] sm:$0xff] }
  0x61   : > { %6482 = vst [vmem:[#allocation72_spill] sm:$0xff] %v3590_v10  ;;  %v557_v10 = vadd.f32 %v556_v43, %v555_v58  ;;  %v3681_v58 = vld [vmem:[%s3165_s18 + $0x478] sm:$0xff]  ;;  %v3684_v43 = vld [vmem:[%s3165_s18 + $0x428] sm:$0xff] }
  0x62   : > { %6483 = vst [vmem:[#allocation73_spill] sm:$0xff] %v3600_v32  ;;  %v3663_v32 = vld [vmem:[%s3165_s18 + $0x470] sm:$0xff]  ;;  %v548_v45 = vadd.f32 %v547_v59, %v546_v8 }
  0x63   : > { %6484 = vst [vmem:[#allocation74_spill] sm:$0xff] %v3603_v15  ;;  %v3640_v15 = vld [vmem:[%s3165_s18 + $0x358] sm:$0xff]  ;;  %558 = vadd.xlane.f32.xlu1 %v557_v10  ;;  %v3720_v59 = vld [vmem:[%s3165_s18 + $0x490] sm:$0xff] }
  0x64   : > { %6485 = vst [vmem:[#allocation75_spill] sm:$0xff] %v3606_v46  ;;  %v3637_v46 = vld [vmem:[%s3165_s18 + $0x350] sm:$0xff]  ;;  %549 = vadd.xlane.f32.xlu0 %v548_v45  ;;  %v619_v45 = vsel %vm438_vm0, %v3720_v59, 0.0 }
  0x65   : > { %6486 = vst [vmem:[#allocation76_spill] sm:$0xff] %v3609_v53  ;;  %v569_v41 = vadd.f32 %v3637_v46, %v3626_v31  ;;  %v591_v53 = vadd.f32 %v590_v3, %v3643_v49 }
  0x66   : > { %6487 = vst [vmem:[#allocation77_spill] sm:$0xff] %v3614_v28  ;;  %v3660_v28 = vld [vmem:[%s3165_s18 + $0x468] sm:$0xff] }
  0x67   : > { %6488 = vst [vmem:[#allocation78_spill] sm:$0xff] %v3620_v54  ;;  %v570_v60 = vadd.f32 %v569_v41, %v3640_v15  ;;  %v3687_v54 = vld [vmem:[%s3165_s18 + $0x430] sm:$0xff] }
  0x68   : > { %6489 = vst [vmem:[#allocation79_spill] sm:$0xff] %v3623_v23  ;;  %v581_v23 = vadd.f32 %v580_v22, %v3646_v62  ;;  %v3691_v41 = vld [vmem:[%s3165_s18 + $0x3b0] sm:$0xff] }
  0x69   : > { %6490 = vst [vmem:[#allocation80_spill] sm:$0xff] %v3626_v31  ;;  %v614_v31 = vadd.f32 %v3660_v28, %v3657_v51  ;;  %v583_v10 = vsel %vm438_vm0, %v3691_v41, 0.0 }
  0x6a   : > { %6491 = vst [vmem:[#allocation81_spill] sm:$0xff] %v3631_v34  ;;  %v3728_v34 = vld [vmem:[%s3165_s18 + $0x400] sm:$0xff] }
  0x6b   : > { %6492 = vst [vmem:[#allocation82_spill] sm:$0xff] %v3637_v46  ;;  %v3668_v46 = vld [vmem:[%s3165_s18 + $0x3e8] sm:$0xff]  ;;  %v615_v22 = vadd.f32 %v614_v31, %v3663_v32  ;;  %v3715_v31 = vld [vmem:[%s3165_s18 + $0x3f0] sm:$0xff] }
  0x6c   : > { %6493 = vst [vmem:[#allocation83_spill] sm:$0xff] %v3640_v15  ;;  %v3694_v15 = vld [vmem:[%s3165_s18 + $0x370] sm:$0xff]  ;;  %v592_v3 = vsel %vm438_vm0, %v3668_v46, 0.0 }
  0x6d   : > { %6494 = vst [vmem:[#allocation84_spill] sm:$0xff] %v3643_v49  ;;  %v3706_v49 = vld [vmem:[%s3165_s18 + $0x378] sm:$0xff] }
  0x6e   : > { %6495 = vst [vmem:[#allocation85_spill] sm:$0xff] %v3646_v62  ;;  %v605_v62 = vadd.f32 %v3687_v54, %v3684_v43 }
  0x6f   : > { %6496 = vst [vmem:[#allocation86_spill] sm:$0xff] %v3649_v63 }
  0x70   : > { %6497 = vst [vmem:[#allocation87_spill] sm:$0xff] %v3657_v51  ;;  %v3699_v51 = vld [vmem:[%s3165_s18 + $0x438] sm:$0xff] }
  0x71   : > { %6498 = vst [vmem:[#allocation88_spill] sm:$0xff] %v3660_v28  ;;  %v571_v28 = vadd.f32 %v570_v60, %v3649_v63  ;;  %v3709_v60 = vld [vmem:[%s3165_s18 + $0x480] sm:$0xff] }
  0x72   : > { %6499 = vst [vmem:[#allocation89_spill] sm:$0xff] %v3663_v32  ;;  %v3712_v63 = vld [vmem:[%s3165_s18 + $0x440] sm:$0xff]  ;;  %v582_v32 = vadd.f32 %v581_v23, %v3671_v57  ;;  %v3733_v23 = vld [vmem:[%s3165_s18 + $0x488] sm:$0xff] }
  0x73   : > { %6500 = vst [vmem:[#allocation90_spill] sm:$0xff] %v3668_v46  ;;  %v572_v8 = vadd.f32 %v571_v28, %v3674_v33  ;;  %v3725_v46 = vld [vmem:[%s3165_s18 + $0x3f8] sm:$0xff]  ;;  %v3736_v28 = vld [vmem:[%s3165_s18 + $0x448] sm:$0xff] }
  0x74   : > { %6501 = vst [vmem:[#allocation91_spill] sm:$0xff] %v3671_v57  ;;  %v3742_v57 = vld [vmem:[%s3165_s18 + $0x408] sm:$0xff] }
  0x75   : > { %6502 = vst [vmem:[#allocation92_spill] sm:$0xff] %v3674_v33  ;;  %v3739_v33 = vld [vmem:[%s3165_s18 + $0x458] sm:$0xff]  ;;  %v573_v44 = vadd.f32 %v572_v8, %v3694_v15 }
  0x76   : > { %6503 = vst [vmem:[#allocation93_spill] sm:$0xff] %v3681_v58 }
  0x77   : > { %6504 = vst [vmem:[#allocation94_spill] sm:$0xff] %v3684_v43  ;;  %v606_v43 = vadd.f32 %v605_v62, %v3699_v51  ;;  %v596_v62 = vadd.f32 %v3725_v46, %v3715_v31 }
  0x78   : > { %6505 = vst [vmem:[#allocation95_spill] sm:$0xff] %v3687_v54  ;;  %v616_v54 = vadd.f32 %v615_v22, %v3681_v58  ;;  %v593_v22 = vadd.f32 %v592_v3, %v591_v53  ;;  %v3762_v53 = vld [vmem:[%s3165_s18 + $0x410] sm:$0xff] }
  0x79   : > { %6506 = vst [vmem:[#allocation96_spill] sm:$0xff] %v3691_v41  ;;  %v607_v58 = vadd.f32 %v606_v43, %v3712_v63  ;;  %v3749_v41 = vld [vmem:[%s3165_s18 + $0x508] sm:$0xff]  ;;  %v597_v43 = vadd.f32 %v596_v62, %v3728_v34  ;;  %v3782_v62 = vld [vmem:[%s3165_s18 + $0x4d8] sm:$0xff] }
  0x7a   : > { %6507 = vst [vmem:[#allocation97_spill] sm:$0xff] %v3694_v15  ;;  %v641_v3 = vadd.f32 %v3752_v16, %v3749_v41  ;;  %v3779_v15 = vld [vmem:[%s3165_s18 + $0x4d0] sm:$0xff]  ;;  %594 = vadd.xlane.f32.xlu2 %v593_v22  ;;  %v719_v22 = vmul.f32 %v3185_v6, %v3185_v6 }
  0x7b   : > { %6508 = vst [vmem:[#allocation98_spill] sm:$0xff] %v3699_v51  ;;  %v617_v51 = vadd.f32 %v616_v54, %v3709_v60  ;;  %v3765_v54 = vld [vmem:[%s3165_s18 + $0x420] sm:$0xff]  ;;  %v608_v8 = vadd.f32 %v607_v58, %v3736_v28  ;;  %v3829_v6 = vld [vmem:[%s3165_s18 + $0x530] sm:$0xff] }
  0x7c   : > { %6509 = vst [vmem:[#allocation99_spill] sm:$0xff] %v3706_v49  ;;  %v3795_v58 = vld [vmem:[%s3165_s18 + $0x4e0] sm:$0xff] }
  0x7d   : > { %6510 = vst [vmem:[#allocation100_spill] sm:$0xff] %v3709_v60  ;;  %v3776_v60 = vld [vmem:[%s3165_s18 + $0x520] sm:$0xff] }
  0x7e   : > { %6511 = vst [vmem:[#allocation101_spill] sm:$0xff] %v3712_v63  ;;  %v574_v63 = vsel %vm438_vm0, %v3706_v49, 0.0  ;;  %v3822_v49 = vld [vmem:[%s3165_s18 + $0x4a0] sm:$0xff] }
  0x7f   : > { %6512 = vst [vmem:[#allocation102_spill] sm:$0xff] %v3715_v31  ;;  %v584_v31 = vadd.f32 %v583_v10, %v582_v32  ;;  %v610_v32 = vsel %vm438_vm0, %v3739_v33, 0.0  ;;  %v3787_v10 = vld [vmem:[%s3165_s18 + $0x418] sm:$0xff] }
  0x80   : > { %6513 = vst [vmem:[#allocation103_spill] sm:$0xff] %v3720_v59  ;;  %v618_v59 = vadd.f32 %v617_v51, %v3733_v23 }
  0x81   : > { %6514 = vst [vmem:[#allocation104_spill] sm:$0xff] %v3725_v46  ;;  %v3759_v46 = vld [vmem:[%s3165_s18 + $0x450] sm:$0xff]  ;;  %585 = vadd.xlane.f32.xlu1 %v584_v31 }
  0x82   : > { %6515 = vst [vmem:[#allocation105_spill] sm:$0xff] %v3728_v34  ;;  %v642_v34 = vadd.f32 %v641_v3, %v3755_v11  ;;  %v3809_v3 = vld [vmem:[%s3165_s18 + $0x498] sm:$0xff] }
  0x83   : > { %6516 = vst [vmem:[#allocation106_spill] sm:$0xff] %v3733_v23 }
  0x84   : > { %6517 = vst [vmem:[#allocation107_spill] sm:$0xff] %v3736_v28  ;;  %v632_v28 = vadd.f32 %v3782_v62, %v3779_v15 }
  0x85   : > { %6518 = vst [vmem:[#allocation108_spill] sm:$0xff] %v3739_v33  ;;  %v601_v33 = vsel %vm438_vm0, %v3765_v54, 0.0 }
  0x86   : > { %6519 = vst [vmem:[#allocation109_spill] sm:$0xff] %v3742_v57  ;;  %v633_v23 = vadd.f32 %v632_v28, %v3795_v58 }
  0x87   : > { %6520 = vst [vmem:[#allocation110_spill] sm:$0xff] %v3749_v41  ;;  %v3791_v41 = vld [vmem:[%s3165_s18 + $0x528] sm:$0xff] }
  0x88   : > { %6521 = vst [vmem:[#allocation111_spill] sm:$0xff] %v3752_v16  ;;  %v598_v16 = vadd.f32 %v597_v43, %v3742_v57  ;;  %v3803_v43 = vld [vmem:[%s3165_s18 + $0x538] sm:$0xff]  ;;  %v3806_v57 = vld [vmem:[%s3165_s18 + $0x4e8] sm:$0xff] }
  0x89   : > { %6522 = vst [vmem:[#allocation112_spill] sm:$0xff] %v3755_v11  ;;  %v718_v11 = vmul.f32 %v3182_v5, %v3182_v5  ;;  %v609_v5 = vadd.f32 %v608_v8, %v3759_v46  ;;  %v646_v8 = vsel %vm438_vm0, %v3803_v43, 0.0 }
  0x8a   : > { %6523 = vst [vmem:[#allocation113_spill] sm:$0xff] %v3759_v46  ;;  %v599_v51 = vadd.f32 %v598_v16, %v3762_v53  ;;  %v3835_v16 = vld [vmem:[%s3165_s18 + $0x4b0] sm:$0xff] }
  0x8b   : > { %6524 = vst [vmem:[#allocation114_spill] sm:$0xff] %v3762_v53  ;;  %v932_v28 = vadd.f32 %v719_v22, %v718_v11  ;;  %v3847_v53 = vld [vmem:[%s3165_s18 + $0x5b0] sm:$0xff]  ;;  %v3856_v11 = vld [vmem:[%s3165_s18 + $0x4f8] sm:$0xff] }
  0x8c   : > { %6525 = vst [vmem:[#allocation115_spill] sm:$0xff] %v3765_v54  ;;  %v3818_v54 = vld [vmem:[%s3165_s18 + $0x500] sm:$0xff]  ;;  %v600_v31 = vadd.f32 %v599_v51, %v3787_v10  ;;  %v3861_v22 = vld [vmem:[%s3165_s18 + $0x4b8] sm:$0xff]  ;;  %v3864_v51 = vld [vmem:[%s3165_s18 + $0x4c8] sm:$0xff] }
  0x8d   : > { %6526 = vst [vmem:[#allocation116_spill] sm:$0xff] %v3776_v60 }
  0x8e   : > { %6527 = vst [vmem:[#allocation117_spill] sm:$0xff] %v3779_v15  ;;  %v643_v15 = vadd.f32 %v642_v34, %v3776_v60  ;;  %v720_v34 = vmul.f32 %v3192_v9, %v3192_v9  ;;  %v634_v60 = vadd.f32 %v633_v23, %v3806_v57  ;;  %v620_v9 = vadd.f32 %v619_v45, %v618_v59 }
  0x8f   : > { %6528 = vst [vmem:[#allocation118_spill] sm:$0xff] %v3782_v62  ;;  %v575_v62 = vadd.f32 %v574_v63, %v573_v44  ;;  %v3832_v44 = vld [vmem:[%s3165_s18 + $0x4f0] sm:$0xff]  ;;  %v623_v63 = vadd.f32 %v3822_v49, %v3809_v3  ;;  %v602_v46 = vadd.f32 %v601_v33, %v600_v31 }
  0x90   : > { %6529 = vst [vmem:[#allocation119_spill] sm:$0xff] %v3787_v10  ;;  %v635_v45 = vadd.f32 %v634_v60, %v3832_v44  ;;  %v3881_v10 = vld [vmem:[%s3165_s18 + $0x580] sm:$0xff]  ;;  %v3887_v60 = vld [vmem:[%s3165_s18 + $0x5d0] sm:$0xff]  ;;  %621 = vadd.xlane.f32.xlu2 %v620_v9 }
  0x91   : > { %6530 = vst [vmem:[#allocation120_spill] sm:$0xff] %v3791_v41  ;;  %v624_v23 = vadd.f32 %v623_v63, %v3825_v7  ;;  %576 = vadd.xlane.f32.xlu0 %v575_v62  ;;  %v721_v63 = vmul.f32 %v3200_v12, %v3200_v12  ;;  %v611_v62 = vadd.f32 %v610_v32, %v609_v5  ;;  %v628_v32 = vsel %vm438_vm0, %v3864_v51, 0.0  ;;  %v3902_v5 = vld [vmem:[%s3165_s18 + $0x5d8] sm:$0xff] }
  0x92   : > { %6531 = vst [vmem:[#allocation121_spill] sm:$0xff] %v3795_v58  ;;  %v644_v58 = vadd.f32 %v643_v15, %v3791_v41  ;;  %v637_v15 = vsel %vm438_vm0, %v3818_v54, 0.0  ;;  %v3878_v41 = vld [vmem:[%s3165_s18 + $0x578] sm:$0xff]  ;;  %v636_v12 = vadd.f32 %v635_v45, %v3856_v11 }
  0x93   : > { %6532 = vst [vmem:[#allocation122_spill] sm:$0xff] %v3803_v43  ;;  %v3872_v43 = vld [vmem:[%s3165_s18 + $0x4c0] sm:$0xff]  ;;  %612 = vadd.xlane.f32.xlu1 %v611_v62 }
  0x94   : > { %6533 = vst [vmem:[#allocation123_spill] sm:$0xff] %v3806_v57  ;;  %v645_v59 = vadd.f32 %v644_v58, %v3829_v6  ;;  %v625_v58 = vadd.f32 %v624_v23, %v3835_v16  ;;  %v3915_v23 = vld [vmem:[%s3165_s18 + $0x5a8] sm:$0xff]  ;;  %v3959_v62 = vld [vmem:[%s3165_s18 + $0x560] sm:$0xff] }
  0x95   : > { %6534 = vst [vmem:[#allocation124_spill] sm:$0xff] %v3809_v3  ;;  %v3853_v3 = vld [vmem:[%s3165_s18 + $0x5c0] sm:$0xff] }
  0x96   : > { %6535 = vst [vmem:[#allocation125_spill] sm:$0xff] %v3818_v54  ;;  %v3875_v54 = vld [vmem:[%s3165_s18 + $0x5c8] sm:$0xff]  ;;  %v626_v33 = vadd.f32 %v625_v58, %v3861_v22  ;;  %v3932_v58 = vld [vmem:[%s3165_s18 + $0x558] sm:$0xff] }
  0x97   : > { %6536 = vst [vmem:[#allocation126_spill] sm:$0xff] %v3822_v49  ;;  %v3850_v49 = vld [vmem:[%s3165_s18 + $0x5b8] sm:$0xff] }
  0x98   : > { %6537 = vst [vmem:[#allocation127_spill] sm:$0xff] %v3825_v7  ;;  %v668_v57 = vadd.f32 %v3850_v49, %v3847_v53  ;;  %v3894_v7 = vld [vmem:[%s3165_s18 + $0x588] sm:$0xff] }
  0x99   : > { %6538 = vst [vmem:[#allocation128_spill] sm:$0xff] %v3829_v6  ;;  %v659_v6 = vadd.f32 %v3881_v10, %v3878_v41  ;;  %603 = vadd.xlane.f32.xlu0 %v602_v46 }
  0x9a   : > { %6539 = vst [vmem:[#allocation129_spill] sm:$0xff] %v3832_v44  ;;  %v669_v44 = vadd.f32 %v668_v57, %v3853_v3  ;;  %v3908_v57 = vld [vmem:[%s3165_s18 + $0x540] sm:$0xff] }
  0x9b   : > { %6540 = vst [vmem:[#allocation130_spill] sm:$0xff] %v3847_v53  ;;  %v3890_v53 = vld [vmem:[%s3165_s18 + $0x5e0] sm:$0xff]  ;;  %v660_v45 = vadd.f32 %v659_v6, %v3894_v7  ;;  %v3935_v6 = vld [vmem:[%s3165_s18 + $0x570] sm:$0xff] }
  0x9c   : > { %6541 = vst [vmem:[#allocation131_spill] sm:$0xff] %v3850_v49  ;;  %v933_v49 = vadd.f32 %v932_v28, %v720_v34  ;;  %v3905_v34 = vld [vmem:[%s3165_s18 + $0x590] sm:$0xff]  ;;  %v722_v28 = vmul.f32 %v3217_v19, %v3217_v19  ;;  %v670_v31 = vadd.f32 %v669_v44, %v3875_v54  ;;  %v647_v19 = vadd.f32 %v646_v8, %v645_v59  ;;  %v3929_v44 = vld [vmem:[%s3165_s18 + $0x598] sm:$0xff] }
  0x9d   : > { %6542 = vst [vmem:[#allocation132_spill] sm:$0xff] %v3853_v3  ;;  %v724_v3 = vmul.f32 %v3220_v20, %v3220_v20  ;;  %v673_v9 = vsel %vm438_vm0, %v3890_v53, 0.0  ;;  %v661_v8 = vadd.f32 %v660_v45, %v3905_v34  ;;  %v3943_v59 = vld [vmem:[%s3165_s18 + $0x658] sm:$0xff] }
  0x9e   : > { %6543 = vst [vmem:[#allocation133_spill] sm:$0xff] %v3861_v22  ;;  %v671_v20 = vadd.f32 %v670_v31, %v3887_v60  ;;  %v3949_v22 = vld [vmem:[%s3165_s18 + $0x668] sm:$0xff]  ;;  %648 = vadd.xlane.f32.xlu2 %v647_v19 }
  0x9f   : > { %6544 = vst [vmem:[#allocation134_spill] sm:$0xff] %v3864_v51  ;;  %v627_v51 = vadd.f32 %v626_v33, %v3872_v43 }
  0xa0   : > { %6545 = vst [vmem:[#allocation135_spill] sm:$0xff] %v3872_v43  ;;  %v3973_v43 = vld [vmem:[%s3165_s18 + $0x628] sm:$0xff] }
  0xa1   : > { %6546 = vst [vmem:[#allocation136_spill] sm:$0xff] %v3875_v54  ;;  %v934_v54 = vadd.f32 %v933_v49, %v721_v63  ;;  %v3954_v49 = vld [vmem:[%s3165_s18 + $0x5a0] sm:$0xff]  ;;  %v664_v63 = vsel %vm438_vm0, %v3915_v23, 0.0 }
  0xa2   : > { %6547 = vst [vmem:[#allocation137_spill] sm:$0xff] %v3878_v41  ;;  %v3922_v41 = vld [vmem:[%s3165_s18 + $0x550] sm:$0xff] }
  0xa3   : > { %6548 = vst [vmem:[#allocation138_spill] sm:$0xff] %v3881_v10  ;;  %v3919_v10 = vld [vmem:[%s3165_s18 + $0x548] sm:$0xff]  ;;  %v935_v45 = vadd.f32 %v934_v54, %v722_v28 }
  0xa4   : > { %6549 = vst [vmem:[#allocation139_spill] sm:$0xff] %v3887_v60  ;;  %v3967_v60 = vld [vmem:[%s3165_s18 + $0x670] sm:$0xff]  ;;  %v3983_v28 = vld [vmem:[%s3165_s18 + $0x688] sm:$0xff] }
  0xa5   : > { %6550 = vst [vmem:[#allocation140_spill] sm:$0xff] %v3890_v53  ;;  %v3946_v53 = vld [vmem:[%s3165_s18 + $0x660] sm:$0xff] }
  0xa6   : > { %6551 = vst [vmem:[#allocation141_spill] sm:$0xff] %v3894_v7  ;;  %v650_v7 = vadd.f32 %v3919_v10, %v3908_v57  ;;  %v695_v31 = vadd.f32 %v3946_v53, %v3943_v59 }
  0xa7   : > { %6552 = vst [vmem:[#allocation142_spill] sm:$0xff] %v3905_v34  ;;  %v672_v34 = vadd.f32 %v671_v20, %v3902_v5 }
  0xa8   : > { %6553 = vst [vmem:[#allocation143_spill] sm:$0xff] %v3908_v57  ;;  %v651_v33 = vadd.f32 %v650_v7, %v3922_v41  ;;  %v638_v57 = vadd.f32 %v637_v15, %v636_v12  ;;  %v937_v7 = vsel %vm438_vm0, %v724_v3, 0.0  ;;  %v655_v15 = vsel %vm438_vm0, %v3935_v6, 0.0  ;;  %v3980_v12 = vld [vmem:[%s3165_s18 + $0x678] sm:$0xff] }
  0xa9   : > { %6554 = vst [vmem:[#allocation144_spill] sm:$0xff] %v3915_v23  ;;  %v3970_v23 = vld [vmem:[%s3165_s18 + $0x620] sm:$0xff]  ;;  %v696_v20 = vadd.f32 %v695_v31, %v3949_v22  ;;  %v711_v31 = vmul.f32 %v3286_v50, %v3286_v50  ;;  %v700_v50 = vsel %vm438_vm0, %v3983_v28, 0.0 }
  0xaa   : > { %6555 = vst [vmem:[#allocation145_spill] sm:$0xff] %v3919_v10  ;;  %v723_v10 = vmul.f32 %v3241_v29, %v3241_v29  ;;  %v662_v29 = vadd.f32 %v661_v8, %v3929_v44  ;;  %v652_v54 = vadd.f32 %v651_v33, %v3932_v58  ;;  %v3987_v8 = vld [vmem:[%s3165_s18 + $0x630] sm:$0xff]  ;;  %v686_v3 = vadd.f32 %v3973_v43, %v3970_v23  ;;  %v3993_v33 = vld [vmem:[%s3165_s18 + $0x638] sm:$0xff] }
  0xab   : > { %6556 = vst [vmem:[#allocation146_spill] sm:$0xff] %v3932_v58  ;;  %639 = vadd.xlane.f32.xlu1 %v638_v57  ;;  %v714_v57 = vmul.f32 %v3309_v61, %v3309_v61  ;;  %v716_v61 = vmul.f32 %v3339_v39, %v3339_v39 }
  0xac   : > { %6557 = vst [vmem:[#allocation147_spill] sm:$0xff] %v3935_v6  ;;  %v663_v46 = vadd.f32 %v662_v29, %v3954_v49  ;;  %v3996_v6 = vld [vmem:[%s3165_s18 + $0x650] sm:$0xff]  ;;  %v936_v58 = vadd.f32 %v935_v45, %v723_v10  ;;  %v712_v10 = vmul.f32 %v3295_v55, %v3295_v55  ;;  %v674_v45 = vadd.f32 %v673_v9, %v672_v34  ;;  %v4037_v9 = vld [vmem:[%s3165_s18 + $0x600] sm:$0xff] }
  0xad   : > { %6558 = vst [vmem:[#allocation148_spill] sm:$0xff] %v3943_v59  ;;  %v3999_v59 = vld [vmem:[%s3165_s18 + $0x5e8] sm:$0xff]  ;;  %v4010_v29 = vld [vmem:[%s3165_s18 + $0x5f0] sm:$0xff]  ;;  %v691_v19 = vsel %vm438_vm0, %v3996_v6, 0.0 }
  0xae   : > { %6559 = vst [vmem:[#allocation149_spill] sm:$0xff] %v3946_v53  ;;  %v629_v53 = vadd.f32 %v628_v32, %v627_v51  ;;  %v697_v51 = vadd.f32 %v696_v20, %v3967_v60  ;;  %v687_v32 = vadd.f32 %v686_v3, %v3987_v8  ;;  %v677_v20 = vadd.f32 %v4010_v29, %v3999_v59 }
  0xaf   : > { %6560 = vst [vmem:[#allocation150_spill] sm:$0xff] %v3949_v22  ;;  %v4004_v22 = vld [vmem:[%s3165_s18 + $0x568] sm:$0xff]  ;;  %v713_v3 = vmul.f32 %v3298_v56, %v3298_v56  ;;  %v717_v56 = vmul.f32 %v3353_v47, %v3353_v47  ;;  %v704_v47 = vmul.f32 %v3203_v13, %v3203_v13  ;;  %675 = vadd.xlane.f32.xlu2 %v674_v45 }
  0xb0   : > { %6561 = vst [vmem:[#allocation151_spill] sm:$0xff] %v3954_v49  ;;  %v4020_v49 = vld [vmem:[%s3165_s18 + $0x640] sm:$0xff]  ;;  %v698_v55 = vadd.f32 %v697_v51, %v3980_v12  ;;  %v688_v34 = vadd.f32 %v687_v32, %v3993_v33  ;;  %v4050_v51 = vld [vmem:[%s3165_s18 + $0x608] sm:$0xff]  ;;  %630 = vadd.xlane.f32.xlu0 %v629_v53  ;;  %v709_v45 = vmul.f32 %v3252_v35, %v3252_v35 }
  0xb1   : > { %6562 = vst [vmem:[#allocation152_spill] sm:$0xff] %v3967_v60  ;;  %v4030_v60 = vld [vmem:[%s3165_s18 + $0x680] sm:$0xff]  ;;  %v734_v35 = vmul.f32 %v3174_v2, %v3174_v2 }
  0xb2   : > { %6563 = vst [vmem:[#allocation153_spill] sm:$0xff] %v3970_v23  ;;  %v4013_v23 = vld [vmem:[%s3165_s18 + $0x5f8] sm:$0xff] }
  0xb3   : > { %6564 = vst [vmem:[#allocation154_spill] sm:$0xff] %v3973_v43  ;;  %v653_v43 = vadd.f32 %v652_v54, %v3959_v62  ;;  %v4023_v54 = vld [vmem:[%s3165_s18 + $0x618] sm:$0xff] }
  0xb4   : > { %6565 = vst [vmem:[#allocation155_spill] sm:$0xff] %v3983_v28  ;;  %v682_v32 = vsel %vm438_vm0, %v4023_v54, 0.0 }
  0xb5   : > { %6566 = vst [vmem:[#allocation156_spill] sm:$0xff] %v3987_v8  ;;  %v665_v8 = vadd.f32 %v664_v63, %v663_v46  ;;  %v654_v28 = vadd.f32 %v653_v43, %v4004_v22  ;;  %v4046_v63 = vld [vmem:[%s3165_s18 + $0x648] sm:$0xff]  ;;  %v689_v46 = vadd.f32 %v688_v34, %v4020_v49  ;;  %v923_v43 = vadd.f32 %v712_v10, %v711_v31  ;;  %v4063_v34 = vld [vmem:[%s3165_s18 + $0x610] sm:$0xff] }
  0xb6   : > { %6567 = vst [vmem:[#allocation157_spill] sm:$0xff] %v3996_v6  ;;  %v706_v10 = vmul.f32 %v3214_v18, %v3214_v18  ;;  %v739_v18 = vmul.f32 %v3230_v25, %v3230_v25  ;;  %v745_v25 = vmul.f32 %v3290_v52, %v3290_v52  ;;  %v743_v52 = vmul.f32 %v3270_v42, %v3270_v42 }
  0xb7   : > { %6568 = vst [vmem:[#allocation158_spill] sm:$0xff] %v3999_v59  ;;  %v4041_v59 = vadd.f32 %v937_v7, %v936_v58  ;;  %v705_v7 = vmul.f32 %v3211_v17, %v3211_v17  ;;  %v924_v31 = vadd.f32 %v923_v43, %v713_v3  ;;  %v928_v17 = vsel %vm438_vm0, %v717_v56, 0.0  ;;  %666 = vadd.xlane.f32.xlu1 %v665_v8 }
  0xb8   : > { %6569 = vst [vmem:[#allocation159_spill] sm:$0xff] %v4010_v29  ;;  %v678_v29 = vadd.f32 %v677_v20, %v4013_v23  ;;  %v699_v20 = vadd.f32 %v698_v55, %v4030_v60  ;;  %v690_v55 = vadd.f32 %v689_v46, %v4046_v63  ;;  %v708_v56 = vmul.f32 %v3244_v30, %v3244_v30 }
  0xb9   : > { %6570 = vst [vmem:[#allocation160_spill] sm:$0xff] %v4023_v54  ;;  %v715_v54 = vmul.f32 %v3331_v24, %v3331_v24  ;;  %v925_v53 = vadd.f32 %v924_v31, %v714_v57  ;;  %v710_v24 = vmul.f32 %v3266_v40, %v3266_v40  ;;  %v914_v6 = vadd.f32 %v705_v7, %v704_v47  ;;  %v6572_v47 = vld [vmem:[#allocation2_spill] sm:$0xff]  ;;  %v6573_v31 = vld [vmem:[#allocation4_spill] sm:$0xff] }
  0xba   : > { %6571 = vst [vmem:[#allocation161_spill] sm:$0xff] %v4037_v9  ;;  %v679_v58 = vadd.f32 %v678_v29, %v4037_v9  ;;  %v656_v29 = vadd.f32 %v655_v15, %v654_v28  ;;  %v707_v9 = vmul.f32 %v3223_v21, %v3223_v21  ;;  %v701_v39 = vadd.f32 %v700_v50, %v699_v20 }
  0xbb   : > { %v740_v15 = vmul.f32 %v3233_v26, %v3233_v26  ;;  %v926_v28 = vadd.f32 %v925_v53, %v715_v54  ;;  %v915_v46 = vadd.f32 %v914_v6, %v706_v10  ;;  %v741_v21 = vmul.f32 %v3236_v27, %v3236_v27 }
  0xbc   : > { %v680_v13 = vadd.f32 %v679_v58, %v4050_v51  ;;  %v692_v40 = vadd.f32 %v691_v19, %v690_v55  ;;  %v919_v50 = vsel %vm438_vm0, %v710_v24, 0.0  ;;  %v742_v26 = vmul.f32 %v3255_v36, %v3255_v36  ;;  %657 = vadd.xlane.f32.xlu0 %v656_v29  ;;  %702 = vadd.xlane.f32.xlu2 %v701_v39  ;;  %v6574_v29 = vld [vmem:[#allocation3_spill] sm:$0xff]  ;;  %v6575_v55 = vld [vmem:[#allocation5_spill] sm:$0xff]  ;;  %v6577_v24 = vld [vmem:[#allocation8_spill] sm:$0xff] }
  0xbd   : > { %v916_v57 = vadd.f32 %v915_v46, %v707_v9  ;;  %v959_v54 = vadd.f32 %v740_v15, %v739_v18  ;;  %v732_v30 = vmul.f32 %v3168_v0, %v3168_v0  ;;  %v927_v27 = vadd.f32 %v926_v28, %v716_v61 }
  0xbe   : > { %v681_v3 = vadd.f32 %v680_v13, %v4063_v34  ;;  %v733_v8 = vmul.f32 %v3171_v1, %v3171_v1  ;;  %v744_v36 = vmul.f32 %v3280_v48, %v3280_v48  ;;  %v964_v43 = vsel %vm438_vm0, %v745_v25, 0.0 }
  0xbf   : > { %v917_v19 = vadd.f32 %v916_v57, %v708_v56  ;;  %v960_v9 = vadd.f32 %v959_v54, %v741_v21  ;;  %v735_v0 = vmul.f32 %v3179_v4, %v3179_v4  ;;  %v725_v1 = vmul.f32 %v3258_v37, %v3258_v37  ;;  %693 = vadd.xlane.f32.xlu1 %v692_v40  ;;  %v6579_v56 = vld [vmem:[#allocation6_spill] sm:$0xff]  ;;  %v6581_v40 = vld [vmem:[#allocation11_spill] sm:$0xff] }
  0xc0   : > { %v683_v6 = vadd.f32 %v682_v32, %v681_v3  ;;  %v950_v32 = vadd.f32 %v733_v8, %v732_v30  ;;  %v738_v58 = vmul.f32 %v3206_v14, %v3206_v14  ;;  %v726_v42 = vmul.f32 %v3261_v38, %v3261_v38  ;;  %v6576_v14 = vld [vmem:[#allocation7_spill] sm:$0xff]  ;;  %v6578_v3 = vld [vmem:[#allocation9_spill] sm:$0xff]  ;;  %v6580_v21 = vld [vmem:[#allocation10_spill] sm:$0xff] }
  0xc1   : > { %v918_v20 = vadd.f32 %v917_v19, %v709_v45  ;;  %v961_v2 = vadd.f32 %v960_v9, %v742_v26  ;;  %v929_v48 = vadd.f32 %v928_v17, %v927_v27  ;;  %v736_v7 = vmul.f32 %v6572_v47, %v6572_v47  ;;  %v6582_v27 = vld [vmem:[#allocation12_spill] sm:$0xff] }
  0xc2   : > { %v951_v61 = vadd.f32 %v950_v32, %v734_v35  ;;  %v727_v4 = vmul.f32 %v6573_v31, %v6573_v31  ;;  %v737_v37 = vmul.f32 %v6574_v29, %v6574_v29  ;;  %v728_v13 = vmul.f32 %v6575_v55, %v6575_v55  ;;  %v6583_v35 = vld [vmem:[#allocation13_spill] sm:$0xff]  ;;  %v6585_v32 = vld [vmem:[#allocation14_spill] sm:$0xff]  ;;  %v6588_v47 = vld [vmem:[#allocation16_spill] sm:$0xff] }
  0xc3   : > { %v962_v10 = vadd.f32 %v961_v2, %v743_v52  ;;  %v731_v53 = vmul.f32 %v6576_v14, %v6576_v14  ;;  %v941_v17 = vadd.f32 %v726_v42, %v725_v1  ;;  %v760_v39 = vmul.f32 %v6577_v24, %v6577_v24  ;;  %v6587_v2 = vld [vmem:[#allocation17_spill] sm:$0xff]  ;;  %v6590_v29 = vld [vmem:[#allocation24_spill] sm:$0xff]  ;;  %v6591_v14 = vld [vmem:[#allocation19_spill] sm:$0xff] }
  0xc4   : > { %v952_v38 = vadd.f32 %v951_v61, %v735_v0  ;;  %v761_v18 = vmul.f32 %v6578_v3, %v6578_v3  ;;  %v920_v15 = vadd.f32 %v919_v50, %v918_v20  ;;  %v955_v28 = vsel %vm438_vm0, %v738_v58, 0.0  ;;  %684 = vadd.xlane.f32.xlu0 %v683_v6  ;;  %v6584_v0 = vld [vmem:[#allocation20_spill] sm:$0xff]  ;;  %v6586_v20 = vld [vmem:[#allocation15_spill] sm:$0xff]  ;;  %939 = vadd.xlane.f32.xlu2 %v4041_v59  ;;  %v6594_v3 = vld [vmem:[#allocation22_spill] sm:$0xff] }
  0xc5   : > { %v729_v46 = vmul.f32 %v6579_v56, %v6579_v56  ;;  %v762_v45 = vmul.f32 %v6580_v21, %v6580_v21  ;;  %v963_v25 = vadd.f32 %v962_v10, %v744_v36  ;;  %v730_v26 = vmul.f32 %v6581_v40, %v6581_v40  ;;  %v6595_v21 = vld [vmem:[#allocation29_spill] sm:$0xff] }
  0xc6   : > { %v953_v57 = vadd.f32 %v952_v38, %v736_v7  ;;  %v942_v54 = vadd.f32 %v941_v17, %v727_v4  ;;  %v946_v30 = vsel %vm438_vm0, %v731_v53, 0.0  ;;  %v763_v50 = vmul.f32 %v6582_v27, %v6582_v27  ;;  %v6589_v4 = vld [vmem:[#allocation18_spill] sm:$0xff]  ;;  %v6592_v38 = vld [vmem:[#allocation21_spill] sm:$0xff] }
  0xc7   : > { %v986_v8 = vadd.f32 %v761_v18, %v760_v39  ;;  %v753_v19 = vmul.f32 %v6583_v35, %v6583_v35  ;;  %v766_v36 = vmul.f32 %v6584_v0, %v6584_v0  ;;  %v754_v1 = vmul.f32 %v6585_v32, %v6585_v32  ;;  %930 = vadd.xlane.f32.xlu1 %v929_v48  ;;  %v6596_v40 = vld [vmem:[#allocation25_spill] sm:$0xff]  ;;  %v6598_v35 = vld [vmem:[#allocation35_spill] sm:$0xff] }
  0xc8   : > { %v954_v52 = vadd.f32 %v953_v57, %v737_v37  ;;  %v943_v9 = vadd.f32 %v942_v54, %v728_v13  ;;  %v764_v6 = vmul.f32 %v6586_v20, %v6586_v20  ;;  %v765_v58 = vmul.f32 %v6587_v2, %v6587_v2  ;;  %v6597_v54 = vld [vmem:[#allocation26_spill] sm:$0xff]  ;;  %v6602_v20 = vld [vmem:[#allocation28_spill] sm:$0xff] }
  0xc9   : > { %v987_v42 = vadd.f32 %v986_v8, %v762_v45  ;;  %v755_v7 = vmul.f32 %v6588_v47, %v6588_v47  ;;  %v965_v61 = vadd.f32 %v964_v43, %v963_v25  ;;  %v756_v10 = vmul.f32 %v6589_v4, %v6589_v4  ;;  %v6593_v43 = vld [vmem:[#allocation23_spill] sm:$0xff] }
  0xca   : > { %v944_v31 = vadd.f32 %v943_v9, %v729_v46  ;;  %v759_v37 = vmul.f32 %v6590_v29, %v6590_v29  ;;  %v977_v13 = vadd.f32 %v754_v1, %v753_v19  ;;  %v746_v53 = vmul.f32 %v6591_v14, %v6591_v14  ;;  %v6599_v19 = vld [vmem:[#allocation27_spill] sm:$0xff]  ;;  %v6600_v9 = vld [vmem:[#allocation30_spill] sm:$0xff] }
  0xcb   : > { %v988_v55 = vadd.f32 %v987_v42, %v763_v50  ;;  %v747_v17 = vmul.f32 %v6592_v38, %v6592_v38  ;;  %v956_v24 = vadd.f32 %v955_v28, %v954_v52  ;;  %v991_v59 = vsel %vm438_vm0, %v766_v36, 0.0  ;;  %v6601_v36 = vld [vmem:[#allocation34_spill] sm:$0xff]  ;;  %v6604_v47 = vld [vmem:[#allocation43_spill] sm:$0xff]  ;;  %v6608_v38 = vld [vmem:[#allocation36_spill] sm:$0xff] }
  0xcc   : > { %v757_v39 = vmul.f32 %v6593_v43, %v6593_v43  ;;  %v748_v18 = vmul.f32 %v6594_v3, %v6594_v3  ;;  %v945_v56 = vadd.f32 %v944_v31, %v730_v26  ;;  %v758_v45 = vmul.f32 %v6595_v21, %v6595_v21  ;;  %921 = vadd.xlane.f32.xlu0 %v920_v15 }
  0xcd   : > { %v989_v46 = vadd.f32 %v988_v55, %v764_v6  ;;  %v978_v25 = vadd.f32 %v977_v13, %v755_v7  ;;  %v982_v57 = vsel %vm438_vm0, %v759_v37, 0.0  ;;  %v749_v48 = vmul.f32 %v6596_v40, %v6596_v40  ;;  %966 = vadd.xlane.f32.xlu2 %v965_v61  ;;  %v6606_v37 = vld [vmem:[#allocation33_spill] sm:$0xff] }
  0xce   : > { %v968_v28 = vadd.f32 %v747_v17, %v746_v53  ;;  %v781_v27 = vmul.f32 %v6597_v54, %v6597_v54  ;;  %v752_v26 = vmul.f32 %v6598_v35, %v6598_v35  ;;  %v782_v52 = vmul.f32 %v6599_v19, %v6599_v19  ;;  %v6615_v35 = vld [vmem:[#allocation49_spill] sm:$0xff] }
  0xcf   : > { %v990_v50 = vadd.f32 %v989_v46, %v765_v58  ;;  %v979_v8 = vadd.f32 %v978_v25, %v756_v10  ;;  %v750_v0 = vmul.f32 %v6600_v9, %v6600_v9  ;;  %v751_v32 = vmul.f32 %v6601_v36, %v6601_v36  ;;  %v6603_v58 = vld [vmem:[#allocation31_spill] sm:$0xff]  ;;  %v6605_v10 = vld [vmem:[#allocation32_spill] sm:$0xff]  ;;  %957 = vadd.xlane.f32.xlu1 %v956_v24  ;;  %v6610_v46 = vld [vmem:[#allocation38_spill] sm:$0xff] }
  0xd0   : > { %v969_v1 = vadd.f32 %v968_v28, %v748_v18  ;;  %v783_v6 = vmul.f32 %v6602_v20, %v6602_v20  ;;  %v947_v2 = vadd.f32 %v946_v30, %v945_v56  ;;  %v784_v42 = vmul.f32 %v6603_v58, %v6603_v58  ;;  %v6607_v30 = vld [vmem:[#allocation37_spill] sm:$0xff]  ;;  %v6611_v25 = vld [vmem:[#allocation39_spill] sm:$0xff]  ;;  %v6612_v28 = vld [vmem:[#allocation44_spill] sm:$0xff] }
  0xd1   : > { %v980_v15 = vadd.f32 %v979_v8, %v757_v39  ;;  %v787_v7 = vmul.f32 %v6604_v47, %v6604_v47  ;;  %v1013_v4 = vadd.f32 %v782_v52, %v781_v27  ;;  %v774_v29 = vmul.f32 %v6605_v10, %v6605_v10  ;;  %v6609_v39 = vld [vmem:[#allocation40_spill] sm:$0xff]  ;;  %v6613_v24 = vld [vmem:[#allocation50_spill] sm:$0xff]  ;;  %v6614_v27 = vld [vmem:[#allocation41_spill] sm:$0xff] }
  0xd2   : > { %v970_v31 = vadd.f32 %v969_v1, %v749_v48  ;;  %v775_v55 = vmul.f32 %v6606_v37, %v6606_v37  ;;  %v992_v13 = vadd.f32 %v991_v59, %v990_v50  ;;  %v973_v14 = vsel %vm438_vm0, %v752_v26, 0.0  ;;  %v6616_v52 = vld [vmem:[#allocation42_spill] sm:$0xff]  ;;  %v6617_v1 = vld [vmem:[#allocation45_spill] sm:$0xff] }
  0xd3   : > { %v785_v53 = vmul.f32 %v6607_v30, %v6607_v30  ;;  %v776_v17 = vmul.f32 %v6608_v38, %v6608_v38  ;;  %v981_v43 = vadd.f32 %v980_v15, %v758_v45  ;;  %v786_v3 = vmul.f32 %v6609_v39, %v6609_v39  ;;  %v6619_v47 = vld [vmem:[#allocation46_spill] sm:$0xff] }
  0xd4   : > { %v971_v61 = vadd.f32 %v970_v31, %v750_v0  ;;  %v1014_v18 = vadd.f32 %v1013_v4, %v783_v6  ;;  %v1018_v56 = vsel %vm438_vm0, %v787_v7, 0.0  ;;  %v777_v59 = vmul.f32 %v6610_v46, %v6610_v46  ;;  %948 = vadd.xlane.f32.xlu0 %v947_v2  ;;  %v6618_v6 = vld [vmem:[#allocation56_spill] sm:$0xff]  ;;  %v6620_v2 = vld [vmem:[#allocation47_spill] sm:$0xff] }
  0xd5   : > { %v1004_v21 = vadd.f32 %v775_v55, %v774_v29  ;;  %v767_v40 = vmul.f32 %v6611_v25, %v6611_v25  ;;  %v778_v54 = vmul.f32 %v6612_v28, %v6612_v28  ;;  %v780_v45 = vmul.f32 %v6613_v24, %v6613_v24  ;;  %993 = vadd.xlane.f32.xlu2 %v992_v13  ;;  %v6622_v29 = vld [vmem:[#allocation48_spill] sm:$0xff]  ;;  %v6627_v25 = vld [vmem:[#allocation54_spill] sm:$0xff] }
  0xd6   : > { %v1015_v48 = vadd.f32 %v1014_v18, %v784_v42  ;;  %v768_v50 = vmul.f32 %v6614_v27, %v6614_v27  ;;  %v972_v8 = vadd.f32 %v971_v61, %v751_v32  ;;  %v779_v26 = vmul.f32 %v6615_v35, %v6615_v35  ;;  %v6624_v61 = vld [vmem:[#allocation52_spill] sm:$0xff]  ;;  %v6628_v28 = vld [vmem:[#allocation58_spill] sm:$0xff]  ;;  %v6630_v35 = vld [vmem:[#allocation61_spill] sm:$0xff] }
  0xd7   : > { %v1005_v19 = vadd.f32 %v1004_v21, %v776_v17  ;;  %v769_v9 = vmul.f32 %v6616_v52, %v6616_v52  ;;  %v983_v0 = vadd.f32 %v982_v57, %v981_v43  ;;  %v770_v20 = vmul.f32 %v6617_v1, %v6617_v1  ;;  %v6621_v57 = vld [vmem:[#allocation51_spill] sm:$0xff]  ;;  %v6626_v21 = vld [vmem:[#allocation64_spill] sm:$0xff]  ;;  %v6633_v1 = vld [vmem:[#allocation62_spill] sm:$0xff] }
  0xd8   : > { %v1016_v36 = vadd.f32 %v1015_v48, %v785_v53  ;;  %v773_v15 = vmul.f32 %v6618_v6, %v6618_v6  ;;  %v995_v42 = vadd.f32 %v768_v50, %v767_v40  ;;  %v802_v32 = vmul.f32 %v6619_v47, %v6619_v47  ;;  %v6623_v53 = vld [vmem:[#allocation55_spill] sm:$0xff] }
  0xd9   : > { %v1006_v58 = vadd.f32 %v1005_v19, %v777_v59  ;;  %v803_v7 = vmul.f32 %v6620_v2, %v6620_v2  ;;  %v1009_v4 = vsel %vm438_vm0, %v780_v45, 0.0  ;;  %v771_v10 = vmul.f32 %v6621_v57, %v6621_v57  ;;  %984 = vadd.xlane.f32.xlu1 %v983_v0  ;;  %v6629_v45 = vld [vmem:[#allocation57_spill] sm:$0xff]  ;;  %v6631_v19 = vld [vmem:[#allocation59_spill] sm:$0xff] }
  0xda   : > { %v1017_v31 = vadd.f32 %v1016_v36, %v786_v3  ;;  %v804_v37 = vmul.f32 %v6622_v29, %v6622_v29  ;;  %v974_v55 = vadd.f32 %v973_v14, %v972_v8  ;;  %v772_v38 = vmul.f32 %v6623_v53, %v6623_v53  ;;  %v6625_v3 = vld [vmem:[#allocation53_spill] sm:$0xff]  ;;  %v6632_v36 = vld [vmem:[#allocation60_spill] sm:$0xff]  ;;  %v6635_v47 = vld [vmem:[#allocation63_spill] sm:$0xff] }
  0xdb   : > { %v1007_v30 = vadd.f32 %v1006_v58, %v778_v54  ;;  %v996_v17 = vadd.f32 %v995_v42, %v769_v9  ;;  %v1000_v43 = vsel %vm438_vm0, %v773_v15, 0.0  ;;  %v805_v13 = vmul.f32 %v6624_v61, %v6624_v61  ;;  %v6634_v58 = vld [vmem:[#allocation71_spill] sm:$0xff] }
  0xdc   : > { %v1040_v39 = vadd.f32 %v803_v7, %v802_v32  ;;  %v795_v18 = vmul.f32 %v6625_v3, %v6625_v3  ;;  %v808_v14 = vmul.f32 %v6626_v21, %v6626_v21  ;;  %v796_v40 = vmul.f32 %v6627_v25, %v6627_v25  ;;  %975 = vadd.xlane.f32.xlu0 %v974_v55  ;;  %v6636_v7 = vld [vmem:[#allocation65_spill] sm:$0xff]  ;;  %v6639_v53 = vld [vmem:[#allocation67_spill] sm:$0xff]  ;;  %v6641_v3 = vld [vmem:[#allocation68_spill] sm:$0xff] }
  0xdd   : > { %v1008_v46 = vadd.f32 %v1007_v30, %v779_v26  ;;  %v997_v59 = vadd.f32 %v996_v17, %v770_v20  ;;  %v1019_v48 = vadd.f32 %v1018_v56, %v1017_v31  ;;  %v806_v54 = vmul.f32 %v6628_v28, %v6628_v28  ;;  %v6644_v28 = vld [vmem:[#allocation76_spill] sm:$0xff] }
  0xde   : > { %v1041_v24 = vadd.f32 %v1040_v39, %v804_v37  ;;  %v797_v27 = vmul.f32 %v6629_v45, %v6629_v45  ;;  %v807_v26 = vmul.f32 %v6630_v35, %v6630_v35  ;;  %v798_v52 = vmul.f32 %v6631_v19, %v6631_v19  ;;  %v6638_v37 = vld [vmem:[#allocation66_spill] sm:$0xff] }
  0xdf   : > { %v1010_v50 = vadd.f32 %v1009_v4, %v1008_v46  ;;  %v998_v8 = vadd.f32 %v997_v59, %v771_v10  ;;  %v1031_v0 = vadd.f32 %v796_v40, %v795_v18  ;;  %v788_v56 = vmul.f32 %v6632_v36, %v6632_v36  ;;  %1020 = vadd.xlane.f32.xlu2 %v1019_v48  ;;  %v6637_v4 = vld [vmem:[#allocation70_spill] sm:$0xff]  ;;  %v6642_v59 = vld [vmem:[#allocation72_spill] sm:$0xff] }
  0xe0   : > { %v1042_v9 = vadd.f32 %v1041_v24, %v805_v13  ;;  %v789_v20 = vmul.f32 %v6633_v1, %v6633_v1  ;;  %v1045_v15 = vsel %vm438_vm0, %v808_v14, 0.0  ;;  %v801_v42 = vmul.f32 %v6634_v58, %v6634_v58  ;;  %v6640_v13 = vld [vmem:[#allocation81_spill] sm:$0xff]  ;;  %v6649_v1 = vld [vmem:[#allocation78_spill] sm:$0xff] }
  0xe1   : > { %v999_v6 = vadd.f32 %v998_v8, %v772_v38  ;;  %v790_v32 = vmul.f32 %v6635_v47, %v6635_v47  ;;  %v799_v31 = vmul.f32 %v6636_v7, %v6636_v7  ;;  %v800_v57 = vmul.f32 %v6637_v4, %v6637_v4  ;;  %1011 = vadd.xlane.f32.xlu1 %v1010_v50  ;;  %v6643_v14 = vld [vmem:[#allocation69_spill] sm:$0xff]  ;;  %v6646_v8 = vld [vmem:[#allocation74_spill] sm:$0xff]  ;;  %v6651_v47 = vld [vmem:[#allocation79_spill] sm:$0xff] }
  0xe2   : > { %v1043_v2 = vadd.f32 %v1042_v9, %v806_v54  ;;  %v1032_v10 = vadd.f32 %v1031_v0, %v797_v27  ;;  %v791_v55 = vmul.f32 %v6638_v37, %v6638_v37  ;;  %v1022_v30 = vadd.f32 %v789_v20, %v788_v56  ;;  %v6645_v24 = vld [vmem:[#allocation73_spill] sm:$0xff]  ;;  %v6652_v7 = vld [vmem:[#allocation80_spill] sm:$0xff]  ;;  %v6654_v37 = vld [vmem:[#allocation82_spill] sm:$0xff] }
  0xe3   : > { %v1001_v29 = vadd.f32 %v1000_v43, %v999_v6  ;;  %v823_v38 = vmul.f32 %v6639_v53, %v6639_v53  ;;  %v794_v39 = vmul.f32 %v6640_v13, %v6640_v13  ;;  %v824_v18 = vmul.f32 %v6641_v3, %v6641_v3  ;;  %v6648_v0 = vld [vmem:[#allocation77_spill] sm:$0xff]  ;;  %v6650_v6 = vld [vmem:[#allocation90_spill] sm:$0xff] }
  0xe4   : > { %v1044_v17 = vadd.f32 %v1043_v2, %v807_v26  ;;  %v1033_v61 = vadd.f32 %v1032_v10, %v798_v52  ;;  %v1036_v46 = vsel %vm438_vm0, %v801_v42, 0.0  ;;  %v792_v43 = vmul.f32 %v6642_v59, %v6642_v59  ;;  %v6647_v26 = vld [vmem:[#allocation75_spill] sm:$0xff] }
  0xe5   : > { %v1023_v21 = vadd.f32 %v1022_v30, %v790_v32  ;;  %v825_v25 = vmul.f32 %v6643_v14, %v6643_v14  ;;  %v793_v54 = vmul.f32 %v6644_v28, %v6644_v28  ;;  %v826_v45 = vmul.f32 %v6645_v24, %v6645_v24  ;;  %1002 = vadd.xlane.f32.xlu0 %v1001_v29  ;;  %v6655_v30 = vld [vmem:[#allocation85_spill] sm:$0xff]  ;;  %v4304_v28 = vpop.xlane.xlu1 %459  ;;  %v6660_v24 = vld [vmem:[#allocation87_spill] sm:$0xff] }
  0xe6   : > { %v1046_v40 = vadd.f32 %v1045_v15, %v1044_v17  ;;  %v1034_v48 = vadd.f32 %v1033_v61, %v799_v31  ;;  %v1067_v50 = vadd.f32 %v824_v18, %v823_v38  ;;  %v816_v35 = vmul.f32 %v6646_v8, %v6646_v8  ;;  %v6656_v17 = vld [vmem:[#allocation83_spill] sm:$0xff] }
  0xe7   : > { %v1024_v27 = vadd.f32 %v1023_v21, %v791_v55  ;;  %v817_v19 = vmul.f32 %v6647_v26, %v6647_v26  ;;  %v1027_v9 = vsel %vm438_vm0, %v794_v39, 0.0  ;;  %v818_v36 = vmul.f32 %v6648_v0, %v6648_v0  ;;  %v4295_v39 = vpop.xlane.xlu2 %477  ;;  %v6663_v0 = vld [vmem:[#allocation99_spill] sm:$0xff] }
  0xe8   : > { %v1035_v52 = vadd.f32 %v1034_v48, %v800_v57  ;;  %v827_v20 = vmul.f32 %v6649_v1, %v6649_v1  ;;  %v829_v15 = vmul.f32 %v6650_v6, %v6650_v6  ;;  %v1068_v58 = vadd.f32 %v1067_v50, %v825_v25  ;;  %1047 = vadd.xlane.f32.xlu2 %v1046_v40  ;;  %v6653_v57 = vld [vmem:[#allocation84_spill] sm:$0xff]  ;;  %v6659_v25 = vld [vmem:[#allocation86_spill] sm:$0xff] }
  0xe9   : > { %v1025_v56 = vadd.f32 %v1024_v27, %v792_v43  ;;  %v819_v32 = vmul.f32 %v6651_v47, %v6651_v47  ;;  %v1058_v2 = vadd.f32 %v817_v19, %v816_v35  ;;  %v809_v31 = vmul.f32 %v6652_v7, %v6652_v7  ;;  %v6658_v43 = vld [vmem:[#allocation91_spill] sm:$0xff]  ;;  %v6661_v27 = vld [vmem:[#allocation88_spill] sm:$0xff]  ;;  %v6666_v47 = vld [vmem:[#allocation93_spill] sm:$0xff] }
  0xea   : > { %v1037_v42 = vadd.f32 %v1036_v46, %v1035_v52  ;;  %v828_v10 = vmul.f32 %v6653_v57, %v6653_v57  ;;  %v1069_v29 = vadd.f32 %v1068_v58, %v826_v45  ;;  %v810_v55 = vmul.f32 %v6654_v37, %v6654_v37  ;;  %v6657_v46 = vld [vmem:[#allocation96_spill] sm:$0xff]  ;;  %v6667_v7 = vld [vmem:[#allocation94_spill] sm:$0xff] }
  0xeb   : > { %v1026_v4 = vadd.f32 %v1025_v56, %v793_v54  ;;  %v820_v53 = vmul.f32 %v6655_v30, %v6655_v30  ;;  %v1059_v38 = vadd.f32 %v1058_v2, %v818_v36  ;;  %v811_v61 = vmul.f32 %v6656_v17, %v6656_v17  ;;  %v6662_v35 = vld [vmem:[#allocation92_spill] sm:$0xff]  ;;  %v6664_v56 = vld [vmem:[#allocation89_spill] sm:$0xff]  ;;  %v6670_v17 = vld [vmem:[#allocation98_spill] sm:$0xff] }
  0xec   : > { %1038 = vadd.xlane.f32.xlu1 %v1037_v42  ;;  %v1070_v3 = vadd.f32 %v1069_v29, %v827_v20  ;;  %v1072_v18 = vsel %vm438_vm0, %v829_v15, 0.0  ;;  %v822_v59 = vmul.f32 %v6657_v46, %v6657_v46  ;;  %v821_v21 = vmul.f32 %v6658_v43, %v6658_v43  ;;  %v4317_v20 = vpop.xlane.xlu0 %441  ;;  %v6665_v15 = vld [vmem:[#allocation97_spill] sm:$0xff]  ;;  %v6669_v30 = vld [vmem:[#allocation100_spill] sm:$0xff]  ;;  %v6672_v46 = vld [vmem:[#allocation103_spill] sm:$0xff] }
  0xed   : > { %v1028_v13 = vadd.f32 %v1027_v9, %v1026_v4  ;;  %v1060_v14 = vadd.f32 %v1059_v38, %v819_v32  ;;  %v812_v40 = vmul.f32 %v6659_v25, %v6659_v25  ;;  %v1049_v48 = vadd.f32 %v810_v55, %v809_v31  ;;  %v6668_v4 = vld [vmem:[#allocation95_spill] sm:$0xff]  ;;  %v6673_v43 = vld [vmem:[#allocation101_spill] sm:$0xff] }
  0xee   : > { %v1071_v54 = vadd.f32 %v1070_v3, %v828_v10  ;;  %v844_v45 = vmul.f32 %v6660_v24, %v6660_v24  ;;  %v845_v50 = vmul.f32 %v6661_v27, %v6661_v27  ;;  %v813_v26 = vmul.f32 %v6662_v35, %v6662_v35  ;;  %v6671_v3 = vld [vmem:[#allocation106_spill] sm:$0xff]  ;;  %v6675_v24 = vld [vmem:[#allocation104_spill] sm:$0xff] }
  0xef   : > { %1029 = vadd.xlane.f32.xlu0 %v1028_v13  ;;  %v1061_v8 = vadd.f32 %v1060_v14, %v820_v53  ;;  %v1050_v19 = vadd.f32 %v1049_v48, %v811_v61  ;;  %v1063_v9 = vsel %vm438_vm0, %v822_v59, 0.0  ;;  %v815_v36 = vmul.f32 %v6663_v0, %v6663_v0  ;;  %v4328_v55 = vpop.xlane.xlu2 %486  ;;  %v4340_v14 = vpop.xlane.xlu1 %468  ;;  %v6674_v48 = vld [vmem:[#allocation102_spill] sm:$0xff] }
  0xf0   : > { %v1073_v52 = vadd.f32 %v1072_v18, %v1071_v54  ;;  %v846_v1 = vmul.f32 %v6664_v56, %v6664_v56  ;;  %v814_v58 = vmul.f32 %v6665_v15, %v6665_v15  ;;  %v847_v32 = vmul.f32 %v6666_v47, %v6666_v47 }
  0xf1   : > { %v1062_v6 = vadd.f32 %v1061_v8, %v821_v21  ;;  %v1051_v42 = vadd.f32 %v1050_v19, %v812_v40  ;;  %v1094_v2 = vadd.f32 %v845_v50, %v844_v45  ;;  %v837_v31 = vmul.f32 %v6667_v7, %v6667_v7  ;;  %v6676_v8 = vld [vmem:[#allocation107_spill] sm:$0xff]  ;;  %v6677_v19 = vld [vmem:[#allocation105_spill] sm:$0xff] }
  0xf2   : > { %1074 = vadd.xlane.f32.xlu2 %v1073_v52  ;;  %v838_v57 = vmul.f32 %v6668_v4, %v6668_v4  ;;  %v1054_v37 = vsel %vm438_vm0, %v815_v36, 0.0  ;;  %v848_v53 = vmul.f32 %v6669_v30, %v6669_v30  ;;  %v839_v61 = vmul.f32 %v6670_v17, %v6670_v17  ;;  %v6678_v36 = vld [vmem:[#allocation113_spill] sm:$0xff] }
  0xf3   : > { %v1064_v10 = vadd.f32 %v1063_v9, %v1062_v6  ;;  %v1052_v29 = vadd.f32 %v1051_v42, %v813_v26  ;;  %v1095_v38 = vadd.f32 %v1094_v2, %v846_v1  ;;  %v849_v18 = vmul.f32 %v6671_v3, %v6671_v3  ;;  %v6679_v1 = vld [vmem:[#allocation108_spill] sm:$0xff]  ;;  %v6680_v42 = vld [vmem:[#allocation109_spill] sm:$0xff]  ;;  %v6681_v2 = vld [vmem:[#allocation114_spill] sm:$0xff] }
  0xf4   : > { %v850_v59 = vmul.f32 %v6672_v46, %v6672_v46  ;;  %v840_v21 = vmul.f32 %v6673_v43, %v6673_v43  ;;  %v1085_v40 = vadd.f32 %v838_v57, %v837_v31  ;;  %v830_v54 = vmul.f32 %v6674_v48, %v6674_v48  ;;  %v4350_v9 = vpop.xlane.xlu0 %450  ;;  %v6682_v31 = vld [vmem:[#allocation110_spill] sm:$0xff]  ;;  %v6683_v57 = vld [vmem:[#allocation111_spill] sm:$0xff] }
  0xf5   : > { %1065 = vadd.xlane.f32.xlu1 %v1064_v10  ;;  %v1053_v13 = vadd.f32 %v1052_v29, %v814_v58  ;;  %v1096_v25 = vadd.f32 %v1095_v38, %v847_v32  ;;  %v831_v45 = vmul.f32 %v6675_v24, %v6675_v24  ;;  %v841_v35 = vmul.f32 %v6676_v8, %v6676_v8  ;;  %v6684_v38 = vld [vmem:[#allocation112_spill] sm:$0xff] }
  0xf6   : > { %v1086_v26 = vadd.f32 %v1085_v40, %v839_v61  ;;  %v832_v52 = vmul.f32 %v6677_v19, %v6677_v19  ;;  %v1099_v0 = vsel %vm438_vm0, %v850_v59, 0.0  ;;  %v842_v56 = vmul.f32 %v6678_v36, %v6678_v36  ;;  %v6691_v36 = vld [vmem:[#allocation122_spill] sm:$0xff] }
  0xf7   : > { %v1055_v27 = vadd.f32 %v1054_v37, %v1053_v13  ;;  %v1097_v50 = vadd.f32 %v1096_v25, %v848_v53  ;;  %v843_v6 = vmul.f32 %v6679_v1, %v6679_v1  ;;  %v833_v47 = vmul.f32 %v6680_v42, %v6680_v42  ;;  %v4365_v53 = vpop.xlane.xlu2 %513  ;;  %v6685_v13 = vld [vmem:[#allocation119_spill] sm:$0xff]  ;;  %v6687_v25 = vld [vmem:[#allocation116_spill] sm:$0xff]  ;;  %v6692_v1 = vld [vmem:[#allocation121_spill] sm:$0xff] }
  0xf8   : > { %v1087_v58 = vadd.f32 %v1086_v26, %v840_v21  ;;  %v1076_v32 = vadd.f32 %v831_v45, %v830_v54  ;;  %v834_v7 = vmul.f32 %v6681_v2, %v6681_v2  ;;  %v865_v4 = vmul.f32 %v6682_v31, %v6682_v31  ;;  %v4374_v21 = vpop.xlane.xlu1 %504  ;;  %v6688_v54 = vld [vmem:[#allocation117_spill] sm:$0xff]  ;;  %v6689_v45 = vld [vmem:[#allocation118_spill] sm:$0xff]  ;;  %v6695_v31 = vld [vmem:[#allocation124_spill] sm:$0xff] }
  0xf9   : > { %1056 = vadd.xlane.f32.xlu0 %v1055_v27  ;;  %v1098_v15 = vadd.f32 %v1097_v50, %v849_v18  ;;  %v866_v10 = vmul.f32 %v6683_v57, %v6683_v57  ;;  %v867_v17 = vmul.f32 %v6684_v38, %v6684_v38  ;;  %v1090_v61 = vsel %vm438_vm0, %v843_v6, 0.0  ;;  %v6686_v18 = vld [vmem:[#allocation115_spill] sm:$0xff]  ;;  %v6696_v57 = vld [vmem:[#allocation126_spill] sm:$0xff] }
  0xfa   : > { %v1088_v37 = vadd.f32 %v1087_v58, %v841_v35  ;;  %v1077_v30 = vadd.f32 %v1076_v32, %v832_v52  ;;  %v835_v3 = vmul.f32 %v6685_v13, %v6685_v13  ;;  %v836_v46 = vmul.f32 %v6686_v18, %v6686_v18  ;;  %v6690_v35 = vld [vmem:[#allocation120_spill] sm:$0xff]  ;;  %v6694_v32 = vld [vmem:[#allocation123_spill] sm:$0xff]  ;;  %v6698_v13 = vld [vmem:[#allocation129_spill] sm:$0xff] }
  0xfb   : > { %v1100_v29 = vadd.f32 %v1099_v0, %v1098_v15  ;;  %v868_v40 = vmul.f32 %v6687_v25, %v6687_v25  ;;  %v1121_v48 = vadd.f32 %v866_v10, %v865_v4  ;;  %v858_v24 = vmul.f32 %v6688_v54, %v6688_v54  ;;  %v6693_v58 = vld [vmem:[#allocation128_spill] sm:$0xff] }
  0xfc   : > { %v1089_v59 = vadd.f32 %v1088_v37, %v842_v56  ;;  %v1078_v43 = vadd.f32 %v1077_v30, %v833_v47  ;;  %v859_v27 = vmul.f32 %v6689_v45, %v6689_v45  ;;  %v869_v26 = vmul.f32 %v6690_v35, %v6690_v35  ;;  %v4385_v0 = vpop.xlane.xlu0 %495  ;;  %v6697_v30 = vld [vmem:[#allocation127_spill] sm:$0xff]  ;;  %v6700_v45 = vld [vmem:[#allocation133_spill] sm:$0xff] }
  0xfd   : > { %1101 = vadd.xlane.f32.xlu2 %v1100_v29  ;;  %v1122_v19 = vadd.f32 %v1121_v48, %v867_v17  ;;  %v1081_v52 = vsel %vm438_vm0, %v836_v46, 0.0  ;;  %v871_v56 = vmul.f32 %v6691_v36, %v6691_v36  ;;  %v860_v6 = vmul.f32 %v6692_v1, %v6692_v1  ;;  %v6703_v36 = vld [vmem:[#allocation131_spill] sm:$0xff] }
  0xfe   : > { %v1091_v50 = vadd.f32 %v1090_v61, %v1089_v59  ;;  %v1079_v8 = vadd.f32 %v1078_v43, %v834_v7  ;;  %v870_v42 = vmul.f32 %v6693_v58, %v6693_v58  ;;  %v861_v2 = vmul.f32 %v6694_v32, %v6694_v32  ;;  %v6699_v59 = vld [vmem:[#allocation125_spill] sm:$0xff]  ;;  %v6705_v58 = vld [vmem:[#allocation135_spill] sm:$0xff] }
  0xff   : > { %v1123_v47 = vadd.f32 %v1122_v19, %v868_v40  ;;  %v1112_v7 = vadd.f32 %v859_v27, %v858_v24  ;;  %v851_v4 = vmul.f32 %v6695_v31, %v6695_v31  ;;  %v852_v10 = vmul.f32 %v6696_v57, %v6696_v57  ;;  %v4401_v17 = vpop.xlane.xlu2 %540 }
 0x100   : > { %1092 = vadd.xlane.f32.xlu1 %v1091_v50  ;;  %v1080_v15 = vadd.f32 %v1079_v8, %v835_v3  ;;  %v853_v38 = vmul.f32 %v6697_v30, %v6697_v30  ;;  %v1126_v61 = vsel %vm438_vm0, %v871_v56, 0.0  ;;  %v862_v3 = vmul.f32 %v6698_v13, %v6698_v13  ;;  %v4410_v48 = vpop.xlane.xlu1 %531  ;;  %v6701_v50 = vld [vmem:[#allocation130_spill] sm:$0xff]  ;;  %v6709_v13 = vld [vmem:[#allocation139_spill] sm:$0xff] }
 0x101   : > { %v1124_v37 = vadd.f32 %v1123_v47, %v869_v26  ;;  %v1113_v18 = vadd.f32 %v1112_v7, %v860_v6  ;;  %v864_v43 = vmul.f32 %v6699_v59, %v6699_v59  ;;  %v854_v25 = vmul.f32 %v3835_v16, %v3835_v16  ;;  %v6702_v26 = vld [vmem:[#allocation134_spill] sm:$0xff]  ;;  %v6704_v6 = vld [vmem:[#allocation132_spill] sm:$0xff] }
 0x102   : > { %v1082_v29 = vadd.f32 %v1081_v52, %v1080_v15  ;;  %v1103_v40 = vadd.f32 %v852_v10, %v851_v4  ;;  %v863_v54 = vmul.f32 %v3856_v11, %v3856_v11  ;;  %v855_v27 = vmul.f32 %v6700_v45, %v6700_v45  ;;  %v6707_v10 = vld [vmem:[#allocation137_spill] sm:$0xff] }
 0x103   : > { %v1125_v46 = vadd.f32 %v1124_v37, %v870_v42  ;;  %v1114_v24 = vadd.f32 %v1113_v18, %v861_v2  ;;  %v886_v8 = vmul.f32 %v6701_v50, %v6701_v50  ;;  %v857_v19 = vmul.f32 %v6702_v26, %v6702_v26  ;;  %v6706_v2 = vld [vmem:[#allocation136_spill] sm:$0xff]  ;;  %v6708_v37 = vld [vmem:[#allocation138_spill] sm:$0xff] }
 0x104   : > { %1083 = vadd.xlane.f32.xlu0 %v1082_v29  ;;  %v1104_v52 = vadd.f32 %v1103_v40, %v853_v38  ;;  %v887_v16 = vmul.f32 %v6703_v36, %v6703_v36  ;;  %v4422_v1 = vpop.xlane.xlu0 %522  ;;  %v888_v11 = vmul.f32 %v6704_v6, %v6704_v6  ;;  %v1117_v15 = vsel %vm438_vm0, %v864_v43, 0.0  ;;  %v6711_v40 = vld [vmem:[#allocation140_spill] sm:$0xff] }
 0x105   : > { %v1127_v35 = vadd.f32 %v1126_v61, %v1125_v46  ;;  %v1115_v56 = vadd.f32 %v1114_v24, %v862_v3  ;;  %v856_v42 = vmul.f32 %v6705_v58, %v6705_v58  ;;  %v889_v7 = vmul.f32 %v6706_v2, %v6706_v2  ;;  %v6710_v46 = vld [vmem:[#allocation141_spill] sm:$0xff]  ;;  %v6715_v6 = vld [vmem:[#allocation144_spill] sm:$0xff] }
 0x106   : > { %v1105_v47 = vadd.f32 %v1104_v52, %v854_v25  ;;  %v1148_v31 = vadd.f32 %v887_v16, %v886_v8  ;;  %v1108_v57 = vsel %vm438_vm0, %v857_v19, 0.0  ;;  %v879_v29 = vmul.f32 %v6707_v10, %v6707_v10  ;;  %v6714_v52 = vld [vmem:[#allocation145_spill] sm:$0xff]  ;;  %v6718_v10 = vld [vmem:[#allocation148_spill] sm:$0xff] }
 0x107   : > { %1128 = vadd.xlane.f32.xlu2 %v1127_v35  ;;  %v1116_v32 = vadd.f32 %v1115_v56, %v863_v54  ;;  %v880_v30 = vmul.f32 %v6708_v37, %v6708_v37  ;;  %v4436_v38 = vpop.xlane.xlu2 %567  ;;  %v890_v3 = vmul.f32 %v6709_v13, %v6709_v13  ;;  %v881_v59 = vmul.f32 %v6710_v46, %v6710_v46  ;;  %v6713_v35 = vld [vmem:[#allocation143_spill] sm:$0xff] }
 0x108   : > { %v1106_v4 = vadd.f32 %v1105_v47, %v855_v27  ;;  %v1149_v18 = vadd.f32 %v1148_v31, %v888_v11  ;;  %v891_v25 = vmul.f32 %v3902_v5, %v3902_v5  ;;  %v892_v54 = vmul.f32 %v6711_v40, %v6711_v40  ;;  %v4446_v24 = vpop.xlane.xlu1 %558  ;;  %v6712_v27 = vld [vmem:[#allocation142_spill] sm:$0xff]  ;;  %v6717_v31 = vld [vmem:[#allocation151_spill] sm:$0xff] }
 0x109   : > { %v1118_v61 = vadd.f32 %v1117_v15, %v1116_v32  ;;  %v882_v50 = vmul.f32 %v6712_v27, %v6712_v27  ;;  %v1139_v8 = vadd.f32 %v880_v30, %v879_v29  ;;  %v872_v26 = vmul.f32 %v6713_v35, %v6713_v35  ;;  %v6716_v47 = vld [vmem:[#allocation146_spill] sm:$0xff]  ;;  %v6722_v27 = vld [vmem:[#allocation152_spill] sm:$0xff] }
 0x10a   : > { %v1107_v43 = vadd.f32 %v1106_v4, %v856_v42  ;;  %v1150_v45 = vadd.f32 %v1149_v18, %v889_v7  ;;  %v873_v36 = vmul.f32 %v6714_v52, %v6714_v52  ;;  %v874_v5 = vmul.f32 %v3922_v41, %v3922_v41 }
 0x10b   : > { %1119 = vadd.xlane.f32.xlu1 %v1118_v61  ;;  %v883_v56 = vmul.f32 %v3929_v44, %v3929_v44  ;;  %v885_v11 = vmul.f32 %v6715_v6, %v6715_v6  ;;  %v1140_v15 = vadd.f32 %v1139_v8, %v881_v59  ;;  %v1153_v42 = vsel %vm438_vm0, %v892_v54, 0.0 }
 0x10c   : > { %v1109_v19 = vadd.f32 %v1108_v57, %v1107_v43  ;;  %v1151_v16 = vadd.f32 %v1150_v45, %v890_v3  ;;  %v4460_v58 = vpop.xlane.xlu0 %549  ;;  %v875_v32 = vmul.f32 %v6716_v47, %v6716_v47  ;;  %v1130_v2 = vadd.f32 %v873_v36, %v872_v26  ;;  %v6719_v3 = vld [vmem:[#allocation147_spill] sm:$0xff]  ;;  %v6720_v43 = vld [vmem:[#allocation149_spill] sm:$0xff] }
 0x10d   : > { %v884_v41 = vmul.f32 %v6717_v31, %v6717_v31  ;;  %v1141_v4 = vadd.f32 %v1140_v15, %v882_v50  ;;  %v876_v44 = vmul.f32 %v3959_v62, %v3959_v62  ;;  %v907_v29 = vmul.f32 %v6718_v10, %v6718_v10  ;;  %v6723_v26 = vld [vmem:[#allocation153_spill] sm:$0xff]  ;;  %v6727_v31 = vld [vmem:[#allocation158_spill] sm:$0xff] }
 0x10e   : > { %1110 = vadd.xlane.f32.xlu0 %v1109_v19  ;;  %v1152_v7 = vadd.f32 %v1151_v16, %v891_v25  ;;  %v1131_v57 = vadd.f32 %v1130_v2, %v874_v5  ;;  %v1144_v13 = vsel %vm438_vm0, %v885_v11, 0.0  ;;  %v878_v18 = vmul.f32 %v6719_v3, %v6719_v3  ;;  %v6721_v25 = vld [vmem:[#allocation150_spill] sm:$0xff]  ;;  %v6725_v16 = vld [vmem:[#allocation156_spill] sm:$0xff]  ;;  %v6729_v3 = vld [vmem:[#allocation157_spill] sm:$0xff] }
 0x10f   : > { %v4471_v37 = vpop.xlane.xlu2 %594  ;;  %v1142_v61 = vadd.f32 %v1141_v4, %v883_v56  ;;  %v877_v46 = vmul.f32 %v4004_v22, %v4004_v22  ;;  %v908_v62 = vmul.f32 %v6720_v43, %v6720_v43  ;;  %v909_v40 = vmul.f32 %v6721_v25, %v6721_v25  ;;  %v6724_v22 = vld [vmem:[#allocation154_spill] sm:$0xff]  ;;  %v6728_v4 = vld [vmem:[#allocation159_spill] sm:$0xff] }
 0x110   : > { %v1154_v30 = vadd.f32 %v1153_v42, %v1152_v7  ;;  %v1132_v59 = vadd.f32 %v1131_v57, %v875_v32  ;;  %v4482_v54 = vpop.xlane.xlu1 %585  ;;  %v910_v50 = vmul.f32 %v6722_v27, %v6722_v27  ;;  %v900_v19 = vmul.f32 %v6723_v26, %v6723_v26  ;;  %v6726_v42 = vld [vmem:[#allocation155_spill] sm:$0xff] }
 0x111   : > { %v1143_v45 = vadd.f32 %v1142_v61, %v884_v41  ;;  %v1175_v35 = vadd.f32 %v908_v62, %v907_v29  ;;  %v901_v52 = vmul.f32 %v6724_v22, %v6724_v22  ;;  %v1135_v5 = vsel %vm438_vm0, %v878_v18, 0.0 }
 0x112   : > { %1155 = vadd.xlane.f32.xlu2 %v1154_v30  ;;  %v1133_v8 = vadd.f32 %v1132_v59, %v876_v44  ;;  %v902_v56 = vmul.f32 %v6725_v16, %v6725_v16  ;;  %v911_v15 = vmul.f32 %v3980_v12, %v3980_v12  ;;  %v913_v47 = vmul.f32 %v6726_v42, %v6726_v42 }
 0x113   : > { %v1145_v36 = vadd.f32 %v1144_v13, %v1143_v45  ;;  %v1176_v32 = vadd.f32 %v1175_v35, %v909_v40  ;;  %v903_v2 = vmul.f32 %v3993_v33, %v3993_v33  ;;  %v1166_v7 = vadd.f32 %v901_v52, %v900_v19 }
 0x114   : > { %v4493_v6 = vpop.xlane.xlu0 %576  ;;  %v1134_v11 = vadd.f32 %v1133_v8, %v877_v46  ;;  %v893_v41 = vmul.f32 %v6727_v31, %v6727_v31  ;;  %v894_v44 = vmul.f32 %v6728_v4, %v6728_v4  ;;  %v912_v10 = vmul.f32 %v4030_v60, %v4030_v60  ;;  %v6730_v46 = vld [vmem:[#allocation161_spill] sm:$0xff] }
 0x115   : > { %1146 = vadd.xlane.f32.xlu1 %v1145_v36  ;;  %v1177_v12 = vadd.f32 %v1176_v32, %v910_v50  ;;  %v895_v29 = vmul.f32 %v4013_v23, %v4013_v23  ;;  %v904_v33 = vmul.f32 %v4020_v49, %v4020_v49  ;;  %v1167_v61 = vadd.f32 %v1166_v7, %v902_v56  ;;  %v6731_v50 = vld [vmem:[#allocation160_spill] sm:$0xff] }
 0x116   : > { %v1136_v57 = vadd.f32 %v1135_v5, %v1134_v11  ;;  %v906_v18 = vmul.f32 %v6729_v3, %v6729_v3  ;;  %v896_v59 = vmul.f32 %v6730_v46, %v6730_v46  ;;  %v1157_v43 = vadd.f32 %v894_v44, %v893_v41 }
 0x117   : > { %v4509_v30 = vpop.xlane.xlu2 %621  ;;  %v1178_v13 = vadd.f32 %v1177_v12, %v911_v15  ;;  %v1180_v62 = vsel %vm438_vm0, %v913_v47, 0.0  ;;  %v905_v23 = vmul.f32 %v4046_v63, %v4046_v63  ;;  %v1168_v25 = vadd.f32 %v1167_v61, %v903_v2 }
 0x118   : > { %1137 = vadd.xlane.f32.xlu0 %v1136_v57  ;;  %v4517_v60 = vpop.xlane.xlu1 %612  ;;  %v897_v49 = vmul.f32 %v4050_v51, %v4050_v51  ;;  %v1158_v45 = vadd.f32 %v1157_v43, %v895_v29  ;;  %v899_v8 = vmul.f32 %v6731_v50, %v6731_v50  ;;  %v1171_v19 = vsel %vm438_vm0, %v906_v18, 0.0 }
 0x119   : > { %v1179_v40 = vadd.f32 %v1178_v13, %v912_v10  ;;  %v1169_v27 = vadd.f32 %v1168_v25, %v904_v33  ;;  %v898_v22 = vmul.f32 %v4063_v34, %v4063_v34  ;;  %v4549_v31 = vmul.f32 0.0012755102, %v4295_v39 }
 0x11a   : > { %v1159_v52 = vadd.f32 %v1158_v45, %v896_v59  ;;  %v1162_v16 = vsel %vm438_vm0, %v899_v8, 0.0  ;;  %v4552_v41 = vmul.f32 0.0012755102, %v4304_v28  ;;  %v4557_v44 = vmul.f32 0.0012755102, %v4317_v20 }
 0x11b   : > { %v1181_v26 = vadd.f32 %v1180_v62, %v1179_v40  ;;  %v1170_v63 = vadd.f32 %v1169_v27, %v905_v23  ;;  %v4560_v57 = vmul.f32 0.0012755102, %v4328_v55  ;;  %v4563_v10 = vmul.f32 0.0012755102, %v4340_v14 }
 0x11c   : > { %v4526_v35 = vpop.xlane.xlu0 %603  ;;  %v1160_v36 = vadd.f32 %v1159_v52, %v897_v49  ;;  %v4566_v12 = vmul.f32 0.0012755102, %v4350_v9  ;;  %v4570_v39 = vmul.f32 %v4549_v31, %v4549_v31  ;;  %v4573_v28 = vmul.f32 0.0012755102, %v4365_v53 }
 0x11d   : > { %1182 = vadd.xlane.f32.xlu2 %v1181_v26  ;;  %v1172_v51 = vadd.f32 %v1171_v19, %v1170_v63  ;;  %6732 = vst [vmem:[#allocation2_spill] sm:$0xff] %v4560_v57  ;;  %v4576_v29 = vmul.f32 0.0012755102, %v4374_v21  ;;  %v4579_v20 = vmul.f32 0.0012755102, %v4385_v0  ;;  %v1246_v14 = vmul.f32 %v4552_v41, %v4552_v41 }
 0x11e   : > { %v1161_v56 = vadd.f32 %v1160_v36, %v898_v22  ;;  %6733 = vst [vmem:[#allocation4_spill] sm:$0xff] %v4573_v28  ;;  %v4584_v9 = vmul.f32 0.0012755102, %v4401_v17  ;;  %v4587_v33 = vmul.f32 0.0012755102, %v4410_v48  ;;  %v1244_v53 = vmul.f32 %v4557_v44, %v4557_v44 }
 0x11f   : > { %v4531_v5 = vpop.xlane.xlu2 %648  ;;  %1173 = vadd.xlane.f32.xlu1 %v1172_v51  ;;  %6734 = vst [vmem:[#allocation3_spill] sm:$0xff] %v4576_v29  ;;  %v1249_v21 = vmul.f32 %v4560_v57, %v4560_v57  ;;  %v4594_v0 = vmul.f32 0.0012755102, %v4422_v1  ;;  %v4597_v13 = vmul.f32 0.0012755102, %v4436_v38  ;;  %v1245_v17 = vmul.f32 %v4566_v12, %v4566_v12 }
 0x120   : > { %v4534_v11 = vpop.xlane.xlu1 %639  ;;  %v1163_v15 = vadd.f32 %v1162_v16, %v1161_v56  ;;  %6735 = vst [vmem:[#allocation5_spill] sm:$0xff] %v4579_v20  ;;  %v4602_v48 = vmul.f32 0.0012755102, %v4446_v24  ;;  %v4606_v59 = vmul.f32 %v4563_v10, %v4563_v10  ;;  %v4610_v1 = vmul.f32 %v4573_v28, %v4573_v28 }
 0x121   : > { %6736 = vst [vmem:[#allocation7_spill] sm:$0xff] %v4584_v9  ;;  %v4614_v38 = vmul.f32 %v4576_v29, %v4576_v29  ;;  %v4618_v43 = vmul.f32 %v4579_v20, %v4579_v20  ;;  %v4622_v24 = vmul.f32 %v4584_v9, %v4584_v9  ;;  %v4626_v62 = vmul.f32 %v4587_v33, %v4587_v33 }
 0x122   : > { %1164 = vadd.xlane.f32.xlu0 %v1163_v15  ;;  %6737 = vst [vmem:[#allocation8_spill] sm:$0xff] %v4587_v33  ;;  %v4630_v49 = vmul.f32 %v4594_v0, %v4594_v0  ;;  %v4634_v45 = vmul.f32 %v4597_v13, %v4597_v13  ;;  %v4637_v27 = vmul.f32 0.0012755102, %v4460_v58  ;;  %v4641_v8 = vmul.f32 %v4602_v48, %v4602_v48 }
 0x123   : > { %6738 = vst [vmem:[#allocation9_spill] sm:$0xff] %v4594_v0  ;;  %v4644_v26 = vmul.f32 0.0012755102, %v4471_v37  ;;  %v4649_v52 = vmul.f32 0.0012755102, %v4482_v54 }
 0x124   : > { %v4536_v42 = vpop.xlane.xlu0 %630  ;;  %6739 = vst [vmem:[#allocation6_spill] sm:$0xff] %v4597_v13  ;;  %v4652_v63 = vmul.f32 0.0012755102, %v4493_v6  ;;  %v4655_v58 = vmul.f32 0.0012755102, %v4509_v30  ;;  %v4665_v54 = vmul.f32 %v4637_v27, %v4637_v27 }
 0x125   : > { %6740 = vst [vmem:[#allocation10_spill] sm:$0xff] %v4602_v48  ;;  %v4658_v16 = vmul.f32 0.0012755102, %v4517_v60  ;;  %v4668_v6 = vmul.f32 0.0012755102, %v4526_v35  ;;  %v4683_v35 = vmul.f32 %v4649_v52, %v4649_v52 }
 0x126   : > { %6741 = vst [vmem:[#allocation11_spill] sm:$0xff] %v4637_v27  ;;  %v4671_v30 = vmul.f32 0.0012755102, %v4531_v5  ;;  %v4674_v60 = vmul.f32 0.0012755102, %v4534_v11  ;;  %v4687_v5 = vmul.f32 %v4652_v63, %v4652_v63  ;;  %v4693_v11 = vmul.f32 %v4655_v58, %v4655_v58 }
 0x127   : > { %v4538_v47 = vpop.xlane.xlu2 %675  ;;  %6742 = vst [vmem:[#allocation12_spill] sm:$0xff] %v4644_v26 }
 0x128   : > { %6743 = vst [vmem:[#allocation13_spill] sm:$0xff] %v4649_v52 }
 0x129   : > { %6744 = vst [vmem:[#allocation20_spill] sm:$0xff] %v4652_v63 }
 0x12a   : > { %v4540_v34 = vpop.xlane.xlu1 %666  ;;  %6745 = vst [vmem:[#allocation14_spill] sm:$0xff] %v4655_v58 }
 0x12b   : > { %6746 = vst [vmem:[#allocation15_spill] sm:$0xff] %v4658_v16 }
 0x12c   : > { %6747 = vst [vmem:[#allocation17_spill] sm:$0xff] %v4668_v6 }
 0x12d   : > { %6748 = vst [vmem:[#allocation16_spill] sm:$0xff] %v4671_v30 }
 0x12e   : > { %6749 = vst [vmem:[#allocation18_spill] sm:$0xff] %v4674_v60 }
 0x12f   : > { %v4542_v32 = vpop.xlane.xlu0 %657  ;;  %v4544_v2 = vpop.xlane.xlu2 %702 }
 0x132   : > { %v4546_v7 = vpop.xlane.xlu1 %693 }
 0x137   : > { %v4554_v4 = vpop.xlane.xlu0 %684  ;;  %v940_v55 = vpop.xlane.xlu2 %939 }
 0x138   : > { %v1216_v61 = vmul.f32 0.0012755102, %v940_v55 }
 0x13a   : > { %v931_v3 = vpop.xlane.xlu1 %930  ;;  %v1276_v18 = vsub.f32 %v1216_v61, %v1246_v14 }
 0x13b   : > { %v1215_v46 = vmul.f32 0.0012755102, %v931_v3 }
 0x13c   : > { %v1306_v23 = vmax.f32 %v1276_v18, 0.0 }
 0x13d   : > { %v1275_v25 = vsub.f32 %v1215_v46, %v1245_v17  ;;  %v4700_v17 = vmul.f32 0.0012755102, %v4536_v42  ;;  %v4716_v42 = vmul.f32 %v4674_v60, %v4674_v60 }
 0x13e   : > { %v4646_v19 = vadd.f32 0.001, %v1306_v23  ;;  %v4705_v23 = vmul.f32 %v4668_v6, %v4668_v6 }
 0x13f   : > { %v922_v40 = vpop.xlane.xlu0 %921  ;;  %v1305_v22 = vmax.f32 %v1275_v25, 0.0  ;;  %6750 = vst [vmem:[#allocation24_spill] sm:$0xff] %v4700_v17  ;;  %v4709_v25 = vmul.f32 %v4671_v30, %v4671_v30 }
 0x140   : > { %v1214_v50 = vmul.f32 0.0012755102, %v922_v40  ;;  %v967_v51 = vpop.xlane.xlu2 %966  ;;  %2850 = vrsqrt.f32 %v4646_v19  ;;  %vm1390_vm2 = vweird.f32 %v4646_v19 }
 0x141   : > { %v4661_v37 = vadd.f32 0.001, %v1305_v22  ;;  %v1219_v56 = vmul.f32 0.0012755102, %v967_v51  ;;  %v4722_v51 = vmul.f32 0.0012755102, %v4540_v34 }
 0x142   : > { %v1274_v36 = vsub.f32 %v1214_v50, %v1244_v53  ;;  %v958_v55 = vpop.xlane.xlu1 %957  ;;  %v4679_v53 = vmul.f32 %v4644_v26, %v4644_v26 }
 0x143   : > { %2852 = vrsqrt.f32 %v4661_v37  ;;  %v1279_v14 = vsub.f32 %v1219_v56, %v1249_v21  ;;  %v1218_v61 = vmul.f32 0.0012755102, %v958_v55  ;;  %v4697_v21 = vmul.f32 %v4658_v16, %v4658_v16  ;;  %6752 = vst [vmem:[#allocation21_spill] sm:$0xff] %v4722_v51 }
 0x144   : > { %v1304_v15 = vmax.f32 %v1274_v36, 0.0  ;;  %v4725_v56 = vmul.f32 0.0012755102, %v4542_v32  ;;  %v4742_v32 = vmul.f32 0.0012755102, %v4546_v7  ;;  %vm1380_vm5 = vweird.f32 %v4661_v37 }
 0x145   : > { %v1278_v18 = vsub.f32 %v1218_v61, %v4570_v39  ;;  %v4719_v39 = vmul.f32 0.0012755102, %v4538_v47  ;;  %v1309_v22 = vmax.f32 %v1279_v14, 0.0  ;;  %v4734_v47 = vmul.f32 %v4700_v17, %v4700_v17 }
 0x146   : > { %v4689_v3 = vadd.f32 0.001, %v1304_v15  ;;  %v4712_v50 = vpop.eup %2850  ;;  %6753 = vst [vmem:[#allocation23_spill] sm:$0xff] %v4725_v56  ;;  %v4737_v14 = vmul.f32 0.0012755102, %v4544_v2 }
 0x147   : > { %v949_v46 = vpop.xlane.xlu0 %948  ;;  %6751 = vst [vmem:[#allocation19_spill] sm:$0xff] %v4719_v39  ;;  %v1308_v36 = vmax.f32 %v1278_v18, 0.0  ;;  %v1385_v15 = vmul.f32 %v4712_v50, %v4646_v19  ;;  %v4747_v58 = vadd.f32 0.001, %v1309_v22  ;;  %vm1391_vm1 = vweird.f32 %v4712_v50 }
 0x148   : > { %2854 = vrsqrt.f32 %v4689_v3  ;;  %v1217_v40 = vmul.f32 0.0012755102, %v949_v46  ;;  %v994_v61 = vpop.xlane.xlu2 %993  ;;  %6754 = vst [vmem:[#allocation22_spill] sm:$0xff] %v4737_v14  ;;  %vm4812_vm3 = vmor %vm1390_vm2, %vm1391_vm1  ;;  %vm1370_vm8 = vweird.f32 %v4689_v3 }
 0x149   : > { %v4730_v46 = vpop.eup %2852  ;;  %v4739_v34 = vadd.f32 0.001, %v1308_v36  ;;  %v1222_v18 = vmul.f32 0.0012755102, %v994_v61  ;;  %6755 = vst [vmem:[#allocation29_spill] sm:$0xff] %v4742_v32  ;;  %v1386_v30 = vmul.f32 %v4712_v50, %v1385_v15  ;;  %v4758_v15 = vmul.f32 %v4719_v39, %v4719_v39 }
 0x14a   : > { %v1277_v55 = vsub.f32 %v1217_v40, %v4606_v59  ;;  %v1375_v59 = vmul.f32 %v4730_v46, %v4661_v37  ;;  %v4777_v39 = vmul.f32 %v4737_v14, %v4737_v14  ;;  %vm1381_vm4 = vweird.f32 %v4730_v46 }
 0x14b   : > { %2856 = vrsqrt.f32 %v4739_v34  ;;  %v1282_v2 = vsub.f32 %v1222_v18, %v4610_v1  ;;  %v1387_v61 = vmul.f32 0.5, %v1386_v30  ;;  %v4765_v30 = vmul.f32 %v4722_v51, %v4722_v51  ;;  %vm4847_vm6 = vmor %vm1380_vm5, %vm1381_vm4 }
 0x14c   : > { %v1307_v40 = vmax.f32 %v1277_v55, 0.0  ;;  %v985_v60 = vpop.xlane.xlu1 %984  ;;  %v1376_v7 = vmul.f32 %v4730_v46, %v1375_v59  ;;  %vm1410_vm9 = vweird.f32 %v4739_v34  ;;  %vm1420_vm13 = vweird.f32 %v4747_v58 }
 0x14d   : > { %v1221_v17 = vmul.f32 0.0012755102, %v985_v60  ;;  %v1312_v55 = vmax.f32 %v1282_v2, 0.0  ;;  %v3128_v60 = vmov 0   ;;  %v1388_v18 = vsub.f32 1.5, %v1387_v61 }
 0x14e   : > { %v4751_v36 = vpop.eup %2854  ;;  %v4754_v6 = vadd.f32 0.001, %v1307_v40  ;;  %2849 = vset.pattern.permute.xlu2 %v3128_v60  ;;  %2848 = vset.pattern.permute.xlu1 %v3128_v60  ;;  %v1377_v59 = vmul.f32 0.5, %v1376_v7  ;;  %v4773_v2 = vmul.f32 %v4725_v56, %v4725_v56  ;;  %v4781_v61 = vmul.f32 %v4742_v32, %v4742_v32 }
 0x14f   : > { %v1365_v22 = vmul.f32 %v4751_v36, %v4689_v3  ;;  %v1281_v16 = vsub.f32 %v1221_v17, %v4614_v38  ;;  %v976_v1 = vpop.xlane.xlu0 %975  ;;  %2847 = vset.pattern.permute.xlu0 %v3128_v60  ;;  %v1389_v14 = vmul.f32 %v4712_v50, %v1388_v18  ;;  %vm1371_vm7 = vweird.f32 %v4751_v36 }
 0x150   : > { %2858 = vrsqrt.f32 %v4754_v6  ;;  %v1220_v17 = vmul.f32 0.0012755102, %v976_v1  ;;  %v1378_v60 = vsub.f32 1.5, %v1377_v59  ;;  %vm1372_vm10 = vmor %vm1370_vm8, %vm1371_vm7  ;;  %vm1400_vm11 = vweird.f32 %v4754_v6 }
 0x151   : > { %v1366_v40 = vmul.f32 %v4751_v36, %v1365_v22  ;;  %2860 = vrsqrt.f32 %v4747_v58  ;;  %v1311_v38 = vmax.f32 %v1281_v16, 0.0  ;;  %v4784_v22 = vpop.eup %2856  ;;  %v4786_v16 = vadd.f32 0.001, %v1312_v55 }
 0x152   : > { %v1021_v7 = vpop.xlane.xlu2 %1020  ;;  %v1405_v56 = vmul.f32 %v4784_v22, %v4739_v34  ;;  %v1280_v51 = vsub.f32 %v1220_v17, %v4618_v43  ;;  %v1379_v13 = vmul.f32 %v4730_v46, %v1378_v60  ;;  %v1665_v43 = vld [vmem:[%s4795_s22 + $0x8] sm:$0xff]  ;;  %vm1411_vm12 = vweird.f32 %v4784_v22 }
 0x153   : > { %v4788_v1 = vadd.f32 0.001, %v1311_v38  ;;  %v1367_v32 = vmul.f32 0.5, %v1366_v40  ;;  %v1225_v59 = vmul.f32 0.0012755102, %v1021_v7  ;;  %vm4911_vm14 = vmor %vm1410_vm9, %vm1411_vm12  ;;  %vm1450_vm9 = vweird.f32 %v4786_v16 }
 0x154   : > { %v1012_v55 = vpop.xlane.xlu1 %1011  ;;  %v4802_v38 = vmul.f32 0.0012755102, %v4554_v4  ;;  %v1406_v18 = vmul.f32 %v4784_v22, %v1405_v56  ;;  %v1310_v40 = vmax.f32 %v1280_v51, 0.0  ;;  %v1666_v4 = vld [vmem:[%s4795_s22 + $0x10] sm:$0xff] }
 0x155   : > { %2862 = vrsqrt.f32 %v4788_v1  ;;  %v1224_v26 = vmul.f32 0.0012755102, %v1012_v55  ;;  %v1285_v52 = vsub.f32 %v1225_v59, %v4622_v24  ;;  %v1393_v24 = vsel %vm4812_vm3, %v4712_v50, %v1389_v14 }
 0x156   : > { %6756 = vst [vmem:[#allocation25_spill] sm:$0xff] %v4802_v38  ;;  %v4806_v63 = vpop.eup %2858  ;;  %2864 = vrsqrt.f32 %v4786_v16  ;;  %v1368_v7 = vsub.f32 1.5, %v1367_v32  ;;  %v4827_v59 = vadd.f32 0.001, %v1310_v40  ;;  %v4831_v0 = vmul.f32 %v1666_v4, %v1393_v24 }
 0x157   : > { %v4818_v19 = vpop.eup %2860  ;;  %v1395_v17 = vmul.f32 %v4806_v63, %v4754_v6  ;;  %v1284_v51 = vsub.f32 %v1224_v26, %v4626_v62  ;;  %v1315_v55 = vmax.f32 %v1285_v52, 0.0  ;;  %v1407_v26 = vmul.f32 0.5, %v1406_v18 }
 0x158   : > { %v1003_v56 = vpop.xlane.xlu0 %1002  ;;  %v1415_v62 = vmul.f32 %v4818_v19, %v4747_v58  ;;  %2866 = vrsqrt.f32 %v4827_v59  ;;  %1826 = vperm.xlu2 %2849, %v4831_v0   ;;  %vm1401_vm15 = vweird.f32 %v4806_v63  ;;  %vm1421_vm1 = vweird.f32 %v4818_v19 }
 0x159   : > { %v1396_v27 = vmul.f32 %v4806_v63, %v1395_v17  ;;  %v1314_v48 = vmax.f32 %v1284_v51, 0.0  ;;  %v1223_v9 = vmul.f32 0.0012755102, %v1003_v56  ;;  %v4839_v52 = vadd.f32 0.001, %v1315_v55  ;;  %vm1402_vm2 = vmor %vm1400_vm11, %vm1401_vm15 }
 0x15a   : > { %v4863_v17 = vmul.f32 %v4802_v38, %v4802_v38  ;;  %v1416_v51 = vmul.f32 %v4818_v19, %v1415_v62  ;;  %vm1440_vm3 = vweird.f32 %v4788_v1  ;;  %vm1430_vm4 = vweird.f32 %v4827_v59  ;;  %vm4977_vm8 = vmor %vm1420_vm13, %vm1421_vm1 }
 0x15b   : > { %v1048_v50 = vpop.xlane.xlu2 %1047  ;;  %v4837_v14 = vpop.eup %2862  ;;  %v4841_v32 = vadd.f32 0.001, %v1314_v48  ;;  %v1283_v60 = vsub.f32 %v1223_v9, %v4630_v49  ;;  %v1397_v18 = vmul.f32 0.5, %v1396_v27  ;;  %v1383_v48 = vsel %vm4847_vm6, %v4730_v46, %v1379_v13  ;;  %v1664_v27 = vld [vmem:[%s4795_s22] sm:$0xff] }
 0x15c   : > { %v1435_v40 = vmul.f32 %v4837_v14, %v4788_v1  ;;  %v1369_v9 = vmul.f32 %v4751_v36, %v1368_v7  ;;  %v4859_v4 = vpop.eup %2864  ;;  %2868 = vrsqrt.f32 %v4839_v52  ;;  %v1408_v13 = vsub.f32 1.5, %v1407_v26  ;;  %v1670_v1 = vld [vmem:[%s4795_s22 + $0x30] sm:$0xff] }
 0x15d   : > { %2870 = vrsqrt.f32 %v4841_v32  ;;  %v1313_v46 = vmax.f32 %v1283_v60, 0.0  ;;  %v4873_v56 = vmul.f32 %v1665_v43, %v1383_v48  ;;  %v1228_v7 = vmul.f32 0.0012755102, %v1048_v50 }
 0x15e   : > { %v1373_v24 = vsel %vm1372_vm10, %v4751_v36, %v1369_v9  ;;  %v4876_v37 = vpop.eup %2866  ;;  %v1398_v38 = vsub.f32 1.5, %v1397_v18  ;;  %v1436_v33 = vmul.f32 %v4837_v14, %v1435_v40  ;;  %v1417_v43 = vmul.f32 0.5, %v1416_v51 }
 0x15f   : > { %v1039_v49 = vpop.xlane.xlu1 %1038  ;;  %v4879_v62 = vadd.f32 0.001, %v1313_v46  ;;  %v4881_v26 = vmul.f32 %v1664_v27, %v1373_v24  ;;  %v1425_v60 = vmul.f32 %v4876_v37, %v4827_v59  ;;  %1821 = vperm.xlu1 %2848, %v4873_v56   ;;  %v1288_v48 = vsub.f32 %v1228_v7, %v4634_v45 }
 0x160   : > { %v1227_v3 = vmul.f32 0.0012755102, %v1039_v49  ;;  %v1409_v18 = vmul.f32 %v4784_v22, %v1408_v13  ;;  %v1445_v9 = vmul.f32 %v4859_v4, %v4786_v16  ;;  %v1437_v51 = vmul.f32 0.5, %v1436_v33 }
 0x161   : > { %2872 = vrsqrt.f32 %v4879_v62  ;;  %1816 = vperm.xlu0 %2847, %v4881_v26   ;;  %v1318_v49 = vmax.f32 %v1288_v48, 0.0  ;;  %v1426_v46 = vmul.f32 %v4876_v37, %v1425_v60  ;;  %v1399_v24 = vmul.f32 %v4806_v63, %v1398_v38  ;;  %v1668_v48 = vld [vmem:[%s4795_s22 + $0x20] sm:$0xff] }
 0x162   : > { %v1030_v55 = vpop.xlane.xlu0 %1029  ;;  %v1287_v36 = vsub.f32 %v1227_v3, %v4641_v8  ;;  %v4892_v40 = vpop.eup %2868  ;;  %v1413_v60 = vsel %vm4911_vm14, %v4784_v22, %v1409_v18  ;;  %v1446_v28 = vmul.f32 %v4859_v4, %v1445_v9  ;;  %v1438_v20 = vsub.f32 1.5, %v1437_v51 }
 0x163   : > { %v1226_v50 = vmul.f32 0.0012755102, %v1030_v55  ;;  %v4897_v8 = vpop.eup %2870  ;;  %v4905_v3 = vadd.f32 0.001, %v1318_v49  ;;  %v1475_v38 = vmul.f32 %v4892_v40, %v4839_v52  ;;  %vm1441_vm5 = vweird.f32 %v4837_v14 }
 0x164   : > { %v1317_v27 = vmax.f32 %v1287_v36, 0.0  ;;  %v1465_v7 = vmul.f32 %v4897_v8, %v4841_v32  ;;  %v1418_v36 = vsub.f32 1.5, %v1417_v43  ;;  %v1427_v43 = vmul.f32 0.5, %v1426_v46  ;;  %vm4959_vm6 = vmor %vm1440_vm3, %vm1441_vm5 }
 0x165   : > { %v1286_v45 = vsub.f32 %v1226_v50, %v4665_v54  ;;  %v1075_v13 = vpop.xlane.xlu2 %1074  ;;  %2874 = vrsqrt.f32 %v4905_v3  ;;  %v1667_v50 = vld [vmem:[%s4795_s22 + $0x18] sm:$0xff]  ;;  %v1476_v9 = vmul.f32 %v4892_v40, %v1475_v38  ;;  %v1439_v38 = vmul.f32 %v4837_v14, %v1438_v20 }
 0x166   : > { %v4907_v54 = vadd.f32 0.001, %v1317_v27  ;;  %v1466_v34 = vmul.f32 %v4897_v8, %v1465_v7  ;;  %v1231_v49 = vmul.f32 0.0012755102, %v1075_v13  ;;  %v4938_v13 = vmul.f32 %v1668_v48, %v1413_v60 }
 0x167   : > { %v1316_v55 = vmax.f32 %v1286_v45, 0.0  ;;  %v4926_v27 = vpop.eup %2872  ;;  %v1403_v7 = vsel %vm1402_vm2, %v4806_v63, %v1399_v24  ;;  %v1419_v60 = vmul.f32 %v4818_v19, %v1418_v36  ;;  %vm1470_vm7 = vweird.f32 %v4841_v32 }
 0x168   : > { %2876 = vrsqrt.f32 %v4907_v54  ;;  %v1066_v22 = vpop.xlane.xlu1 %1065  ;;  %v1455_v18 = vmul.f32 %v4926_v27, %v4879_v62  ;;  %v4944_v51 = vmul.f32 %v1667_v50, %v1403_v7  ;;  %v1467_v6 = vmul.f32 0.5, %v1466_v34  ;;  %1836 = vperm.xlu1 %2848, %v4938_v13  }
 0x169   : > { %v4930_v45 = vadd.f32 0.001, %v1316_v55  ;;  %v1291_v55 = vsub.f32 %v1231_v49, %v4679_v53  ;;  %v1230_v63 = vmul.f32 0.0012755102, %v1066_v22  ;;  %v1447_v34 = vmul.f32 0.5, %v1446_v28  ;;  %v1671_v49 = vld [vmem:[%s4795_s22 + $0x38] sm:$0xff] }
 0x16a   : > { %v1456_v46 = vmul.f32 %v4926_v27, %v1455_v18  ;;  %1831 = vperm.xlu2 %2849, %v4944_v51   ;;  %v1428_v50 = vsub.f32 1.5, %v1427_v43  ;;  %v4966_v22 = vmul.f32 0.5, %v1476_v9  ;;  %v1468_v58 = vsub.f32 1.5, %v1467_v6 }
 0x16b   : > { %2878 = vrsqrt.f32 %v4930_v45  ;;  %v4954_v48 = vpop.eup %2874  ;;  %v1321_v7 = vmax.f32 %v1291_v55, 0.0  ;;  %v1290_v18 = vsub.f32 %v1230_v63, %v4683_v35  ;;  %v1443_v35 = vsel %vm4959_vm6, %v4837_v14, %v1439_v38 }
 0x16c   : > { %v1057_v33 = vpop.xlane.xlu0 %1056  ;;  %v1457_v36 = vmul.f32 0.5, %v1456_v46  ;;  %v1423_v14 = vsel %vm4977_vm8, %v4818_v19, %v1419_v60  ;;  %v1505_v55 = vmul.f32 %v4954_v48, %v4905_v3  ;;  %v1429_v19 = vmul.f32 %v4876_v37, %v1428_v50 }
 0x16d   : > { %v1229_v24 = vmul.f32 0.0012755102, %v1057_v33  ;;  %v4984_v9 = vadd.f32 0.001, %v1321_v7  ;;  %v1669_v33 = vld [vmem:[%s4795_s22 + $0x28] sm:$0xff]  ;;  %vm1431_vm10 = vweird.f32 %v4876_v37  ;;  %v1478_v57 = vsub.f32 1.5, %v4966_v22 }
 0x16e   : > { %v4964_v20 = vpop.eup %2876  ;;  %v5006_v53 = vmul.f32 %v1669_v33, %v1423_v14  ;;  %vm1460_vm11 = vweird.f32 %v4879_v62  ;;  %v1506_v50 = vmul.f32 %v4954_v48, %v1505_v55  ;;  %vm1432_vm12 = vmor %vm1430_vm4, %vm1431_vm10  ;;  %vm1500_vm13 = vweird.f32 %v4907_v54 }
 0x16f   : > { %v1289_v28 = vsub.f32 %v1229_v24, %v4687_v5  ;;  %v1495_v43 = vmul.f32 %v4964_v20, %v4907_v54  ;;  %v1320_v5 = vmax.f32 %v1290_v18, 0.0  ;;  %v4994_v24 = vmul.f32 %v1671_v49, %v1443_v35 }
 0x170   : > { %v1102_v38 = vpop.xlane.xlu2 %1101  ;;  %2880 = vrsqrt.f32 %v4984_v9  ;;  %v1448_v49 = vsub.f32 1.5, %v1447_v34  ;;  %vm1471_vm14 = vweird.f32 %v4897_v8  ;;  %vm1451_vm1 = vweird.f32 %v4859_v4 }
 0x171   : > { %v4990_v46 = vpop.eup %2878  ;;  %v1319_v63 = vmax.f32 %v1289_v28, 0.0  ;;  %v1496_v7 = vmul.f32 %v4964_v20, %v1495_v43  ;;  %v5001_v60 = vadd.f32 0.001, %v1320_v5  ;;  %1851 = vperm.xlu0 %2847, %v4994_v24   ;;  %v1458_v28 = vsub.f32 1.5, %v1457_v36  ;;  %vm5030_vm15 = vmor %vm1470_vm7, %vm1471_vm14 }
 0x172   : > { %v1485_v18 = vmul.f32 %v4990_v46, %v4930_v45  ;;  %v1234_v43 = vmul.f32 0.0012755102, %v1102_v38  ;;  %1841 = vperm.xlu2 %2849, %v5006_v53   ;;  %v1433_v36 = vsel %vm1432_vm12, %v4876_v37, %v1429_v19  ;;  %v1469_v5 = vmul.f32 %v4897_v8, %v1468_v58  ;;  %v1674_v19 = vld [vmem:[%s4795_s22 + $0x50] sm:$0xff]  ;;  %vm5044_vm2 = vmor %vm1450_vm9, %vm1451_vm1 }
 0x173   : > { %v5003_v6 = vadd.f32 0.001, %v1319_v63  ;;  %v1497_v35 = vmul.f32 0.5, %v1496_v7  ;;  %v1093_v29 = vpop.xlane.xlu1 %1092  ;;  %2882 = vrsqrt.f32 %v5001_v60  ;;  %v5022_v14 = vmul.f32 %v1670_v1, %v1433_v36 }
 0x174   : > { %v1486_v34 = vmul.f32 %v4990_v46, %v1485_v18  ;;  %v1294_v33 = vsub.f32 %v1234_v43, %v4693_v11  ;;  %v1233_v55 = vmul.f32 0.0012755102, %v1093_v29  ;;  %v1449_v58 = vmul.f32 %v4859_v4, %v1448_v49  ;;  %v1672_v49 = vld [vmem:[%s4795_s22 + $0x40] sm:$0xff] }
 0x175   : > { %2884 = vrsqrt.f32 %v5003_v6  ;;  %v1498_v63 = vsub.f32 1.5, %v1497_v35  ;;  %v1459_v11 = vmul.f32 %v4926_v27, %v1458_v28  ;;  %1846 = vperm.xlu1 %2848, %v5022_v14   ;;  %v5049_v1 = vmul.f32 0.5, %v1506_v50 }
 0x176   : > { %v5026_v59 = vpop.eup %2880  ;;  %v1324_v7 = vmax.f32 %v1294_v33, 0.0  ;;  %v1293_v18 = vsub.f32 %v1233_v55, %v4697_v21  ;;  %v1473_v28 = vsel %vm5030_vm15, %v4897_v8, %v1469_v5  ;;  %v1453_v21 = vsel %vm5044_vm2, %v4859_v4, %v1449_v58  ;;  %v1673_v5 = vld [vmem:[%s4795_s22 + $0x48] sm:$0xff] }
 0x177   : > { %v1084_v38 = vpop.xlane.xlu0 %1083  ;;  %v1535_v29 = vmul.f32 %v5026_v59, %v4984_v9  ;;  %vm1461_vm3 = vweird.f32 %v4926_v27  ;;  %vm1480_vm4 = vweird.f32 %v4839_v52  ;;  %v1487_v16 = vmul.f32 0.5, %v1486_v34 }
 0x178   : > { %v1232_v32 = vmul.f32 0.0012755102, %v1084_v38  ;;  %v5061_v36 = vadd.f32 0.001, %v1324_v7  ;;  %v1323_v33 = vmax.f32 %v1293_v18, 0.0  ;;  %vm5066_vm5 = vmor %vm1460_vm11, %vm1461_vm3  ;;  %v5075_v38 = vmul.f32 %v1674_v19, %v1473_v28  ;;  %v1677_v28 = vld [vmem:[%s4795_s22 + $0x68] sm:$0xff] }
 0x179   : > { %v5058_v43 = vpop.eup %2882  ;;  %v5077_v34 = vmul.f32 %v1672_v49, %v1453_v21  ;;  %v1536_v62 = vmul.f32 %v5026_v59, %v1535_v29  ;;  %v1499_v7 = vmul.f32 %v4964_v20, %v1498_v63  ;;  %vm1490_vm6 = vweird.f32 %v4930_v45 }
 0x17a   : > { %v1292_v50 = vsub.f32 %v1232_v32, %v4705_v23  ;;  %v1525_v55 = vmul.f32 %v5058_v43, %v5001_v60  ;;  %v1463_v23 = vsel %vm5066_vm5, %v4926_v27, %v1459_v11  ;;  %v1129_v37 = vpop.xlane.xlu2 %1128  ;;  %2886 = vrsqrt.f32 %v5061_v36  ;;  %1866 = vperm.xlu0 %2847, %v5075_v38  }
 0x17b   : > { %v5071_v4 = vpop.eup %2884  ;;  %v5088_v32 = vadd.f32 0.001, %v1323_v33  ;;  %1856 = vperm.xlu2 %2849, %v5077_v34   ;;  %v5092_v27 = vmul.f32 %v1673_v5, %v1463_v23  ;;  %v1508_v11 = vsub.f32 1.5, %v5049_v1  ;;  %v1237_v29 = vmul.f32 0.0012755102, %v1129_v37 }
 0x17c   : > { %v1515_v58 = vmul.f32 %v5071_v4, %v5003_v6  ;;  %v1526_v18 = vmul.f32 %v5058_v43, %v1525_v55  ;;  %v1322_v19 = vmax.f32 %v1292_v50, 0.0  ;;  %vm1501_vm7 = vweird.f32 %v4964_v20 }
 0x17d   : > { %v1488_v63 = vsub.f32 1.5, %v1487_v16  ;;  %2888 = vrsqrt.f32 %v5088_v32  ;;  %vm1502_vm8 = vmor %vm1500_vm13, %vm1501_vm7  ;;  %1861 = vperm.xlu1 %2848, %v5092_v27   ;;  %v1297_v33 = vsub.f32 %v1237_v29, %v4709_v25  ;;  %v1479_v16 = vmul.f32 %v4892_v40, %v1478_v57 }
 0x17e   : > { %v1527_v35 = vmul.f32 0.5, %v1526_v18  ;;  %v5098_v49 = vadd.f32 0.001, %v1322_v19  ;;  %v1516_v21 = vmul.f32 %v5071_v4, %v1515_v58  ;;  %v1120_v50 = vpop.xlane.xlu1 %1119  ;;  %v1503_v8 = vsel %vm1502_vm8, %v4964_v20, %v1499_v7  ;;  %v1675_v20 = vld [vmem:[%s4795_s22 + $0x58] sm:$0xff] }
 0x17f   : > { %v5110_v5 = vmul.f32 0.5, %v1536_v62  ;;  %vm1530_vm9 = vweird.f32 %v5001_v60  ;;  %v1236_v54 = vmul.f32 0.0012755102, %v1120_v50  ;;  %v1327_v37 = vmax.f32 %v1297_v33, 0.0  ;;  %v1678_v60 = vld [vmem:[%s4795_s22 + $0x70] sm:$0xff] }
 0x180   : > { %2890 = vrsqrt.f32 %v5098_v49  ;;  %v5114_v55 = vpop.eup %2886  ;;  %v1528_v23 = vsub.f32 1.5, %v1527_v35  ;;  %v5116_v25 = vmul.f32 %v1677_v28, %v1503_v8  ;;  %vm1481_vm10 = vweird.f32 %v4892_v40 }
 0x181   : > { %vm1510_vm11 = vweird.f32 %v4905_v3  ;;  %v1565_v57 = vmul.f32 %v5114_v55, %v5061_v36  ;;  %v1296_v22 = vsub.f32 %v1236_v54, %v4716_v42  ;;  %v1111_v62 = vpop.xlane.xlu0 %1110  ;;  %vm1482_vm12 = vmor %vm1480_vm4, %vm1481_vm10  ;;  %v1489_v58 = vmul.f32 %v4990_v46, %v1488_v63  ;;  %v1676_v42 = vld [vmem:[%s4795_s22 + $0x60] sm:$0xff] }
 0x182   : > { %vm1491_vm13 = vweird.f32 %v4990_v46  ;;  %v1517_v7 = vmul.f32 0.5, %v1516_v21  ;;  %v5128_v18 = vadd.f32 0.001, %v1327_v37  ;;  %v1235_v19 = vmul.f32 0.0012755102, %v1111_v62  ;;  %1881 = vperm.xlu0 %2847, %v5116_v25   ;;  %v1680_v62 = vld [vmem:[%s4795_s22 + $0x80] sm:$0xff] }
 0x183   : > { %v1483_v29 = vsel %vm1482_vm12, %v4892_v40, %v1479_v16  ;;  %vm5133_vm14 = vmor %vm1490_vm6, %vm1491_vm13  ;;  %v5138_v28 = vpop.eup %2888  ;;  %v1538_v52 = vsub.f32 1.5, %v5110_v5  ;;  %v1326_v63 = vmax.f32 %v1296_v22, 0.0  ;;  %vm1520_vm15 = vweird.f32 %v5003_v6 }
 0x184   : > { %v5142_v21 = vmul.f32 %v1675_v20, %v1483_v29  ;;  %v1493_v40 = vsel %vm5133_vm14, %v4990_v46, %v1489_v58  ;;  %v1555_v45 = vmul.f32 %v5138_v28, %v5088_v32  ;;  %2892 = vrsqrt.f32 %v5128_v18 }
 0x185   : > { %v1295_v33 = vsub.f32 %v1235_v19, %v4734_v47  ;;  %v1529_v50 = vmul.f32 %v5058_v43, %v1528_v23  ;;  %v1566_v16 = vmul.f32 %v5114_v55, %v1565_v57  ;;  %v5156_v54 = vadd.f32 0.001, %v1326_v63  ;;  %v1156_v23 = vpop.xlane.xlu2 %1155 }
 0x186   : > { %v5153_v8 = vpop.eup %2890  ;;  %1871 = vperm.xlu2 %2849, %v5142_v21   ;;  %v5159_v46 = vmul.f32 %v1676_v42, %v1493_v40  ;;  %vm1531_vm1 = vweird.f32 %v5058_v43  ;;  %v1518_v37 = vsub.f32 1.5, %v1517_v7  ;;  %v1556_v20 = vmul.f32 %v5138_v28, %v1555_v45 }
 0x187   : > { %v1545_v47 = vmul.f32 %v5153_v8, %v5098_v49  ;;  %v1325_v22 = vmax.f32 %v1295_v33, 0.0  ;;  %vm1560_vm2 = vweird.f32 %v5088_v32  ;;  %2894 = vrsqrt.f32 %v5156_v54  ;;  %vm1532_vm3 = vmor %vm1530_vm9, %vm1531_vm1 }
 0x188   : > { %1876 = vperm.xlu1 %2848, %v5159_v46   ;;  %v1240_v57 = vmul.f32 0.0012755102, %v1156_v23  ;;  %v1509_v58 = vmul.f32 %v4954_v48, %v1508_v11  ;;  %v1557_v7 = vmul.f32 0.5, %v1556_v20  ;;  %v1533_v35 = vsel %vm1532_vm3, %v5058_v43, %v1529_v50  ;;  %v1147_v33 = vpop.xlane.xlu1 %1146 }
 0x189   : > { %v1546_v19 = vmul.f32 %v5153_v8, %v1545_v47  ;;  %v5175_v29 = vadd.f32 0.001, %v1325_v22  ;;  %v5178_v42 = vmul.f32 0.5, %v1566_v16  ;;  %v5181_v40 = vmul.f32 %v1680_v62, %v1533_v35 }
 0x18a   : > { %v1300_v63 = vsub.f32 %v1240_v57, %v4758_v15  ;;  %vm1511_vm4 = vweird.f32 %v4954_v48  ;;  %v5185_v45 = vpop.eup %2892  ;;  %vm1540_vm5 = vweird.f32 %v4984_v9  ;;  %v1558_v1 = vsub.f32 1.5, %v1557_v7 }
 0x18b   : > { %v1547_v11 = vmul.f32 0.5, %v1546_v19  ;;  %2896 = vrsqrt.f32 %v5175_v29  ;;  %vm1512_vm6 = vmor %vm1510_vm11, %vm1511_vm4  ;;  %v1519_v43 = vmul.f32 %v5071_v4, %v1518_v37  ;;  %v1595_v15 = vmul.f32 %v5185_v45, %v5128_v18  ;;  %1896 = vperm.xlu0 %2847, %v5181_v40   ;;  %v1138_v57 = vpop.xlane.xlu0 %1137 }
 0x18c   : > { %v1330_v50 = vmax.f32 %v1300_v63, 0.0  ;;  %v1239_v16 = vmul.f32 0.0012755102, %v1147_v33  ;;  %v1513_v20 = vsel %vm1512_vm6, %v4954_v48, %v1509_v58  ;;  %vm1550_vm7 = vweird.f32 %v5098_v49  ;;  %v1679_v58 = vld [vmem:[%s4795_s22 + $0x78] sm:$0xff] }
 0x18d   : > { %v5197_v47 = vmul.f32 %v1678_v60, %v1513_v20  ;;  %vm1521_vm8 = vweird.f32 %v5071_v4  ;;  %v1559_v3 = vmul.f32 %v5138_v28, %v1558_v1  ;;  %v5201_v37 = vpop.eup %2894  ;;  %v1568_v22 = vsub.f32 1.5, %v5178_v42  ;;  %v1683_v63 = vld [vmem:[%s4795_s22 + $0x98] sm:$0xff] }
 0x18e   : > { %v5204_v23 = vadd.f32 0.001, %v1330_v50  ;;  %v1299_v62 = vsub.f32 %v1239_v16, %v4765_v30  ;;  %vm5209_vm9 = vmor %vm1520_vm15, %vm1521_vm8  ;;  %vm1561_vm10 = vweird.f32 %v5138_v28  ;;  %v1548_v7 = vsub.f32 1.5, %v1547_v11 }
 0x18f   : > { %v1585_v19 = vmul.f32 %v5201_v37, %v5156_v54  ;;  %v1238_v35 = vmul.f32 0.0012755102, %v1138_v57  ;;  %1886 = vperm.xlu2 %2849, %v5197_v47   ;;  %v1523_v30 = vsel %vm5209_vm9, %v5071_v4, %v1519_v43  ;;  %v1596_v6 = vmul.f32 %v5185_v45, %v1595_v15  ;;  %vm1562_vm11 = vmor %vm1560_vm2, %vm1561_vm10 }
 0x190   : > { %2898 = vrsqrt.f32 %v5204_v23  ;;  %v1329_v60 = vmax.f32 %v1299_v62, 0.0  ;;  %v1539_v1 = vmul.f32 %v5026_v59, %v1538_v52  ;;  %vm1570_vm12 = vweird.f32 %v5061_v36  ;;  %v1183_v62 = vpop.xlane.xlu2 %1182 }
 0x191   : > { %v5229_v11 = vpop.eup %2896  ;;  %v1586_v4 = vmul.f32 %v5201_v37, %v1585_v19  ;;  %v1298_v33 = vsub.f32 %v1238_v35, %v4773_v2  ;;  %v5234_v43 = vmul.f32 %v1679_v58, %v1523_v30  ;;  %v1563_v15 = vsel %vm1562_vm11, %v5138_v28, %v1559_v3  ;;  %v1681_v2 = vld [vmem:[%s4795_s22 + $0x88] sm:$0xff]  ;;  %v1682_v19 = vld [vmem:[%s4795_s22 + $0x90] sm:$0xff] }
 0x192   : > { %vm1590_vm13 = vweird.f32 %v5156_v54  ;;  %v1575_v32 = vmul.f32 %v5229_v11, %v5175_v29  ;;  %v5240_v5 = vadd.f32 0.001, %v1329_v60  ;;  %v5242_v52 = vmul.f32 %v1683_v63, %v1563_v15  ;;  %v1174_v49 = vpop.xlane.xlu1 %1173 }
 0x193   : > { %v1587_v50 = vmul.f32 0.5, %v1586_v4  ;;  %v1328_v16 = vmax.f32 %v1298_v33, 0.0  ;;  %1891 = vperm.xlu1 %2848, %v5234_v43   ;;  %vm1541_vm14 = vweird.f32 %v5026_v59  ;;  %v1549_v20 = vmul.f32 %v5153_v8, %v1548_v7 }
 0x194   : > { %v5248_v28 = vmul.f32 0.5, %v1596_v6  ;;  %v1576_v3 = vmul.f32 %v5229_v11, %v1575_v32  ;;  %2900 = vrsqrt.f32 %v5240_v5  ;;  %1911 = vperm.xlu0 %2847, %v5242_v52   ;;  %vm1542_vm15 = vmor %vm1540_vm5, %vm1541_vm14  ;;  %vm1551_vm1 = vweird.f32 %v5153_v8 }
 0x195   : > { %v1588_v57 = vsub.f32 1.5, %v1587_v50  ;;  %v5256_v48 = vadd.f32 0.001, %v1328_v16  ;;  %v1243_v58 = vmul.f32 0.0012755102, %v1183_v62  ;;  %v1543_v7 = vsel %vm1542_vm15, %v5026_v59, %v1539_v1  ;;  %vm1552_vm2 = vmor %vm1550_vm7, %vm1551_vm1 }
 0x196   : > { %v5262_v35 = vpop.eup %2898  ;;  %v1577_v30 = vmul.f32 0.5, %v1576_v3  ;;  %v5264_v63 = vmul.f32 %v1681_v2, %v1543_v7  ;;  %v1553_v9 = vsel %vm1552_vm2, %v5153_v8, %v1549_v20  ;;  %vm1591_vm3 = vweird.f32 %v5201_v37  ;;  %v1165_v20 = vpop.xlane.xlu0 %1164 }
 0x197   : > { %vm1580_vm4 = vweird.f32 %v5175_v29  ;;  %v1625_v6 = vmul.f32 %v5262_v35, %v5204_v23  ;;  %2902 = vrsqrt.f32 %v5256_v48  ;;  %v1303_v59 = vsub.f32 %v1243_v58, %v4777_v39  ;;  %vm5280_vm5 = vmor %vm1590_vm13, %vm1591_vm3  ;;  %v1686_v39 = vld [vmem:[%s4795_s22 + $0xb0] sm:$0xff] }
 0x198   : > { %v1578_v60 = vsub.f32 1.5, %v1577_v30  ;;  %v1242_v1 = vmul.f32 0.0012755102, %v1174_v49  ;;  %1901 = vperm.xlu2 %2849, %v5264_v63   ;;  %v5274_v4 = vmul.f32 %v1682_v19, %v1553_v9  ;;  %v1589_v8 = vmul.f32 %v5201_v37, %v1588_v57  ;;  %v1685_v30 = vld [vmem:[%s4795_s22 + $0xa8] sm:$0xff] }
 0x199   : > { %v1598_v33 = vsub.f32 1.5, %v5248_v28  ;;  %v1333_v15 = vmax.f32 %v1303_v59, 0.0  ;;  %v1569_v50 = vmul.f32 %v5114_v55, %v1568_v22  ;;  %vm1571_vm6 = vweird.f32 %v5114_v55 }
 0x19a   : > { %v2901_v16 = vpop.eup %2900  ;;  %v1302_v2 = vsub.f32 %v1242_v1, %v4781_v61  ;;  %v1593_v54 = vsel %vm5280_vm5, %v5201_v37, %v1589_v8  ;;  %vm5295_vm7 = vmor %vm1570_vm12, %vm1571_vm6  ;;  %v1579_v42 = vmul.f32 %v5229_v11, %v1578_v60  ;;  %vm1581_vm8 = vweird.f32 %v5229_v11  ;;  %v1684_v37 = vld [vmem:[%s4795_s22 + $0xa0] sm:$0xff] }
 0x19b   : > { %v1626_v22 = vmul.f32 %v5262_v35, %v1625_v6  ;;  %v1615_v61 = vmul.f32 %v2901_v16, %v5240_v5  ;;  %v5303_v3 = vadd.f32 0.001, %v1333_v15  ;;  %v1241_v62 = vmul.f32 0.0012755102, %v1165_v20  ;;  %1906 = vperm.xlu1 %2848, %v5274_v4   ;;  %vm5309_vm9 = vmor %vm1580_vm4, %vm1581_vm8 }
 0x19c   : > { %v1332_v57 = vmax.f32 %v1302_v2, 0.0  ;;  %v5313_v58 = vmul.f32 %v1686_v39, %v1593_v54  ;;  %v1573_v7 = vsel %vm5295_vm7, %v5114_v55, %v1569_v50  ;;  %v1583_v19 = vsel %vm5309_vm9, %v5229_v11, %v1579_v42  ;;  %v1687_v42 = vld [vmem:[%s4795_s22 + $0xb8] sm:$0xff] }
 0x19d   : > { %v2903_v9 = vpop.eup %2902  ;;  %v1616_v6 = vmul.f32 %v2901_v16, %v1615_v61  ;;  %2904 = vrsqrt.f32 %v5303_v3  ;;  %v1301_v49 = vsub.f32 %v1241_v62, %v4863_v17  ;;  %v5328_v60 = vmul.f32 %v1684_v37, %v1573_v7  ;;  %v1688_v7 = vld [vmem:[%s4795_s22 + $0xc0] sm:$0xff] }
 0x19e   : > { %v1605_v29 = vmul.f32 %v2903_v9, %v5256_v48  ;;  %v5324_v59 = vadd.f32 0.001, %v1332_v57  ;;  %1926 = vperm.xlu0 %2847, %v5313_v58   ;;  %v1627_v55 = vmul.f32 0.5, %v1626_v22  ;;  %v5330_v8 = vmul.f32 %v1685_v30, %v1583_v19 }
 0x19f   : > { %v1617_v1 = vmul.f32 0.5, %v1616_v6  ;;  %v1599_v11 = vmul.f32 %v5185_v45, %v1598_v33  ;;  %v1331_v32 = vmax.f32 %v1301_v49, 0.0  ;;  %vm1600_vm10 = vweird.f32 %v5128_v18  ;;  %v1689_v18 = vld [vmem:[%s4795_s22 + $0xc8] sm:$0xff] }
 0x1a0   : > { %v1606_v15 = vmul.f32 %v2903_v9, %v1605_v29  ;;  %2906 = vrsqrt.f32 %v5324_v59  ;;  %1916 = vperm.xlu2 %2849, %v5328_v60   ;;  %vm1621_vm11 = vweird.f32 %v2901_v16  ;;  %vm1601_vm12 = vweird.f32 %v5185_v45 }
 0x1a1   : > { %v1618_v17 = vsub.f32 1.5, %v1617_v1  ;;  %v5337_v50 = vadd.f32 0.001, %v1331_v32  ;;  %vm5339_vm13 = vmor %vm1600_vm10, %vm1601_vm12  ;;  %v1628_v20 = vsub.f32 1.5, %v1627_v55  ;;  %vm1620_vm14 = vweird.f32 %v5240_v5  ;;  %v1690_v32 = vld [vmem:[%s4795_s22 + $0xd0] sm:$0xff] }
 0x1a2   : > { %v1607_v39 = vmul.f32 0.5, %v1606_v15  ;;  %v1603_v28 = vsel %vm5339_vm13, %v5185_v45, %v1599_v11  ;;  %vm1622_vm15 = vmor %vm1620_vm14, %vm1621_vm11  ;;  %vm1611_vm1 = vweird.f32 %v2903_v9  ;;  %vm1610_vm2 = vweird.f32 %v5256_v48 }
 0x1a3   : > { %v5343_v33 = vpop.eup %2904  ;;  %1921 = vperm.xlu1 %2848, %v5330_v8   ;;  %v1619_v54 = vmul.f32 %v2901_v16, %v1618_v17  ;;  %2908 = vrsqrt.f32 %v5337_v50  ;;  %v5360_v57 = vmul.f32 %v1687_v42, %v1603_v28  ;;  %vm1612_vm3 = vmor %vm1610_vm2, %vm1611_vm1  ;;  %v1629_v30 = vmul.f32 %v5262_v35, %v1628_v20  ;;  %v1692_v20 = vld [vmem:[%s4795_s22 + $0xe0] sm:$0xff]  ;;  %v1691_v42 = vld [vmem:[%s4795_s22 + $0xd8] sm:$0xff] }
 0x1a4   : > { %v1608_v22 = vsub.f32 1.5, %v1607_v39  ;;  %v1655_v61 = vmul.f32 %v5343_v33, %v5303_v3  ;;  %vm1631_vm4 = vweird.f32 %v5262_v35  ;;  %vm1630_vm5 = vweird.f32 %v5204_v23 }
 0x1a5   : > { %v1623_v5 = vsel %vm1622_vm15, %v2901_v16, %v1619_v54  ;;  %vm1632_vm6 = vmor %vm1630_vm5, %vm1631_vm4  ;;  %vm1650_vm8 = vweird.f32 %v5324_v59  ;;  %vm1661_vm9 = vweird.f32 %v5343_v33  ;;  %vm1660_vm11 = vweird.f32 %v5303_v3 }
 0x1a6   : > { %v2907_v62 = vpop.eup %2906  ;;  %v1656_v37 = vmul.f32 %v5343_v33, %v1655_v61  ;;  %v5358_v36 = vmul.f32 %v1689_v18, %v1623_v5  ;;  %v1609_v45 = vmul.f32 %v2903_v9, %v1608_v22  ;;  %v1633_v15 = vsel %vm1632_vm6, %v5262_v35, %v1629_v30  ;;  %vm1662_vm13 = vmor %vm1660_vm11, %vm1661_vm9  ;;  %v1693_v61 = vld [vmem:[%s4795_s22 + $0xe8] sm:$0xff]  ;;  %v1696_v30 = vld [vmem:[%s5395_s25 + $0x10] sm:$0xff] }
 0x1a7   : > { %v1645_v19 = vmul.f32 %v2907_v62, %v5324_v59  ;;  %vm1651_vm7 = vweird.f32 %v2907_v62  ;;  %v5376_v23 = vmul.f32 %v1690_v32, %v1633_v15  ;;  %vm1640_vm14 = vweird.f32 %v5337_v50  ;;  %v1701_v32 = vld [vmem:[%s5395_s25 + $0x38] sm:$0xff] }
 0x1a8   : > { %v1657_v6 = vmul.f32 0.5, %v1656_v37  ;;  %1941 = vperm.xlu0 %2847, %v5358_v36   ;;  %1931 = vperm.xlu2 %2849, %v5360_v57   ;;  %v1613_v48 = vsel %vm1612_vm3, %v2903_v9, %v1609_v45  ;;  %vm1652_vm10 = vmor %vm1650_vm8, %vm1651_vm7  ;;  %v1754_v45 = vmul.f32 %v4881_v26, %v4557_v44  ;;  %v1757_v44 = vmul.f32 %v4944_v51, %v4563_v10  ;;  %v1697_v26 = vld [vmem:[%s5395_s25 + $0x18] sm:$0xff] }
 0x1a9   : > { %v1646_v16 = vmul.f32 %v2907_v62, %v1645_v19  ;;  %v5369_v29 = vmul.f32 %v1688_v7, %v1613_v48  ;;  %v2909_v49 = vpop.eup %2908  ;;  %v1756_v7 = vmul.f32 %v4831_v0, %v4552_v41  ;;  %v1694_v19 = vld [vmem:[%s5395_s25] sm:$0xff]  ;;  %v6787_v10 = vld [vmem:[#allocation5_spill] sm:$0xff] }
 0x1aa   : > { %v1658_v55 = vsub.f32 1.5, %v1657_v6  ;;  %v1635_v11 = vmul.f32 %v2909_v49, %v5337_v50  ;;  %vm1641_vm12 = vweird.f32 %v2909_v49  ;;  %v1755_v50 = vmul.f32 %v4873_v56, %v4566_v12  ;;  %v6785_v41 = vld [vmem:[#allocation2_spill] sm:$0xff] }
 0x1ab   : > { %v1647_v1 = vmul.f32 0.5, %v1646_v16  ;;  %1936 = vperm.xlu1 %2848, %v5369_v29   ;;  %vm1642_vm15 = vmor %vm1640_vm14, %vm1641_vm12  ;;  %v1784_v12 = vsub.f32 %v1694_v19, %v1754_v45  ;;  %v1758_v56 = vmul.f32 %v4938_v13, %v4549_v31  ;;  %v1786_v48 = vsub.f32 %v1696_v30, %v1756_v7  ;;  %v1698_v16 = vld [vmem:[%s5395_s25 + $0x20] sm:$0xff]  ;;  %v6786_v31 = vld [vmem:[#allocation3_spill] sm:$0xff] }
 0x1ac   : > { %v1636_v39 = vmul.f32 %v2909_v49, %v1635_v11  ;;  %v1659_v54 = vmul.f32 %v5343_v33, %v1658_v55  ;;  %v1759_v0 = vmul.f32 %v5006_v53, %v6785_v41  ;;  %v1699_v55 = vld [vmem:[%s5395_s25 + $0x28] sm:$0xff]  ;;  %v1787_v11 = vsub.f32 %v1697_v26, %v1757_v44  ;;  %v6788_v53 = vld [vmem:[#allocation4_spill] sm:$0xff]  ;;  %v6795_v41 = vld [vmem:[#allocation13_spill] sm:$0xff] }
 0x1ad   : > { %v1648_v17 = vsub.f32 1.5, %v1647_v1  ;;  %v1761_v13 = vmul.f32 %v4994_v24, %v6786_v31  ;;  %v1760_v51 = vmul.f32 %v5022_v14, %v6787_v10  ;;  %v6789_v24 = vld [vmem:[#allocation8_spill] sm:$0xff]  ;;  %v6790_v14 = vld [vmem:[#allocation9_spill] sm:$0xff]  ;;  %v1707_v30 = vld [vmem:[%s5395_s25 + $0x68] sm:$0xff] }
 0x1ae   : > { %v1637_v9 = vmul.f32 0.5, %v1636_v39  ;;  %v1663_v22 = vsel %vm1662_vm13, %v5343_v33, %v1659_v54  ;;  %v1789_v15 = vsub.f32 %v1699_v55, %v1759_v0  ;;  %v1762_v39 = vmul.f32 %v5077_v34, %v6788_v53  ;;  %v1710_v55 = vld [vmem:[%s5395_s25 + $0x80] sm:$0xff]  ;;  %v6796_v31 = vld [vmem:[#allocation20_spill] sm:$0xff]  ;;  %v6798_v53 = vld [vmem:[#allocation15_spill] sm:$0xff] }
 0x1af   : > { %v1649_v2 = vmul.f32 %v2907_v62, %v1648_v17  ;;  %v5401_v33 = vmul.f32 %v1693_v61, %v1663_v22  ;;  %v1791_v17 = vsub.f32 %v1701_v32, %v1761_v13  ;;  %v1763_v22 = vmul.f32 %v5092_v27, %v6790_v14  ;;  %v6791_v61 = vld [vmem:[#allocation7_spill] sm:$0xff] }
 0x1b0   : > { %1946 = vperm.xlu2 %2849, %v5376_v23   ;;  %v1638_v35 = vsub.f32 1.5, %v1637_v9  ;;  %v1700_v9 = vld [vmem:[%s5395_s25 + $0x30] sm:$0xff]  ;;  %v1765_v34 = vmul.f32 %v5142_v21, %v6791_v61  ;;  %v1770_v0 = vmul.f32 %v5181_v40, %v6795_v41  ;;  %v1769_v13 = vmul.f32 %v5234_v43, %v6796_v31  ;;  %v1711_v40 = vld [vmem:[%s5395_s25 + $0x88] sm:$0xff] }
 0x1b1   : > { %v1653_v18 = vsel %vm1652_vm10, %v2907_v62, %v1649_v2  ;;  %v1695_v62 = vld [vmem:[%s5395_s25 + $0x8] sm:$0xff]  ;;  %v1702_v2 = vld [vmem:[%s5395_s25 + $0x40] sm:$0xff]  ;;  %v1790_v54 = vsub.f32 %v1700_v9, %v1760_v51 }
 0x1b2   : > { %v5383_v59 = vmul.f32 %v1692_v20, %v1653_v18  ;;  %v1639_v28 = vmul.f32 %v2909_v49, %v1638_v35  ;;  %v1785_v37 = vsub.f32 %v1695_v62, %v1755_v50  ;;  %v5412_v6 = vpop.permute.xlu2 %1826  ;;  %v1764_v35 = vmul.f32 %v5075_v38, %v6789_v24  ;;  %v1705_v50 = vld [vmem:[%s5395_s25 + $0x58] sm:$0xff] }
 0x1b3   : > { %v1792_v18 = vsub.f32 %v1702_v2, %v1762_v39  ;;  %v1795_v7 = vsub.f32 %v1705_v50, %v1765_v34  ;;  %v1773_v39 = vmul.f32 %v5242_v52, %v6798_v53  ;;  %v1713_v2 = vld [vmem:[%s5395_s25 + $0x98] sm:$0xff]  ;;  %v1714_v52 = vld [vmem:[%s5395_s25 + $0xa0] sm:$0xff]  ;;  %v1716_v50 = vld [vmem:[%s5395_s25 + $0xb0] sm:$0xff] }
 0x1b4   : > { %1956 = vperm.xlu0 %2847, %v5383_v59   ;;  %v1643_v3 = vsel %vm1642_vm15, %v2909_v49, %v1639_v28  ;;  %v1788_v49 = vsub.f32 %v1698_v16, %v1758_v56  ;;  %v1704_v28 = vld [vmem:[%s5395_s25 + $0x50] sm:$0xff]  ;;  %v6794_v56 = vld [vmem:[#allocation6_spill] sm:$0xff]  ;;  %v6799_v24 = vld [vmem:[#allocation17_spill] sm:$0xff] }
 0x1b5   : > { %v5397_v5 = vmul.f32 %v1691_v42, %v1643_v3  ;;  %v1794_v42 = vsub.f32 %v1704_v28, %v1764_v35  ;;  %v1703_v3 = vld [vmem:[%s5395_s25 + $0x48] sm:$0xff]  ;;  %v1706_v16 = vld [vmem:[%s5395_s25 + $0x60] sm:$0xff]  ;;  %v1772_v35 = vmul.f32 %v5274_v4, %v6799_v24 }
 0x1b6   : > { %v1793_v38 = vsub.f32 %v1703_v3, %v1763_v22  ;;  %v6801_v22 = vld [vmem:[#allocation18_spill] sm:$0xff] }
 0x1b7   : > { %1951 = vperm.xlu1 %2848, %v5397_v5   ;;  %v1776_v61 = vmul.f32 %v5313_v58, %v6801_v22  ;;  %v1715_v58 = vld [vmem:[%s5395_s25 + $0xa8] sm:$0xff] }
 0x1b8   : > { %1961 = vperm.xlu2 %2849, %v5401_v33  }
 0x1bc   : > { %2181 = vperm.xlu0 %2847, %v1785_v37   ;;  %v6792_v37 = vld [vmem:[#allocation10_spill] sm:$0xff] }
 0x1bd   : > { %v1767_v45 = vmul.f32 %v5116_v25, %v6792_v37 }
 0x1bf   : > { %2176 = vperm.xlu1 %2848, %v1784_v12   ;;  %v1797_v27 = vsub.f32 %v1707_v30, %v1767_v45  ;;  %v6793_v12 = vld [vmem:[#allocation11_spill] sm:$0xff] }
 0x1c0   : > { %2186 = vperm.xlu2 %2849, %v1786_v48   ;;  %v1766_v21 = vmul.f32 %v5159_v46, %v6793_v12  ;;  %v1768_v48 = vmul.f32 %v5197_v47, %v6794_v56  ;;  %v1800_v47 = vsub.f32 %v1710_v55, %v1770_v0  ;;  %v6806_v0 = vld [vmem:[#allocation19_spill] sm:$0xff]  ;;  %v1718_v55 = vld [vmem:[%s5395_s25 + $0xc0] sm:$0xff] }
 0x1c2   : > { %v1796_v44 = vsub.f32 %v1706_v16, %v1766_v21  ;;  %v6804_v21 = vld [vmem:[#allocation21_spill] sm:$0xff] }
 0x1c3   : > { %v1779_v56 = vmul.f32 %v5358_v36, %v6804_v21 }
 0x1c4   : > { %2196 = vperm.xlu0 %2847, %v1788_v49   ;;  %v5423_v1 = vpop.permute.xlu2 %1831  ;;  %v1708_v49 = vld [vmem:[%s5395_s25 + $0x70] sm:$0xff] }
 0x1c5   : > { %v1798_v26 = vsub.f32 %v1708_v49, %v1768_v48  ;;  %v1719_v49 = vld [vmem:[%s5395_s25 + $0xc8] sm:$0xff] }
 0x1c7   : > { %2191 = vperm.xlu1 %2848, %v1787_v11  }
 0x1c8   : > { %2201 = vperm.xlu2 %2849, %v1789_v15   ;;  %v6797_v15 = vld [vmem:[#allocation12_spill] sm:$0xff] }
 0x1c9   : > { %v1771_v32 = vmul.f32 %v5264_v63, %v6797_v15  ;;  %v1803_v63 = vsub.f32 %v1713_v2, %v1773_v39  ;;  %v6809_v39 = vld [vmem:[#allocation22_spill] sm:$0xff]  ;;  %v1721_v2 = vld [vmem:[%s5395_s25 + $0xd8] sm:$0xff] }
 0x1cb   : > { %v1801_v9 = vsub.f32 %v1711_v40, %v1771_v32 }
 0x1cc   : > { %2211 = vperm.xlu0 %2847, %v1791_v17   ;;  %v5434_v20 = vpop.permute.xlu2 %1841  ;;  %v1709_v17 = vld [vmem:[%s5395_s25 + $0x78] sm:$0xff] }
 0x1cd   : > { %v1799_v51 = vsub.f32 %v1709_v17, %v1769_v13  ;;  %v6807_v13 = vld [vmem:[#allocation29_spill] sm:$0xff] }
 0x1ce   : > { %v1782_v15 = vmul.f32 %v5383_v59, %v6807_v13 }
 0x1cf   : > { %2206 = vperm.xlu1 %2848, %v1790_v54  }
 0x1d0   : > { %2216 = vperm.xlu2 %2849, %v1792_v18   ;;  %v6800_v18 = vld [vmem:[#allocation14_spill] sm:$0xff] }
 0x1d1   : > { %v5445_v62 = vpop.permute.xlu1 %1821  ;;  %v1774_v28 = vmul.f32 %v5328_v60, %v6800_v18  ;;  %v6802_v60 = vld [vmem:[#allocation24_spill] sm:$0xff] }
 0x1d2   : > { %v1775_v37 = vmul.f32 %v5330_v8, %v6802_v60  ;;  %v1809_v8 = vsub.f32 %v1719_v49, %v1779_v56  ;;  %v2913_v60 = vld [vmem:[%s3165_s18 + $0x88] sm:$0xff]  ;;  %v2915_v56 = vld [vmem:[%s3165_s18 + $0x98] sm:$0xff] }
 0x1d3   : > { %v5458_v25 = vpop.permute.xlu0 %1816  ;;  %v1804_v34 = vsub.f32 %v1714_v52, %v1774_v28 }
 0x1d4   : > { %2226 = vperm.xlu0 %2847, %v1794_v42   ;;  %v1712_v42 = vld [vmem:[%s5395_s25 + $0x90] sm:$0xff]  ;;  %v1805_v12 = vsub.f32 %v1715_v58, %v1775_v37  ;;  %v1981_v37 = vmul.f32 %v2913_v60, %v5412_v6 }
 0x1d5   : > { %v5449_v19 = vpop.permute.xlu2 %1856  ;;  %v1802_v14 = vsub.f32 %v1712_v42, %v1772_v35 }
 0x1d7   : > { %2221 = vperm.xlu1 %2848, %v1793_v38   ;;  %v1806_v38 = vsub.f32 %v1716_v50, %v1776_v61  ;;  %v2911_v61 = vld [vmem:[%s3165_s18 + $0x78] sm:$0xff]  ;;  %v2912_v50 = vld [vmem:[%s3165_s18 + $0x80] sm:$0xff] }
 0x1d8   : > { %2231 = vperm.xlu2 %2849, %v1795_v7   ;;  %v6803_v7 = vld [vmem:[#allocation16_spill] sm:$0xff] }
 0x1d9   : > { %v1777_v30 = vmul.f32 %v5360_v57, %v6803_v7 }
 0x1da   : > { %v5463_v11 = vpop.permute.xlu1 %1836 }
 0x1dc   : > { %2241 = vperm.xlu0 %2847, %v1797_v27   ;;  %v1717_v27 = vld [vmem:[%s5395_s25 + $0xb8] sm:$0xff] }
 0x1dd   : > { %v1807_v48 = vsub.f32 %v1717_v27, %v1777_v30  ;;  %v2914_v30 = vld [vmem:[%s3165_s18 + $0x90] sm:$0xff] }
 0x1de   : > { %v1982_v58 = vmul.f32 %v2914_v30, %v5412_v6 }
 0x1df   : > { %2236 = vperm.xlu1 %2848, %v1796_v44   ;;  %v6805_v44 = vld [vmem:[#allocation23_spill] sm:$0xff] }
 0x1e0   : > { %2246 = vperm.xlu2 %2849, %v1798_v26   ;;  %v5465_v46 = vpop.permute.xlu2 %1871  ;;  %v1778_v41 = vmul.f32 %v5369_v29, %v6805_v44  ;;  %v1780_v26 = vmul.f32 %v5376_v23, %v6806_v0  ;;  %v1722_v29 = vld [vmem:[%s5395_s25 + $0xe0] sm:$0xff] }
 0x1e1   : > { %v1812_v40 = vsub.f32 %v1722_v29, %v1782_v15  ;;  %v2916_v44 = vld [vmem:[%s3165_s18 + $0xa0] sm:$0xff] }
 0x1e2   : > { %v1808_v31 = vsub.f32 %v1718_v55, %v1778_v41  ;;  %v1984_v41 = vmul.f32 %v2916_v44, %v5412_v6  ;;  %v2918_v15 = vld [vmem:[%s3165_s18 + $0x120] sm:$0xff] }
 0x1e3   : > { %v5473_v10 = vpop.permute.xlu0 %1851  ;;  %v2928_v44 = vld [vmem:[%s3165_s18 + $0x1e0] sm:$0xff] }
 0x1e4   : > { %2256 = vperm.xlu0 %2847, %v1800_v47   ;;  %v1720_v47 = vld [vmem:[%s5395_s25 + $0xd0] sm:$0xff] }
 0x1e5   : > { %v1810_v32 = vsub.f32 %v1720_v47, %v1780_v26 }
 0x1e7   : > { %2251 = vperm.xlu1 %2848, %v1799_v51   ;;  %v5480_v54 = vpop.permute.xlu1 %1846  ;;  %v6808_v51 = vld [vmem:[#allocation25_spill] sm:$0xff] }
 0x1e8   : > { %2261 = vperm.xlu2 %2849, %v1801_v9   ;;  %v1781_v23 = vmul.f32 %v5397_v5, %v6808_v51  ;;  %v1783_v9 = vmul.f32 %v5401_v33, %v6809_v39  ;;  %v2921_v39 = vld [vmem:[%s3165_s18 + $0x138] sm:$0xff] }
 0x1e9   : > { %v5478_v43 = vpop.permute.xlu2 %1886 }
 0x1ea   : > { %v1811_v24 = vsub.f32 %v1721_v2, %v1781_v23 }
 0x1ec   : > { %2271 = vperm.xlu0 %2847, %v1803_v63   ;;  %v5490_v3 = vpop.permute.xlu0 %1866  ;;  %v1723_v63 = vld [vmem:[%s5395_s25 + $0xe8] sm:$0xff] }
 0x1ed   : > { %v1813_v35 = vsub.f32 %v1723_v63, %v1783_v9  ;;  %v2003_v9 = vmul.f32 %v2921_v39, %v5434_v20 }
 0x1ef   : > { %2266 = vperm.xlu1 %2848, %v1802_v14   ;;  %v5493_v4 = vpop.permute.xlu1 %1861  ;;  %v2910_v14 = vld [vmem:[%s3165_s18 + $0x70] sm:$0xff] }
 0x1f0   : > { %2276 = vperm.xlu2 %2849, %v1804_v34   ;;  %v1978_v22 = vmul.f32 %v2910_v14, %v5412_v6  ;;  %v1979_v34 = vmul.f32 %v2911_v61, %v5412_v6  ;;  %v2923_v61 = vld [vmem:[%s3165_s18 + $0x148] sm:$0xff] }
 0x1f2   : > { %v5497_v45 = vpop.permute.xlu2 %1901 }
 0x1f4   : > { %2286 = vperm.xlu0 %2847, %v1806_v38   ;;  %v5505_v16 = vpop.permute.xlu0 %1881  ;;  %v1980_v38 = vmul.f32 %v2912_v50, %v5412_v6 }
 0x1f7   : > { %2281 = vperm.xlu1 %2848, %v1805_v12  }
 0x1f8   : > { %2291 = vperm.xlu2 %2849, %v1807_v48   ;;  %v1983_v48 = vmul.f32 %v2915_v56, %v5412_v6  ;;  %v2000_v6 = vmul.f32 %v2918_v15, %v5434_v20 }
 0x1fa   : > { %v5510_v57 = vpop.permute.xlu2 %1916  ;;  %v5515_v36 = vpop.permute.xlu1 %1876 }
 0x1fc   : > { %2301 = vperm.xlu0 %2847, %v1809_v8  }
 0x1fd   : > { %v5520_v17 = vpop.permute.xlu0 %1896 }
 0x1ff   : > { %2296 = vperm.xlu1 %2848, %v1808_v31   ;;  %v2917_v31 = vld [vmem:[%s3165_s18 + $0x118] sm:$0xff] }
 0x200   : > { %2306 = vperm.xlu2 %2849, %v1810_v32   ;;  %v1999_v13 = vmul.f32 %v2917_v31, %v5434_v20  ;;  %v2919_v32 = vld [vmem:[%s3165_s18 + $0x128] sm:$0xff] }
 0x201   : > { %v2001_v29 = vmul.f32 %v2919_v32, %v5434_v20  ;;  %v2929_v31 = vld [vmem:[%s3165_s18 + $0x1e8] sm:$0xff] }
 0x202   : > { %v5525_v53 = vpop.permute.xlu2 %1931 }
 0x204   : > { %2316 = vperm.xlu0 %2847, %v1812_v40   ;;  %v2920_v40 = vld [vmem:[%s3165_s18 + $0x130] sm:$0xff] }
 0x205   : > { %v5531_v59 = vpop.permute.xlu1 %1891  ;;  %v2002_v51 = vmul.f32 %v2920_v40, %v5434_v20  ;;  %v2931_v40 = vld [vmem:[%s3165_s18 + $0x38] sm:$0xff] }
 0x206   : > { %v5533_v5 = vpop.permute.xlu0 %1911 }
 0x207   : > { %2311 = vperm.xlu1 %2848, %v1811_v24  }
 0x208   : > { %2321 = vperm.xlu2 %2849, %v1813_v35   ;;  %v2922_v35 = vld [vmem:[%s3165_s18 + $0x140] sm:$0xff] }
 0x209   : > { %v2004_v14 = vmul.f32 %v2922_v35, %v5434_v20 }
 0x20a   : > { %v5535_v18 = vpop.permute.xlu2 %1946 }
 0x20d   : > { %v5537_v28 = vpop.permute.xlu1 %1906 }
 0x210   : > { %v5541_v42 = vpop.permute.xlu0 %1926 }
 0x212   : > { %v5539_v33 = vpop.permute.xlu2 %1961 }
 0x215   : > { %v5543_v52 = vpop.permute.xlu1 %1921 }
 0x21a   : > { %v2187_v7 = vpop.permute.xlu2 %2186  ;;  %v5564_v8 = vpop.permute.xlu0 %1941 }
 0x21b   : > { %v2338_v27 = vadd.f32 %v2187_v7, %v1978_v22  ;;  %v2339_v12 = vadd.f32 %v2187_v7, %v1979_v34  ;;  %v2340_v21 = vadd.f32 %v2187_v7, %v1980_v38  ;;  %v2341_v49 = vadd.f32 %v2187_v7, %v1981_v37 }
 0x21c   : > { %v2342_v0 = vadd.f32 %v2187_v7, %v1982_v58  ;;  %v2343_v26 = vadd.f32 %v2187_v7, %v1983_v48  ;;  %v2344_v55 = vadd.f32 %v2187_v7, %v1984_v41  ;;  %v2005_v34 = vmul.f32 %v2923_v61, %v5434_v20  ;;  %v2924_v7 = vld [vmem:[%s3165_s18 + $0x1c0] sm:$0xff]  ;;  %v2925_v58 = vld [vmem:[%s3165_s18 + $0x1c8] sm:$0xff]  ;;  %v2935_v61 = vld [vmem:[%s3165_s18 + $0x18] sm:$0xff] }
 0x21d   : > { %2548 = vst [vmem:[%s5556_s28 + $0x70] sm:$0xff] %v2338_v27  ;;  %v5572_v47 = vpop.permute.xlu1 %1936  ;;  %v2020_v30 = vmul.f32 %v2924_v7, %v5449_v19  ;;  %v2021_v20 = vmul.f32 %v2925_v58, %v5449_v19  ;;  %v2926_v27 = vld [vmem:[%s3165_s18 + $0x1d0] sm:$0xff]  ;;  %v2024_v41 = vmul.f32 %v2928_v44, %v5449_v19  ;;  %v2939_v44 = vld [vmem:[%s3165_s18 + $0x40] sm:$0xff] }
 0x21e   : > { %2549 = vst [vmem:[%s5556_s28 + $0x78] sm:$0xff] %v2339_v12  ;;  %v2022_v12 = vmul.f32 %v2926_v27, %v5449_v19 }
 0x21f   : > { %2550 = vst [vmem:[%s5556_s28 + $0x80] sm:$0xff] %v2340_v21  ;;  %v2927_v21 = vld [vmem:[%s3165_s18 + $0x1d8] sm:$0xff] }
 0x220   : > { %2551 = vst [vmem:[%s5556_s28 + $0x88] sm:$0xff] %v2341_v49  ;;  %v2023_v56 = vmul.f32 %v2927_v21, %v5449_v19  ;;  %v2938_v21 = vld [vmem:[%s3165_s18 + $0x30] sm:$0xff] }
 0x221   : > { %2552 = vst [vmem:[%s5556_s28 + $0x90] sm:$0xff] %v2342_v0 }
 0x222   : > { %2553 = vst [vmem:[%s5556_s28 + $0x98] sm:$0xff] %v2343_v26  ;;  %v2202_v23 = vpop.permute.xlu2 %2201 }
 0x223   : > { %2554 = vst.msk [vmem:[%s5556_s28 + $0xa0] sm:$0xff] %vm438_vm0, %v2344_v55  ;;  %v2359_v2 = vadd.f32 %v2202_v23, %v1999_v13  ;;  %v2360_v63 = vadd.f32 %v2202_v23, %v2000_v6  ;;  %v2361_v24 = vadd.f32 %v2202_v23, %v2001_v29  ;;  %v2362_v22 = vadd.f32 %v2202_v23, %v2002_v51  ;;  %v2930_v6 = vld [vmem:[%s3165_s18 + $0x1f0] sm:$0xff] }
 0x224   : > { %v2363_v50 = vadd.f32 %v2202_v23, %v2003_v9  ;;  %v2364_v38 = vadd.f32 %v2202_v23, %v2004_v14  ;;  %v2365_v37 = vadd.f32 %v2202_v23, %v2005_v34  ;;  %v2025_v13 = vmul.f32 %v2929_v31, %v5449_v19  ;;  %v2934_v14 = vld [vmem:[%s3165_s18 + $0x10] sm:$0xff] }
 0x225   : > { %2569 = vst [vmem:[%s5556_s28 + $0x118] sm:$0xff] %v2359_v2  ;;  %v2026_v32 = vmul.f32 %v2930_v6, %v5449_v19  ;;  %v1971_v51 = vmul.f32 %v2931_v40, %v5445_v62  ;;  %v1967_v34 = vmul.f32 %v2935_v61, %v5458_v25  ;;  %v2942_v6 = vld [vmem:[%s3165_s18 + $0x58] sm:$0xff]  ;;  %v2943_v40 = vld [vmem:[%s3165_s18 + $0x60] sm:$0xff] }
 0x226   : > { %2570 = vst [vmem:[%s5556_s28 + $0x120] sm:$0xff] %v2360_v63  ;;  %v5594_v60 = vpop.permute.xlu0 %1956  ;;  %v2932_v63 = vld [vmem:[%s3165_s18] sm:$0xff] }
 0x227   : > { %2571 = vst [vmem:[%s5556_s28 + $0x128] sm:$0xff] %v2361_v24  ;;  %v1964_v19 = vmul.f32 %v2932_v63, %v5458_v25  ;;  %v2933_v24 = vld [vmem:[%s3165_s18 + $0x8] sm:$0xff] }
 0x228   : > { %2572 = vst [vmem:[%s5556_s28 + $0x130] sm:$0xff] %v2362_v22  ;;  %v1965_v35 = vmul.f32 %v2933_v24, %v5458_v25  ;;  %v1966_v22 = vmul.f32 %v2934_v14, %v5458_v25  ;;  %v2945_v24 = vld [vmem:[%s3165_s18 + $0x268] sm:$0xff] }
 0x229   : > { %2573 = vst [vmem:[%s5556_s28 + $0x138] sm:$0xff] %v2363_v50  ;;  %v5608_v48 = vpop.permute.xlu1 %1951 }
 0x22a   : > { %2574 = vst [vmem:[%s5556_s28 + $0x140] sm:$0xff] %v2364_v38  ;;  %v2217_v49 = vpop.permute.xlu2 %2216  ;;  %v2936_v38 = vld [vmem:[%s3165_s18 + $0x20] sm:$0xff] }
 0x22b   : > { %2575 = vst.msk [vmem:[%s5556_s28 + $0x148] sm:$0xff] %vm438_vm0, %v2365_v37  ;;  %v2380_v0 = vadd.f32 %v2217_v49, %v2020_v30  ;;  %v2381_v26 = vadd.f32 %v2217_v49, %v2021_v20  ;;  %v2382_v55 = vadd.f32 %v2217_v49, %v2022_v12  ;;  %v2383_v15 = vadd.f32 %v2217_v49, %v2023_v56  ;;  %v2937_v20 = vld [vmem:[%s3165_s18 + $0x28] sm:$0xff] }
 0x22c   : > { %v2384_v29 = vadd.f32 %v2217_v49, %v2024_v41  ;;  %v2385_v23 = vadd.f32 %v2217_v49, %v2025_v13  ;;  %v2386_v9 = vadd.f32 %v2217_v49, %v2026_v32  ;;  %v1968_v37 = vmul.f32 %v2936_v38, %v5458_v25  ;;  %v2941_v13 = vld [vmem:[%s3165_s18 + $0x50] sm:$0xff] }
 0x22d   : > { %2590 = vst [vmem:[%s5556_s28 + $0x1c0] sm:$0xff] %v2380_v0  ;;  %v1969_v27 = vmul.f32 %v2937_v20, %v5458_v25  ;;  %v1970_v56 = vmul.f32 %v2938_v21, %v5458_v25  ;;  %v1972_v41 = vmul.f32 %v2939_v44, %v5445_v62  ;;  %v1974_v25 = vmul.f32 %v2941_v13, %v5445_v62 }
 0x22e   : > { %2591 = vst [vmem:[%s5556_s28 + $0x1c8] sm:$0xff] %v2381_v26  ;;  %v2182_v39 = vpop.permute.xlu0 %2181  ;;  %v2940_v26 = vld [vmem:[%s3165_s18 + $0x48] sm:$0xff]  ;;  %v1975_v32 = vmul.f32 %v2942_v6, %v5445_v62 }
 0x22f   : > { %2592 = vst [vmem:[%s5556_s28 + $0x1d0] sm:$0xff] %v2382_v55  ;;  %v2331_v2 = vadd.f32 %v2182_v39, %v1971_v51  ;;  %v1973_v55 = vmul.f32 %v2940_v26, %v5445_v62  ;;  %v1976_v51 = vmul.f32 %v2943_v40, %v5445_v62 }
 0x230   : > { %2593 = vst [vmem:[%s5556_s28 + $0x1d8] sm:$0xff] %v2383_v15  ;;  %v2332_v15 = vadd.f32 %v2182_v39, %v1972_v41  ;;  %v2335_v63 = vadd.f32 %v2182_v39, %v1975_v32  ;;  %v2955_v32 = vld [vmem:[%s3165_s18 + $0xc0] sm:$0xff] }
 0x231   : > { %2594 = vst [vmem:[%s5556_s28 + $0x1e0] sm:$0xff] %v2384_v29  ;;  %v2177_v50 = vpop.permute.xlu1 %2176  ;;  %v2333_v29 = vadd.f32 %v2182_v39, %v1973_v55  ;;  %v2336_v14 = vadd.f32 %v2182_v39, %v1976_v51  ;;  %v2956_v51 = vld [vmem:[%s3165_s18 + $0xc8] sm:$0xff] }
 0x232   : > { %2595 = vst [vmem:[%s5556_s28 + $0x1e8] sm:$0xff] %v2385_v23  ;;  %v2324_v7 = vadd.f32 %v2177_v50, %v1964_v19  ;;  %v2325_v30 = vadd.f32 %v2177_v50, %v1965_v35  ;;  %v2326_v58 = vadd.f32 %v2177_v50, %v1966_v22  ;;  %v2327_v12 = vadd.f32 %v2177_v50, %v1967_v34  ;;  %v2232_v19 = vpop.permute.xlu2 %2231  ;;  %v2946_v22 = vld [vmem:[%s3165_s18 + $0x270] sm:$0xff] }
 0x233   : > { %2596 = vst.msk [vmem:[%s5556_s28 + $0x1f0] sm:$0xff] %vm438_vm0, %v2386_v9  ;;  %v2328_v49 = vadd.f32 %v2177_v50, %v1968_v37  ;;  %v2329_v0 = vadd.f32 %v2177_v50, %v1969_v27  ;;  %v2330_v31 = vadd.f32 %v2177_v50, %v1970_v56  ;;  %v2334_v23 = vadd.f32 %v2182_v39, %v1974_v25  ;;  %v2944_v9 = vld [vmem:[%s3165_s18 + $0x68] sm:$0xff]  ;;  %v2948_v37 = vld [vmem:[%s3165_s18 + $0x280] sm:$0xff]  ;;  %v2950_v27 = vld [vmem:[%s3165_s18 + $0x290] sm:$0xff] }
 0x234   : > { %2541 = vst [vmem:[%s5556_s28 + $0x38] sm:$0xff] %v2331_v2  ;;  %v1977_v2 = vmul.f32 %v2944_v9, %v5445_v62  ;;  %v2041_v35 = vmul.f32 %v2945_v24, %v5465_v46  ;;  %v2042_v61 = vmul.f32 %v2946_v22, %v5465_v46  ;;  %v2947_v62 = vld [vmem:[%s3165_s18 + $0x278] sm:$0xff] }
 0x235   : > { %2534 = vst [vmem:[%s5556_s28] sm:$0xff] %v2324_v7  ;;  %v2043_v50 = vmul.f32 %v2947_v62, %v5465_v46  ;;  %v2044_v7 = vmul.f32 %v2948_v37, %v5465_v46  ;;  %v2951_v56 = vld [vmem:[%s3165_s18 + $0x298] sm:$0xff] }
 0x236   : > { %2535 = vst [vmem:[%s5556_s28 + $0x8] sm:$0xff] %v2325_v30  ;;  %v2337_v34 = vadd.f32 %v2182_v39, %v1977_v2  ;;  %v2401_v38 = vadd.f32 %v2232_v19, %v2041_v35  ;;  %v2402_v30 = vadd.f32 %v2232_v19, %v2042_v61  ;;  %v2957_v2 = vld [vmem:[%s3165_s18 + $0xd0] sm:$0xff]  ;;  %v2958_v24 = vld [vmem:[%s3165_s18 + $0xd8] sm:$0xff]  ;;  %v2197_v22 = vpop.permute.xlu0 %2196  ;;  %v2959_v61 = vld [vmem:[%s3165_s18 + $0xe0] sm:$0xff] }
 0x237   : > { %2536 = vst [vmem:[%s5556_s28 + $0x10] sm:$0xff] %v2326_v58  ;;  %v2949_v58 = vld [vmem:[%s3165_s18 + $0x288] sm:$0xff]  ;;  %v2403_v39 = vadd.f32 %v2232_v19, %v2043_v50  ;;  %v2404_v21 = vadd.f32 %v2232_v19, %v2044_v7  ;;  %v1991_v35 = vmul.f32 %v2958_v24, %v5423_v1 }
 0x238   : > { %2537 = vst [vmem:[%s5556_s28 + $0x18] sm:$0xff] %v2327_v12  ;;  %v2045_v20 = vmul.f32 %v2949_v58, %v5465_v46  ;;  %v2046_v12 = vmul.f32 %v2950_v27, %v5465_v46  ;;  %v2960_v50 = vld [vmem:[%s3165_s18 + $0xe8] sm:$0xff]  ;;  %v2962_v58 = vld [vmem:[%s3165_s18 + $0xf8] sm:$0xff]  ;;  %v2963_v27 = vld [vmem:[%s3165_s18 + $0x100] sm:$0xff] }
 0x239   : > { %2538 = vst [vmem:[%s5556_s28 + $0x20] sm:$0xff] %v2328_v49  ;;  %v2047_v49 = vmul.f32 %v2951_v56, %v5465_v46  ;;  %v2192_v41 = vpop.permute.xlu1 %2191  ;;  %v2954_v46 = vld [vmem:[%s3165_s18 + $0xb8] sm:$0xff]  ;;  %v2964_v56 = vld [vmem:[%s3165_s18 + $0x108] sm:$0xff] }
 0x23a   : > { %2539 = vst [vmem:[%s5556_s28 + $0x28] sm:$0xff] %v2329_v0  ;;  %v2405_v44 = vadd.f32 %v2232_v19, %v2045_v20  ;;  %v2952_v0 = vld [vmem:[%s3165_s18 + $0xa8] sm:$0xff]  ;;  %v2406_v55 = vadd.f32 %v2232_v19, %v2046_v12  ;;  %v2351_v37 = vadd.f32 %v2192_v41, %v1991_v35  ;;  %v1995_v20 = vmul.f32 %v2962_v58, %v5463_v11 }
 0x23b   : > { %2540 = vst.msk [vmem:[%s5556_s28 + $0x30] sm:$0xff] %vm438_vm0, %v2330_v31  ;;  %v1985_v26 = vmul.f32 %v2952_v0, %v5423_v1  ;;  %v2953_v31 = vld [vmem:[%s3165_s18 + $0xb0] sm:$0xff]  ;;  %v2407_v25 = vadd.f32 %v2232_v19, %v2047_v49  ;;  %v1996_v12 = vmul.f32 %v2963_v27, %v5463_v11  ;;  %v1997_v49 = vmul.f32 %v2964_v56, %v5463_v11 }
 0x23c   : > { %2542 = vst [vmem:[%s5556_s28 + $0x40] sm:$0xff] %v2332_v15  ;;  %v1986_v13 = vmul.f32 %v2953_v31, %v5423_v1  ;;  %v1987_v15 = vmul.f32 %v2954_v46, %v5423_v1  ;;  %v2966_v31 = vld [vmem:[%s3165_s18 + $0x310] sm:$0xff]  ;;  %v2967_v46 = vld [vmem:[%s3165_s18 + $0x318] sm:$0xff] }
 0x23d   : > { %2543 = vst [vmem:[%s5556_s28 + $0x48] sm:$0xff] %v2333_v29  ;;  %v2345_v6 = vadd.f32 %v2192_v41, %v1985_v26  ;;  %v1988_v29 = vmul.f32 %v2955_v32, %v5423_v1  ;;  %v2356_v26 = vadd.f32 %v2197_v22, %v1996_v12  ;;  %v2977_v12 = vld [vmem:[%s3165_s18 + $0x170] sm:$0xff] }
 0x23e   : > { %2544 = vst [vmem:[%s5556_s28 + $0x50] sm:$0xff] %v2334_v23  ;;  %v2346_v40 = vadd.f32 %v2192_v41, %v1986_v13  ;;  %v1989_v23 = vmul.f32 %v2956_v51, %v5423_v1  ;;  %v2347_v9 = vadd.f32 %v2192_v41, %v1987_v15  ;;  %v2062_v13 = vmul.f32 %v2966_v31, %v5478_v43  ;;  %v2212_v31 = vpop.permute.xlu0 %2211 }
 0x23f   : > { %2545 = vst [vmem:[%s5556_s28 + $0x58] sm:$0xff] %v2335_v63  ;;  %v1990_v63 = vmul.f32 %v2957_v2, %v5423_v1  ;;  %v2348_v19 = vadd.f32 %v2192_v41, %v1988_v29  ;;  %v2961_v1 = vld [vmem:[%s3165_s18 + $0xf0] sm:$0xff]  ;;  %v2063_v15 = vmul.f32 %v2967_v46, %v5478_v43 }
 0x240   : > { %2546 = vst [vmem:[%s5556_s28 + $0x60] sm:$0xff] %v2336_v14  ;;  %v2349_v14 = vadd.f32 %v2192_v41, %v1989_v23  ;;  %v1994_v7 = vmul.f32 %v2961_v1, %v5463_v11 }
 0x241   : > { %2547 = vst.msk [vmem:[%s5556_s28 + $0x68] sm:$0xff] %vm438_vm0, %v2337_v34  ;;  %v1992_v34 = vmul.f32 %v2959_v61, %v5463_v11  ;;  %v2350_v62 = vadd.f32 %v2192_v41, %v1990_v63  ;;  %v2965_v41 = vld [vmem:[%s3165_s18 + $0x110] sm:$0xff] }
 0x242   : > { %2611 = vst [vmem:[%s5556_s28 + $0x268] sm:$0xff] %v2401_v38  ;;  %v1993_v38 = vmul.f32 %v2960_v50, %v5463_v11  ;;  %v1998_v0 = vmul.f32 %v2965_v41, %v5463_v11  ;;  %v2968_v11 = vld [vmem:[%s3165_s18 + $0x320] sm:$0xff] }
 0x243   : > { %2612 = vst [vmem:[%s5556_s28 + $0x270] sm:$0xff] %v2402_v30  ;;  %v2352_v30 = vadd.f32 %v2197_v22, %v1992_v34  ;;  %v2064_v32 = vmul.f32 %v2968_v11, %v5478_v43  ;;  %v2207_v34 = vpop.permute.xlu1 %2206 }
 0x244   : > { %2613 = vst [vmem:[%s5556_s28 + $0x278] sm:$0xff] %v2403_v39  ;;  %v2353_v39 = vadd.f32 %v2197_v22, %v1993_v38 }
 0x245   : > { %2614 = vst [vmem:[%s5556_s28 + $0x280] sm:$0xff] %v2404_v21  ;;  %v2354_v21 = vadd.f32 %v2197_v22, %v1994_v7 }
 0x246   : > { %2615 = vst [vmem:[%s5556_s28 + $0x288] sm:$0xff] %v2405_v44  ;;  %v2355_v44 = vadd.f32 %v2197_v22, %v1995_v20  ;;  %v2976_v20 = vld [vmem:[%s3165_s18 + $0x168] sm:$0xff] }
 0x247   : > { %2616 = vst [vmem:[%s5556_s28 + $0x290] sm:$0xff] %v2406_v55  ;;  %v2247_v55 = vpop.permute.xlu2 %2246 }
 0x248   : > { %2617 = vst.msk [vmem:[%s5556_s28 + $0x298] sm:$0xff] %vm438_vm0, %v2407_v25  ;;  %v2357_v25 = vadd.f32 %v2197_v22, %v1997_v49  ;;  %v2422_v29 = vadd.f32 %v2247_v55, %v2062_v13  ;;  %v2423_v23 = vadd.f32 %v2247_v55, %v2063_v15  ;;  %v2424_v63 = vadd.f32 %v2247_v55, %v2064_v32  ;;  %v2978_v49 = vld [vmem:[%s3165_s18 + $0x178] sm:$0xff]  ;;  %v2980_v13 = vld [vmem:[%s3165_s18 + $0x188] sm:$0xff]  ;;  %v2981_v15 = vld [vmem:[%s3165_s18 + $0x190] sm:$0xff] }
 0x249   : > { %2555 = vst [vmem:[%s5556_s28 + $0xa8] sm:$0xff] %v2345_v6  ;;  %v2358_v6 = vadd.f32 %v2197_v22, %v1998_v0  ;;  %v2979_v0 = vld [vmem:[%s3165_s18 + $0x180] sm:$0xff] }
 0x24a   : > { %2556 = vst [vmem:[%s5556_s28 + $0xb0] sm:$0xff] %v2346_v40  ;;  %v2969_v40 = vld [vmem:[%s3165_s18 + $0x328] sm:$0xff] }
 0x24b   : > { %2557 = vst [vmem:[%s5556_s28 + $0xb8] sm:$0xff] %v2347_v9  ;;  %v2065_v51 = vmul.f32 %v2969_v40, %v5478_v43  ;;  %v2970_v9 = vld [vmem:[%s3165_s18 + $0x330] sm:$0xff]  ;;  %v2983_v40 = vld [vmem:[%s3165_s18 + $0x1a0] sm:$0xff] }
 0x24c   : > { %2558 = vst [vmem:[%s5556_s28 + $0xc0] sm:$0xff] %v2348_v19  ;;  %v2066_v2 = vmul.f32 %v2970_v9, %v5478_v43  ;;  %v2971_v19 = vld [vmem:[%s3165_s18 + $0x338] sm:$0xff]  ;;  %v2984_v9 = vld [vmem:[%s3165_s18 + $0x1a8] sm:$0xff] }
 0x24d   : > { %2559 = vst [vmem:[%s5556_s28 + $0xc8] sm:$0xff] %v2349_v14  ;;  %v2067_v24 = vmul.f32 %v2971_v19, %v5478_v43  ;;  %v2425_v35 = vadd.f32 %v2247_v55, %v2065_v51  ;;  %v2972_v14 = vld [vmem:[%s3165_s18 + $0x340] sm:$0xff]  ;;  %v2016_v51 = vmul.f32 %v2983_v40, %v5473_v10  ;;  %v2985_v19 = vld [vmem:[%s3165_s18 + $0x1b0] sm:$0xff] }
 0x24e   : > { %2560 = vst [vmem:[%s5556_s28 + $0xd0] sm:$0xff] %v2350_v62  ;;  %v2068_v22 = vmul.f32 %v2972_v14, %v5478_v43  ;;  %v2426_v61 = vadd.f32 %v2247_v55, %v2066_v2  ;;  %v2973_v62 = vld [vmem:[%s3165_s18 + $0x150] sm:$0xff]  ;;  %v2975_v43 = vld [vmem:[%s3165_s18 + $0x160] sm:$0xff]  ;;  %v2017_v2 = vmul.f32 %v2984_v9, %v5473_v10  ;;  %v2986_v14 = vld [vmem:[%s3165_s18 + $0x1b8] sm:$0xff] }
 0x24f   : > { %2561 = vst.msk [vmem:[%s5556_s28 + $0xd8] sm:$0xff] %vm438_vm0, %v2351_v37  ;;  %v2006_v50 = vmul.f32 %v2973_v62, %v5480_v54  ;;  %v2427_v38 = vadd.f32 %v2247_v55, %v2067_v24  ;;  %v2974_v37 = vld [vmem:[%s3165_s18 + $0x158] sm:$0xff]  ;;  %v2018_v24 = vmul.f32 %v2985_v19, %v5473_v10 }
 0x250   : > { %2562 = vst [vmem:[%s5556_s28 + $0xe0] sm:$0xff] %v2352_v30  ;;  %v2007_v1 = vmul.f32 %v2974_v37, %v5480_v54  ;;  %v2428_v7 = vadd.f32 %v2247_v55, %v2068_v22  ;;  %v2008_v30 = vmul.f32 %v2975_v43, %v5480_v54  ;;  %v2019_v22 = vmul.f32 %v2986_v14, %v5473_v10  ;;  %v2987_v62 = vld [vmem:[%s3165_s18 + $0x3b8] sm:$0xff]  ;;  %v2988_v37 = vld [vmem:[%s3165_s18 + $0x3c0] sm:$0xff] }
 0x251   : > { %2563 = vst [vmem:[%s5556_s28 + $0xe8] sm:$0xff] %v2353_v39  ;;  %v2366_v58 = vadd.f32 %v2207_v34, %v2006_v50  ;;  %v2009_v39 = vmul.f32 %v2976_v20, %v5480_v54  ;;  %v2083_v50 = vmul.f32 %v2987_v62, %v5497_v45 }
 0x252   : > { %2564 = vst [vmem:[%s5556_s28 + $0xf0] sm:$0xff] %v2354_v21  ;;  %v2367_v27 = vadd.f32 %v2207_v34, %v2007_v1  ;;  %v2010_v21 = vmul.f32 %v2977_v12, %v5480_v54  ;;  %v2368_v56 = vadd.f32 %v2207_v34, %v2008_v30  ;;  %v2084_v1 = vmul.f32 %v2988_v37, %v5497_v45 }
 0x253   : > { %2565 = vst [vmem:[%s5556_s28 + $0xf8] sm:$0xff] %v2355_v44  ;;  %v2011_v44 = vmul.f32 %v2978_v49, %v5480_v54  ;;  %v2369_v41 = vadd.f32 %v2207_v34, %v2009_v39 }
 0x254   : > { %2566 = vst [vmem:[%s5556_s28 + $0x100] sm:$0xff] %v2356_v26  ;;  %v2012_v26 = vmul.f32 %v2979_v0, %v5480_v54  ;;  %v2370_v55 = vadd.f32 %v2207_v34, %v2010_v21  ;;  %v2982_v54 = vld [vmem:[%s3165_s18 + $0x198] sm:$0xff] }
 0x255   : > { %2567 = vst [vmem:[%s5556_s28 + $0x108] sm:$0xff] %v2357_v25  ;;  %v2013_v25 = vmul.f32 %v2980_v13, %v5473_v10  ;;  %v2371_v46 = vadd.f32 %v2207_v34, %v2011_v44  ;;  %v2015_v32 = vmul.f32 %v2982_v54, %v5473_v10 }
 0x256   : > { %2568 = vst.msk [vmem:[%s5556_s28 + $0x110] sm:$0xff] %vm438_vm0, %v2358_v6  ;;  %v2014_v6 = vmul.f32 %v2981_v15, %v5473_v10  ;;  %v2372_v11 = vadd.f32 %v2207_v34, %v2012_v26  ;;  %v2262_v34 = vpop.permute.xlu2 %2261  ;;  %v2989_v10 = vld [vmem:[%s3165_s18 + $0x3c8] sm:$0xff] }
 0x257   : > { %2632 = vst [vmem:[%s5556_s28 + $0x310] sm:$0xff] %v2422_v29  ;;  %v2373_v29 = vadd.f32 %v2212_v31, %v2013_v25  ;;  %v2085_v43 = vmul.f32 %v2989_v10, %v5497_v45  ;;  %v2443_v30 = vadd.f32 %v2262_v34, %v2083_v50  ;;  %v2444_v39 = vadd.f32 %v2262_v34, %v2084_v1  ;;  %v3002_v50 = vld [vmem:[%s3165_s18 + $0x238] sm:$0xff]  ;;  %v3004_v10 = vld [vmem:[%s3165_s18 + $0x248] sm:$0xff] }
 0x258   : > { %2633 = vst [vmem:[%s5556_s28 + $0x318] sm:$0xff] %v2423_v23  ;;  %v2374_v23 = vadd.f32 %v2212_v31, %v2014_v6 }
 0x259   : > { %2634 = vst [vmem:[%s5556_s28 + $0x320] sm:$0xff] %v2424_v63  ;;  %v2375_v63 = vadd.f32 %v2212_v31, %v2015_v32  ;;  %v2445_v21 = vadd.f32 %v2262_v34, %v2085_v43  ;;  %v2997_v32 = vld [vmem:[%s3165_s18 + $0x210] sm:$0xff]  ;;  %v2037_v43 = vmul.f32 %v3004_v10, %v5490_v3 }
 0x25a   : > { %2635 = vst [vmem:[%s5556_s28 + $0x328] sm:$0xff] %v2425_v35  ;;  %v2376_v35 = vadd.f32 %v2212_v31, %v2016_v51  ;;  %v2998_v51 = vld [vmem:[%s3165_s18 + $0x218] sm:$0xff] }
 0x25b   : > { %2636 = vst [vmem:[%s5556_s28 + $0x330] sm:$0xff] %v2426_v61  ;;  %v2377_v61 = vadd.f32 %v2212_v31, %v2017_v2  ;;  %v2999_v2 = vld [vmem:[%s3165_s18 + $0x220] sm:$0xff] }
 0x25c   : > { %2637 = vst [vmem:[%s5556_s28 + $0x338] sm:$0xff] %v2427_v38  ;;  %v2378_v38 = vadd.f32 %v2212_v31, %v2018_v24  ;;  %v3000_v24 = vld [vmem:[%s3165_s18 + $0x228] sm:$0xff] }
 0x25d   : > { %2638 = vst.msk [vmem:[%s5556_s28 + $0x340] sm:$0xff] %vm438_vm0, %v2428_v7  ;;  %v2379_v7 = vadd.f32 %v2212_v31, %v2019_v22  ;;  %v2994_v31 = vld [vmem:[%s3165_s18 + $0x1f8] sm:$0xff]  ;;  %v2227_v22 = vpop.permute.xlu0 %2226 }
 0x25e   : > { %2576 = vst [vmem:[%s5556_s28 + $0x150] sm:$0xff] %v2366_v58  ;;  %v2990_v58 = vld [vmem:[%s3165_s18 + $0x3d0] sm:$0xff]  ;;  %v2027_v13 = vmul.f32 %v2994_v31, %v5493_v4  ;;  %v3009_v31 = vld [vmem:[%s3165_s18 + $0x468] sm:$0xff] }
 0x25f   : > { %2577 = vst [vmem:[%s5556_s28 + $0x158] sm:$0xff] %v2367_v27  ;;  %v2086_v20 = vmul.f32 %v2990_v58, %v5497_v45  ;;  %v2991_v27 = vld [vmem:[%s3165_s18 + $0x3d8] sm:$0xff]  ;;  %v3005_v58 = vld [vmem:[%s3165_s18 + $0x250] sm:$0xff] }
 0x260   : > { %2578 = vst [vmem:[%s5556_s28 + $0x160] sm:$0xff] %v2368_v56  ;;  %v2087_v12 = vmul.f32 %v2991_v27, %v5497_v45  ;;  %v2992_v56 = vld [vmem:[%s3165_s18 + $0x3e0] sm:$0xff]  ;;  %v3006_v27 = vld [vmem:[%s3165_s18 + $0x258] sm:$0xff] }
 0x261   : > { %2579 = vst [vmem:[%s5556_s28 + $0x168] sm:$0xff] %v2369_v41  ;;  %v2088_v49 = vmul.f32 %v2992_v56, %v5497_v45  ;;  %v2446_v44 = vadd.f32 %v2262_v34, %v2086_v20  ;;  %v2993_v41 = vld [vmem:[%s3165_s18 + $0x3e8] sm:$0xff]  ;;  %v2038_v20 = vmul.f32 %v3005_v58, %v5490_v3  ;;  %v3007_v56 = vld [vmem:[%s3165_s18 + $0x260] sm:$0xff] }
 0x262   : > { %2580 = vst [vmem:[%s5556_s28 + $0x170] sm:$0xff] %v2370_v55  ;;  %v2089_v0 = vmul.f32 %v2993_v41, %v5497_v45  ;;  %v2447_v26 = vadd.f32 %v2262_v34, %v2087_v12  ;;  %v2222_v55 = vpop.permute.xlu1 %2221  ;;  %v2996_v45 = vld [vmem:[%s3165_s18 + $0x208] sm:$0xff]  ;;  %v2039_v12 = vmul.f32 %v3006_v27, %v5490_v3  ;;  %v2277_v41 = vpop.permute.xlu2 %2276 }
 0x263   : > { %2581 = vst [vmem:[%s5556_s28 + $0x178] sm:$0xff] %v2371_v46  ;;  %v2448_v25 = vadd.f32 %v2262_v34, %v2088_v49  ;;  %v2995_v46 = vld [vmem:[%s3165_s18 + $0x200] sm:$0xff]  ;;  %v2387_v54 = vadd.f32 %v2222_v55, %v2027_v13  ;;  %v2040_v49 = vmul.f32 %v3007_v56, %v5490_v3  ;;  %v2105_v13 = vmul.f32 %v3009_v31, %v5510_v57  ;;  %v3025_v31 = vld [vmem:[%s3165_s18 + $0x2f0] sm:$0xff] }
 0x264   : > { %2582 = vst.msk [vmem:[%s5556_s28 + $0x180] sm:$0xff] %vm438_vm0, %v2372_v11  ;;  %v2028_v15 = vmul.f32 %v2995_v46, %v5493_v4  ;;  %v2449_v6 = vadd.f32 %v2262_v34, %v2089_v0  ;;  %v2029_v11 = vmul.f32 %v2996_v45, %v5493_v4  ;;  %v3008_v0 = vld [vmem:[%s3165_s18 + $0x460] sm:$0xff] }
 0x265   : > { %2583 = vst [vmem:[%s5556_s28 + $0x188] sm:$0xff] %v2373_v29  ;;  %v2030_v29 = vmul.f32 %v2997_v32, %v5493_v4 }
 0x266   : > { %2584 = vst [vmem:[%s5556_s28 + $0x190] sm:$0xff] %v2374_v23  ;;  %v2388_v40 = vadd.f32 %v2222_v55, %v2028_v15  ;;  %v2031_v23 = vmul.f32 %v2998_v51, %v5493_v4  ;;  %v2389_v9 = vadd.f32 %v2222_v55, %v2029_v11  ;;  %v2465_v11 = vadd.f32 %v2277_v41, %v2105_v13 }
 0x267   : > { %2585 = vst [vmem:[%s5556_s28 + $0x198] sm:$0xff] %v2375_v63  ;;  %v2032_v63 = vmul.f32 %v2999_v2, %v5493_v4  ;;  %v2390_v19 = vadd.f32 %v2222_v55, %v2030_v29  ;;  %v2058_v13 = vmul.f32 %v3025_v31, %v5505_v16 }
 0x268   : > { %2586 = vst [vmem:[%s5556_s28 + $0x1a0] sm:$0xff] %v2376_v35  ;;  %v2033_v35 = vmul.f32 %v3000_v24, %v5493_v4  ;;  %v2391_v14 = vadd.f32 %v2222_v55, %v2031_v23  ;;  %v3003_v4 = vld [vmem:[%s3165_s18 + $0x240] sm:$0xff] }
 0x269   : > { %2587 = vst [vmem:[%s5556_s28 + $0x1a8] sm:$0xff] %v2377_v61  ;;  %v3001_v61 = vld [vmem:[%s3165_s18 + $0x230] sm:$0xff]  ;;  %v2392_v62 = vadd.f32 %v2222_v55, %v2032_v63  ;;  %v2036_v1 = vmul.f32 %v3003_v4, %v5490_v3  ;;  %v3015_v24 = vld [vmem:[%s3165_s18 + $0x2a0] sm:$0xff] }
 0x26a   : > { %2588 = vst [vmem:[%s5556_s28 + $0x1b0] sm:$0xff] %v2378_v38  ;;  %v2034_v34 = vmul.f32 %v3001_v61, %v5490_v3  ;;  %v2035_v38 = vmul.f32 %v3002_v50, %v5490_v3  ;;  %v2393_v37 = vadd.f32 %v2222_v55, %v2033_v35  ;;  %v2399_v55 = vadd.f32 %v2227_v22, %v2039_v12  ;;  %v3010_v3 = vld [vmem:[%s3165_s18 + $0x470] sm:$0xff]  ;;  %v2242_v12 = vpop.permute.xlu0 %2241 }
 0x26b   : > { %2589 = vst.msk [vmem:[%s5556_s28 + $0x1b8] sm:$0xff] %vm438_vm0, %v2379_v7  ;;  %v2106_v46 = vmul.f32 %v3010_v3, %v5510_v57  ;;  %v2048_v35 = vmul.f32 %v3015_v24, %v5515_v36  ;;  %v3026_v3 = vld [vmem:[%s3165_s18 + $0x2f8] sm:$0xff] }
 0x26c   : > { %2653 = vst [vmem:[%s5556_s28 + $0x3b8] sm:$0xff] %v2443_v30  ;;  %v2394_v7 = vadd.f32 %v2227_v22, %v2034_v34  ;;  %v2395_v30 = vadd.f32 %v2227_v22, %v2035_v38  ;;  %v3018_v38 = vld [vmem:[%s3165_s18 + $0x2b8] sm:$0xff] }
 0x26d   : > { %2654 = vst [vmem:[%s5556_s28 + $0x3c0] sm:$0xff] %v2444_v39  ;;  %v2396_v39 = vadd.f32 %v2227_v22, %v2036_v1  ;;  %v2466_v29 = vadd.f32 %v2277_v41, %v2106_v46  ;;  %v3019_v1 = vld [vmem:[%s3165_s18 + $0x2c0] sm:$0xff]  ;;  %v2059_v46 = vmul.f32 %v3026_v3, %v5505_v16 }
 0x26e   : > { %2655 = vst [vmem:[%s5556_s28 + $0x3c8] sm:$0xff] %v2445_v21  ;;  %v2397_v21 = vadd.f32 %v2227_v22, %v2037_v43  ;;  %v3020_v43 = vld [vmem:[%s3165_s18 + $0x2c8] sm:$0xff] }
 0x26f   : > { %2656 = vst [vmem:[%s5556_s28 + $0x3d0] sm:$0xff] %v2446_v44  ;;  %v2398_v44 = vadd.f32 %v2227_v22, %v2038_v20  ;;  %v3021_v20 = vld [vmem:[%s3165_s18 + $0x2d0] sm:$0xff] }
 0x270   : > { %2657 = vst [vmem:[%s5556_s28 + $0x3d8] sm:$0xff] %v2447_v26  ;;  %v2104_v26 = vmul.f32 %v3008_v0, %v5510_v57 }
 0x271   : > { %2658 = vst [vmem:[%s5556_s28 + $0x3e0] sm:$0xff] %v2448_v25  ;;  %v2400_v25 = vadd.f32 %v2227_v22, %v2040_v49  ;;  %v3016_v22 = vld [vmem:[%s3165_s18 + $0x2a8] sm:$0xff] }
 0x272   : > { %2659 = vst.msk [vmem:[%s5556_s28 + $0x3e8] sm:$0xff] %vm438_vm0, %v2449_v6  ;;  %v2464_v15 = vadd.f32 %v2277_v41, %v2104_v26  ;;  %v3011_v6 = vld [vmem:[%s3165_s18 + $0x478] sm:$0xff]  ;;  %v2049_v61 = vmul.f32 %v3016_v22, %v5515_v36 }
 0x273   : > { %2597 = vst [vmem:[%s5556_s28 + $0x1f8] sm:$0xff] %v2387_v54  ;;  %v2107_v45 = vmul.f32 %v3011_v6, %v5510_v57  ;;  %v3012_v54 = vld [vmem:[%s3165_s18 + $0x480] sm:$0xff] }
 0x274   : > { %2598 = vst [vmem:[%s5556_s28 + $0x200] sm:$0xff] %v2388_v40  ;;  %v2108_v32 = vmul.f32 %v3012_v54, %v5510_v57  ;;  %v3013_v40 = vld [vmem:[%s3165_s18 + $0x488] sm:$0xff]  ;;  %v3027_v6 = vld [vmem:[%s3165_s18 + $0x300] sm:$0xff] }
 0x275   : > { %2599 = vst [vmem:[%s5556_s28 + $0x208] sm:$0xff] %v2389_v9  ;;  %v2109_v51 = vmul.f32 %v3013_v40, %v5510_v57  ;;  %v2467_v23 = vadd.f32 %v2277_v41, %v2107_v45  ;;  %v3014_v9 = vld [vmem:[%s3165_s18 + $0x490] sm:$0xff]  ;;  %v2060_v45 = vmul.f32 %v3027_v6, %v5505_v16  ;;  %v3028_v54 = vld [vmem:[%s3165_s18 + $0x308] sm:$0xff]  ;;  %v2292_v40 = vpop.permute.xlu2 %2291 }
 0x276   : > { %2600 = vst [vmem:[%s5556_s28 + $0x210] sm:$0xff] %v2390_v19  ;;  %v2110_v2 = vmul.f32 %v3014_v9, %v5510_v57  ;;  %v2468_v63 = vadd.f32 %v2277_v41, %v2108_v32  ;;  %v2237_v19 = vpop.permute.xlu1 %2236  ;;  %v3017_v57 = vld [vmem:[%s3165_s18 + $0x2b0] sm:$0xff]  ;;  %v2061_v32 = vmul.f32 %v3028_v54, %v5505_v16 }
 0x277   : > { %2601 = vst [vmem:[%s5556_s28 + $0x218] sm:$0xff] %v2391_v14  ;;  %v2469_v14 = vadd.f32 %v2277_v41, %v2109_v51  ;;  %v2408_v50 = vadd.f32 %v2237_v19, %v2048_v35  ;;  %v2409_v4 = vadd.f32 %v2237_v19, %v2049_v61  ;;  %v3029_v51 = vld [vmem:[%s3165_s18 + $0x508] sm:$0xff]  ;;  %v2420_v9 = vadd.f32 %v2242_v12, %v2060_v45 }
 0x278   : > { %2602 = vst [vmem:[%s5556_s28 + $0x220] sm:$0xff] %v2392_v62  ;;  %v2470_v34 = vadd.f32 %v2277_v41, %v2110_v2  ;;  %v2050_v62 = vmul.f32 %v3017_v57, %v5515_v36  ;;  %v3030_v2 = vld [vmem:[%s3165_s18 + $0x510] sm:$0xff] }
 0x279   : > { %2603 = vst.msk [vmem:[%s5556_s28 + $0x228] sm:$0xff] %vm438_vm0, %v2393_v37  ;;  %v2051_v37 = vmul.f32 %v3018_v38, %v5515_v36 }
 0x27a   : > { %2604 = vst [vmem:[%s5556_s28 + $0x230] sm:$0xff] %v2394_v7  ;;  %v2052_v7 = vmul.f32 %v3019_v1, %v5515_v36  ;;  %v2410_v10 = vadd.f32 %v2237_v19, %v2050_v62 }
 0x27b   : > { %2605 = vst [vmem:[%s5556_s28 + $0x238] sm:$0xff] %v2395_v30  ;;  %v2053_v30 = vmul.f32 %v3020_v43, %v5515_v36  ;;  %v2411_v58 = vadd.f32 %v2237_v19, %v2051_v37  ;;  %v3036_v43 = vld [vmem:[%s3165_s18 + $0x348] sm:$0xff] }
 0x27c   : > { %2606 = vst [vmem:[%s5556_s28 + $0x240] sm:$0xff] %v2396_v39  ;;  %v2054_v39 = vmul.f32 %v3021_v20, %v5515_v36  ;;  %v2412_v27 = vadd.f32 %v2237_v19, %v2052_v7  ;;  %v3024_v36 = vld [vmem:[%s3165_s18 + $0x2e8] sm:$0xff]  ;;  %v3037_v20 = vld [vmem:[%s3165_s18 + $0x350] sm:$0xff] }
 0x27d   : > { %2607 = vst [vmem:[%s5556_s28 + $0x248] sm:$0xff] %v2397_v21  ;;  %v3022_v21 = vld [vmem:[%s3165_s18 + $0x2d8] sm:$0xff]  ;;  %v2413_v49 = vadd.f32 %v2237_v19, %v2053_v30  ;;  %v2057_v26 = vmul.f32 %v3024_v36, %v5505_v16  ;;  %v2069_v30 = vmul.f32 %v3036_v43, %v5531_v59 }
 0x27e   : > { %2608 = vst [vmem:[%s5556_s28 + $0x250] sm:$0xff] %v2398_v44  ;;  %v2055_v56 = vmul.f32 %v3022_v21, %v5505_v16  ;;  %v3023_v44 = vld [vmem:[%s3165_s18 + $0x2e0] sm:$0xff]  ;;  %v2414_v0 = vadd.f32 %v2237_v19, %v2054_v39  ;;  %v2421_v19 = vadd.f32 %v2242_v12, %v2061_v32  ;;  %v2070_v39 = vmul.f32 %v3037_v20, %v5531_v59 }
 0x27f   : > { %2609 = vst [vmem:[%s5556_s28 + $0x258] sm:$0xff] %v2399_v55  ;;  %v2056_v41 = vmul.f32 %v3023_v44, %v5505_v16  ;;  %v3031_v16 = vld [vmem:[%s3165_s18 + $0x518] sm:$0xff] }
 0x280   : > { %2610 = vst.msk [vmem:[%s5556_s28 + $0x260] sm:$0xff] %vm438_vm0, %v2400_v25  ;;  %v2415_v55 = vadd.f32 %v2242_v12, %v2055_v56  ;;  %v2127_v24 = vmul.f32 %v3031_v16, %v5525_v53  ;;  %v3039_v56 = vld [vmem:[%s3165_s18 + $0x360] sm:$0xff]  ;;  %v3048_v16 = vld [vmem:[%s3165_s18 + $0x3a8] sm:$0xff] }
 0x281   : > { %2674 = vst [vmem:[%s5556_s28 + $0x460] sm:$0xff] %v2464_v15  ;;  %v2416_v25 = vadd.f32 %v2242_v12, %v2056_v41  ;;  %v2417_v15 = vadd.f32 %v2242_v12, %v2057_v26  ;;  %v3040_v41 = vld [vmem:[%s3165_s18 + $0x368] sm:$0xff]  ;;  %v3041_v26 = vld [vmem:[%s3165_s18 + $0x370] sm:$0xff] }
 0x282   : > { %2675 = vst [vmem:[%s5556_s28 + $0x468] sm:$0xff] %v2465_v11  ;;  %v2418_v11 = vadd.f32 %v2242_v12, %v2058_v13  ;;  %v2487_v62 = vadd.f32 %v2292_v40, %v2127_v24  ;;  %v3042_v13 = vld [vmem:[%s3165_s18 + $0x378] sm:$0xff]  ;;  %v2081_v24 = vmul.f32 %v3048_v16, %v5520_v17 }
 0x283   : > { %2676 = vst [vmem:[%s5556_s28 + $0x470] sm:$0xff] %v2466_v29  ;;  %v2419_v29 = vadd.f32 %v2242_v12, %v2059_v46  ;;  %v2257_v46 = vpop.permute.xlu0 %2256 }
 0x284   : > { %2677 = vst [vmem:[%s5556_s28 + $0x478] sm:$0xff] %v2467_v23  ;;  %v2125_v23 = vmul.f32 %v3029_v51, %v5525_v53  ;;  %v3046_v51 = vld [vmem:[%s3165_s18 + $0x398] sm:$0xff] }
 0x285   : > { %2678 = vst [vmem:[%s5556_s28 + $0x480] sm:$0xff] %v2468_v63  ;;  %v2126_v63 = vmul.f32 %v3030_v2, %v5525_v53  ;;  %v3047_v2 = vld [vmem:[%s3165_s18 + $0x3a0] sm:$0xff] }
 0x286   : > { %2679 = vst [vmem:[%s5556_s28 + $0x488] sm:$0xff] %v2469_v14  ;;  %v2485_v35 = vadd.f32 %v2292_v40, %v2125_v23  ;;  %v3032_v14 = vld [vmem:[%s3165_s18 + $0x520] sm:$0xff]  ;;  %v2079_v23 = vmul.f32 %v3046_v51, %v5520_v17 }
 0x287   : > { %2680 = vst.msk [vmem:[%s5556_s28 + $0x490] sm:$0xff] %vm438_vm0, %v2470_v34  ;;  %v2128_v22 = vmul.f32 %v3032_v14, %v5525_v53  ;;  %v2486_v61 = vadd.f32 %v2292_v40, %v2126_v63  ;;  %v3033_v34 = vld [vmem:[%s3165_s18 + $0x528] sm:$0xff]  ;;  %v2080_v63 = vmul.f32 %v3047_v2, %v5520_v17  ;;  %v3049_v14 = vld [vmem:[%s3165_s18 + $0x3b0] sm:$0xff] }
 0x288   : > { %2618 = vst [vmem:[%s5556_s28 + $0x2a0] sm:$0xff] %v2408_v50  ;;  %v2129_v57 = vmul.f32 %v3033_v34, %v5525_v53  ;;  %v3034_v50 = vld [vmem:[%s3165_s18 + $0x530] sm:$0xff]  ;;  %v2307_v34 = vpop.permute.xlu2 %2306 }
 0x289   : > { %2619 = vst [vmem:[%s5556_s28 + $0x2a8] sm:$0xff] %v2409_v4  ;;  %v2130_v38 = vmul.f32 %v3034_v50, %v5525_v53  ;;  %v2488_v37 = vadd.f32 %v2292_v40, %v2128_v22  ;;  %v3035_v4 = vld [vmem:[%s3165_s18 + $0x538] sm:$0xff]  ;;  %v2082_v22 = vmul.f32 %v3049_v14, %v5520_v17  ;;  %v2441_v50 = vadd.f32 %v2257_v46, %v2081_v24 }
 0x28a   : > { %2620 = vst [vmem:[%s5556_s28 + $0x2b0] sm:$0xff] %v2410_v10  ;;  %v2131_v1 = vmul.f32 %v3035_v4, %v5525_v53  ;;  %v2489_v7 = vadd.f32 %v2292_v40, %v2129_v57  ;;  %v2252_v10 = vpop.permute.xlu1 %2251  ;;  %v3038_v53 = vld [vmem:[%s3165_s18 + $0x358] sm:$0xff]  ;;  %v3050_v57 = vld [vmem:[%s3165_s18 + $0x5b0] sm:$0xff] }
 0x28b   : > { %2621 = vst [vmem:[%s5556_s28 + $0x2b8] sm:$0xff] %v2411_v58  ;;  %v2490_v58 = vadd.f32 %v2292_v40, %v2130_v38  ;;  %v2071_v12 = vmul.f32 %v3038_v53, %v5531_v59  ;;  %v2429_v21 = vadd.f32 %v2252_v10, %v2069_v30  ;;  %v2430_v44 = vadd.f32 %v2252_v10, %v2070_v39  ;;  %v3051_v38 = vld [vmem:[%s3165_s18 + $0x5b8] sm:$0xff] }
 0x28c   : > { %2622 = vst [vmem:[%s5556_s28 + $0x2c0] sm:$0xff] %v2412_v27  ;;  %v2491_v27 = vadd.f32 %v2292_v40, %v2131_v1  ;;  %v2442_v4 = vadd.f32 %v2257_v46, %v2082_v22  ;;  %v3067_v22 = vld [vmem:[%s3165_s18 + $0x440] sm:$0xff] }
 0x28d   : > { %2623 = vst [vmem:[%s5556_s28 + $0x2c8] sm:$0xff] %v2413_v49  ;;  %v2072_v49 = vmul.f32 %v3039_v56, %v5531_v59  ;;  %v2431_v36 = vadd.f32 %v2252_v10, %v2071_v12 }
 0x28e   : > { %2624 = vst.msk [vmem:[%s5556_s28 + $0x2d0] sm:$0xff] %vm438_vm0, %v2414_v0  ;;  %v2073_v0 = vmul.f32 %v3040_v41, %v5531_v59  ;;  %v3057_v41 = vld [vmem:[%s3165_s18 + $0x3f0] sm:$0xff] }
 0x28f   : > { %2625 = vst [vmem:[%s5556_s28 + $0x2d8] sm:$0xff] %v2415_v55  ;;  %v2074_v55 = vmul.f32 %v3041_v26, %v5531_v59  ;;  %v2432_v31 = vadd.f32 %v2252_v10, %v2072_v49  ;;  %v3058_v26 = vld [vmem:[%s3165_s18 + $0x3f8] sm:$0xff] }
 0x290   : > { %2626 = vst [vmem:[%s5556_s28 + $0x2e0] sm:$0xff] %v2416_v25  ;;  %v2075_v25 = vmul.f32 %v3042_v13, %v5531_v59  ;;  %v2433_v3 = vadd.f32 %v2252_v10, %v2073_v0  ;;  %v3045_v59 = vld [vmem:[%s3165_s18 + $0x390] sm:$0xff]  ;;  %v2090_v0 = vmul.f32 %v3057_v41, %v5537_v28 }
 0x291   : > { %2627 = vst [vmem:[%s5556_s28 + $0x2e8] sm:$0xff] %v2417_v15  ;;  %v3043_v15 = vld [vmem:[%s3165_s18 + $0x380] sm:$0xff]  ;;  %v2434_v45 = vadd.f32 %v2252_v10, %v2074_v55  ;;  %v2091_v55 = vmul.f32 %v3058_v26, %v5537_v28 }
 0x292   : > { %2628 = vst [vmem:[%s5556_s28 + $0x2f0] sm:$0xff] %v2418_v11  ;;  %v2076_v6 = vmul.f32 %v3043_v15, %v5520_v17  ;;  %v3044_v11 = vld [vmem:[%s3165_s18 + $0x388] sm:$0xff]  ;;  %v2435_v32 = vadd.f32 %v2252_v10, %v2075_v25 }
 0x293   : > { %2629 = vst [vmem:[%s5556_s28 + $0x2f8] sm:$0xff] %v2419_v29  ;;  %v2077_v54 = vmul.f32 %v3044_v11, %v5520_v17  ;;  %v2078_v29 = vmul.f32 %v3045_v59, %v5520_v17  ;;  %v3052_v17 = vld [vmem:[%s3165_s18 + $0x5c0] sm:$0xff]  ;;  %v3053_v10 = vld [vmem:[%s3165_s18 + $0x5c8] sm:$0xff] }
 0x294   : > { %2630 = vst [vmem:[%s5556_s28 + $0x300] sm:$0xff] %v2420_v9  ;;  %v2436_v40 = vadd.f32 %v2257_v46, %v2076_v6  ;;  %v2148_v1 = vmul.f32 %v3052_v17, %v5535_v18  ;;  %v2149_v43 = vmul.f32 %v3053_v10, %v5535_v18  ;;  %v3061_v6 = vld [vmem:[%s3165_s18 + $0x410] sm:$0xff]  ;;  %v3070_v17 = vld [vmem:[%s3165_s18 + $0x458] sm:$0xff]  ;;  %v2322_v10 = vpop.permute.xlu2 %2321 }
 0x295   : > { %2631 = vst.msk [vmem:[%s5556_s28 + $0x308] sm:$0xff] %vm438_vm0, %v2421_v19  ;;  %v2437_v9 = vadd.f32 %v2257_v46, %v2077_v54  ;;  %v2438_v19 = vadd.f32 %v2257_v46, %v2078_v29  ;;  %v3062_v54 = vld [vmem:[%s3165_s18 + $0x418] sm:$0xff]  ;;  %v3063_v29 = vld [vmem:[%s3165_s18 + $0x420] sm:$0xff] }
 0x296   : > { %2695 = vst [vmem:[%s5556_s28 + $0x508] sm:$0xff] %v2485_v35  ;;  %v2439_v35 = vadd.f32 %v2257_v46, %v2079_v23  ;;  %v2508_v39 = vadd.f32 %v2307_v34, %v2148_v1  ;;  %v2509_v12 = vadd.f32 %v2307_v34, %v2149_v43  ;;  %v2272_v23 = vpop.permute.xlu0 %2271  ;;  %v2103_v1 = vmul.f32 %v3070_v17, %v5533_v5 }
 0x297   : > { %2696 = vst [vmem:[%s5556_s28 + $0x510] sm:$0xff] %v2486_v61  ;;  %v2440_v61 = vadd.f32 %v2257_v46, %v2080_v63 }
 0x298   : > { %2697 = vst [vmem:[%s5556_s28 + $0x518] sm:$0xff] %v2487_v62  ;;  %v2146_v62 = vmul.f32 %v3050_v57, %v5535_v18  ;;  %v3068_v57 = vld [vmem:[%s3165_s18 + $0x448] sm:$0xff] }
 0x299   : > { %2698 = vst [vmem:[%s5556_s28 + $0x520] sm:$0xff] %v2488_v37  ;;  %v2147_v37 = vmul.f32 %v3051_v38, %v5535_v18  ;;  %v3069_v38 = vld [vmem:[%s3165_s18 + $0x450] sm:$0xff] }
 0x29a   : > { %2699 = vst [vmem:[%s5556_s28 + $0x528] sm:$0xff] %v2489_v7  ;;  %v2506_v7 = vadd.f32 %v2307_v34, %v2146_v62  ;;  %v2101_v62 = vmul.f32 %v3068_v57, %v5533_v5 }
 0x29b   : > { %2700 = vst [vmem:[%s5556_s28 + $0x530] sm:$0xff] %v2490_v58  ;;  %v2507_v30 = vadd.f32 %v2307_v34, %v2147_v37  ;;  %v3054_v58 = vld [vmem:[%s3165_s18 + $0x5d0] sm:$0xff]  ;;  %v2102_v37 = vmul.f32 %v3069_v38, %v5533_v5 }
 0x29c   : > { %2701 = vst.msk [vmem:[%s5556_s28 + $0x538] sm:$0xff] %vm438_vm0, %v2491_v27  ;;  %v2150_v20 = vmul.f32 %v3054_v58, %v5535_v18  ;;  %v3055_v27 = vld [vmem:[%s3165_s18 + $0x5d8] sm:$0xff] }
 0x29d   : > { %2639 = vst [vmem:[%s5556_s28 + $0x348] sm:$0xff] %v2429_v21  ;;  %v2151_v53 = vmul.f32 %v3055_v27, %v5535_v18  ;;  %v3056_v21 = vld [vmem:[%s3165_s18 + $0x5e0] sm:$0xff]  ;;  %v2462_v43 = vadd.f32 %v2272_v23, %v2102_v37  ;;  %v3088_v37 = vld [vmem:[%s3165_s18 + $0x4e8] sm:$0xff] }
 0x29e   : > { %2640 = vst [vmem:[%s5556_s28 + $0x350] sm:$0xff] %v2430_v44  ;;  %v2152_v56 = vmul.f32 %v3056_v21, %v5535_v18  ;;  %v2510_v49 = vadd.f32 %v2307_v34, %v2150_v20  ;;  %v2267_v44 = vpop.permute.xlu1 %2266  ;;  %v3059_v18 = vld [vmem:[%s3165_s18 + $0x400] sm:$0xff]  ;;  %v2463_v20 = vadd.f32 %v2272_v23, %v2103_v1  ;;  %v3074_v21 = vld [vmem:[%s3165_s18 + $0x670] sm:$0xff] }
 0x29f   : > { %2641 = vst [vmem:[%s5556_s28 + $0x358] sm:$0xff] %v2431_v36  ;;  %v2511_v36 = vadd.f32 %v2307_v34, %v2151_v53  ;;  %v2092_v13 = vmul.f32 %v3059_v18, %v5537_v28  ;;  %v2450_v25 = vadd.f32 %v2267_v44, %v2090_v0  ;;  %v2451_v15 = vadd.f32 %v2267_v44, %v2091_v55  ;;  %v3089_v1 = vld [vmem:[%s3165_s18 + $0x4f0] sm:$0xff] }
 0x2a0   : > { %2642 = vst [vmem:[%s5556_s28 + $0x360] sm:$0xff] %v2432_v31  ;;  %v2512_v31 = vadd.f32 %v2307_v34, %v2152_v56  ;;  %v2170_v56 = vmul.f32 %v3074_v21, %v5539_v33 }
 0x2a1   : > { %2643 = vst [vmem:[%s5556_s28 + $0x368] sm:$0xff] %v2433_v3  ;;  %v3060_v3 = vld [vmem:[%s3165_s18 + $0x408] sm:$0xff]  ;;  %v2452_v11 = vadd.f32 %v2267_v44, %v2092_v13 }
 0x2a2   : > { %2644 = vst [vmem:[%s5556_s28 + $0x370] sm:$0xff] %v2434_v45  ;;  %v2093_v46 = vmul.f32 %v3060_v3, %v5537_v28  ;;  %v2094_v45 = vmul.f32 %v3061_v6, %v5537_v28  ;;  %v2530_v55 = vadd.f32 %v2322_v10, %v2170_v56  ;;  %v3078_v3 = vld [vmem:[%s3165_s18 + $0x498] sm:$0xff]  ;;  %v3079_v6 = vld [vmem:[%s3165_s18 + $0x4a0] sm:$0xff]  ;;  %v3093_v56 = vld [vmem:[%s3165_s18 + $0x548] sm:$0xff] }
 0x2a3   : > { %2645 = vst.msk [vmem:[%s5556_s28 + $0x378] sm:$0xff] %vm438_vm0, %v2435_v32  ;;  %v2095_v32 = vmul.f32 %v3062_v54, %v5537_v28 }
 0x2a4   : > { %2646 = vst [vmem:[%s5556_s28 + $0x380] sm:$0xff] %v2436_v40  ;;  %v2453_v59 = vadd.f32 %v2267_v44, %v2093_v46  ;;  %v2096_v40 = vmul.f32 %v3063_v29, %v5537_v28  ;;  %v2454_v51 = vadd.f32 %v2267_v44, %v2094_v45  ;;  %v3066_v28 = vld [vmem:[%s3165_s18 + $0x438] sm:$0xff]  ;;  %v2111_v46 = vmul.f32 %v3078_v3, %v5543_v52 }
 0x2a5   : > { %2647 = vst [vmem:[%s5556_s28 + $0x388] sm:$0xff] %v2437_v9  ;;  %v3064_v9 = vld [vmem:[%s3165_s18 + $0x428] sm:$0xff]  ;;  %v2455_v63 = vadd.f32 %v2267_v44, %v2095_v32  ;;  %v2112_v45 = vmul.f32 %v3079_v6, %v5543_v52 }
 0x2a6   : > { %2648 = vst [vmem:[%s5556_s28 + $0x390] sm:$0xff] %v2438_v19  ;;  %v2097_v2 = vmul.f32 %v3064_v9, %v5533_v5  ;;  %v3065_v19 = vld [vmem:[%s3165_s18 + $0x430] sm:$0xff]  ;;  %v2456_v24 = vadd.f32 %v2267_v44, %v2096_v40  ;;  %v3075_v44 = vld [vmem:[%s3165_s18 + $0x678] sm:$0xff] }
 0x2a7   : > { %2649 = vst [vmem:[%s5556_s28 + $0x398] sm:$0xff] %v2439_v35  ;;  %v2098_v16 = vmul.f32 %v3065_v19, %v5533_v5  ;;  %v2099_v35 = vmul.f32 %v3066_v28, %v5533_v5  ;;  %v2171_v41 = vmul.f32 %v3075_v44, %v5539_v33 }
 0x2a8   : > { %2650 = vst [vmem:[%s5556_s28 + $0x3a0] sm:$0xff] %v2440_v61  ;;  %v2457_v14 = vadd.f32 %v2272_v23, %v2097_v2  ;;  %v2100_v61 = vmul.f32 %v3067_v22, %v5533_v5  ;;  %v3073_v5 = vld [vmem:[%s3165_s18 + $0x668] sm:$0xff]  ;;  %v3083_v2 = vld [vmem:[%s3165_s18 + $0x4c0] sm:$0xff] }
 0x2a9   : > { %2651 = vst [vmem:[%s5556_s28 + $0x3a8] sm:$0xff] %v2441_v50  ;;  %v2458_v34 = vadd.f32 %v2272_v23, %v2098_v16  ;;  %v2459_v50 = vadd.f32 %v2272_v23, %v2099_v35  ;;  %v2169_v53 = vmul.f32 %v3073_v5, %v5539_v33  ;;  %v2531_v13 = vadd.f32 %v2322_v10, %v2171_v41  ;;  %v3084_v16 = vld [vmem:[%s3165_s18 + $0x4c8] sm:$0xff]  ;;  %v2287_v35 = vpop.permute.xlu0 %2286 }
 0x2aa   : > { %2652 = vst.msk [vmem:[%s5556_s28 + $0x3b0] sm:$0xff] %vm438_vm0, %v2442_v4  ;;  %v2460_v4 = vadd.f32 %v2272_v23, %v2100_v61 }
 0x2ab   : > { %2716 = vst [vmem:[%s5556_s28 + $0x5b0] sm:$0xff] %v2506_v7  ;;  %v2461_v7 = vadd.f32 %v2272_v23, %v2101_v62  ;;  %v2529_v0 = vadd.f32 %v2322_v10, %v2169_v53  ;;  %v3092_v53 = vld [vmem:[%s3165_s18 + $0x540] sm:$0xff] }
 0x2ac   : > { %2717 = vst [vmem:[%s5556_s28 + $0x5b8] sm:$0xff] %v2507_v30  ;;  %v3071_v30 = vld [vmem:[%s3165_s18 + $0x658] sm:$0xff] }
 0x2ad   : > { %2718 = vst [vmem:[%s5556_s28 + $0x5c0] sm:$0xff] %v2508_v39  ;;  %v2167_v58 = vmul.f32 %v3071_v30, %v5539_v33  ;;  %v3072_v39 = vld [vmem:[%s3165_s18 + $0x660] sm:$0xff] }
 0x2ae   : > { %2719 = vst [vmem:[%s5556_s28 + $0x5c8] sm:$0xff] %v2509_v12  ;;  %v2168_v27 = vmul.f32 %v3072_v39, %v5539_v33 }
 0x2af   : > { %2720 = vst [vmem:[%s5556_s28 + $0x5d0] sm:$0xff] %v2510_v49  ;;  %v2527_v12 = vadd.f32 %v2322_v10, %v2167_v58 }
 0x2b0   : > { %2721 = vst [vmem:[%s5556_s28 + $0x5d8] sm:$0xff] %v2511_v36  ;;  %v2528_v49 = vadd.f32 %v2322_v10, %v2168_v27  ;;  %v3076_v36 = vld [vmem:[%s3165_s18 + $0x680] sm:$0xff] }
 0x2b1   : > { %2722 = vst.msk [vmem:[%s5556_s28 + $0x5e0] sm:$0xff] %vm438_vm0, %v2512_v31  ;;  %v2172_v26 = vmul.f32 %v3076_v36, %v5539_v33  ;;  %v3077_v31 = vld [vmem:[%s3165_s18 + $0x688] sm:$0xff]  ;;  %v3095_v36 = vld [vmem:[%s3165_s18 + $0x558] sm:$0xff] }
 0x2b2   : > { %2660 = vst [vmem:[%s5556_s28 + $0x3f0] sm:$0xff] %v2450_v25  ;;  %v2173_v18 = vmul.f32 %v3077_v31, %v5539_v33  ;;  %v2282_v25 = vpop.permute.xlu1 %2281  ;;  %v3080_v33 = vld [vmem:[%s3165_s18 + $0x4a8] sm:$0xff]  ;;  %v3096_v31 = vld [vmem:[%s3165_s18 + $0x560] sm:$0xff] }
 0x2b3   : > { %2661 = vst [vmem:[%s5556_s28 + $0x3f8] sm:$0xff] %v2451_v15  ;;  %v2532_v15 = vadd.f32 %v2322_v10, %v2172_v26  ;;  %v2113_v54 = vmul.f32 %v3080_v33, %v5543_v52  ;;  %v2471_v32 = vadd.f32 %v2282_v25, %v2111_v46  ;;  %v2472_v40 = vadd.f32 %v2282_v25, %v2112_v45  ;;  %v3099_v33 = vld [vmem:[%s3165_s18 + $0x578] sm:$0xff] }
 0x2b4   : > { %2662 = vst [vmem:[%s5556_s28 + $0x400] sm:$0xff] %v2452_v11  ;;  %v2533_v11 = vadd.f32 %v2322_v10, %v2173_v18  ;;  %v2135_v26 = vmul.f32 %v3095_v36, %v5572_v47  ;;  %v2136_v18 = vmul.f32 %v3096_v31, %v5572_v47  ;;  %v3116_v31 = vld [vmem:[%s3165_s18 + $0x638] sm:$0xff] }
 0x2b5   : > { %2663 = vst [vmem:[%s5556_s28 + $0x408] sm:$0xff] %v2453_v59  ;;  %v3081_v59 = vld [vmem:[%s3165_s18 + $0x4b0] sm:$0xff]  ;;  %v2473_v9 = vadd.f32 %v2282_v25, %v2113_v54  ;;  %v2139_v54 = vmul.f32 %v3099_v33, %v5564_v8 }
 0x2b6   : > { %2664 = vst [vmem:[%s5556_s28 + $0x410] sm:$0xff] %v2454_v51  ;;  %v2114_v29 = vmul.f32 %v3081_v59, %v5543_v52  ;;  %v3082_v51 = vld [vmem:[%s3165_s18 + $0x4b8] sm:$0xff]  ;;  %v3100_v59 = vld [vmem:[%s3165_s18 + $0x580] sm:$0xff] }
 0x2b7   : > { %2665 = vst [vmem:[%s5556_s28 + $0x418] sm:$0xff] %v2455_v63  ;;  %v2115_v23 = vmul.f32 %v3082_v51, %v5543_v52  ;;  %v2116_v63 = vmul.f32 %v3083_v2, %v5543_v52 }
 0x2b8   : > { %2666 = vst.msk [vmem:[%s5556_s28 + $0x420] sm:$0xff] %vm438_vm0, %v2456_v24  ;;  %v2474_v19 = vadd.f32 %v2282_v25, %v2114_v29  ;;  %v2117_v24 = vmul.f32 %v3084_v16, %v5543_v52  ;;  %v3087_v52 = vld [vmem:[%s3165_s18 + $0x4e0] sm:$0xff]  ;;  %v2140_v29 = vmul.f32 %v3100_v59, %v5564_v8 }
 0x2b9   : > { %2667 = vst [vmem:[%s5556_s28 + $0x428] sm:$0xff] %v2457_v14  ;;  %v2475_v28 = vadd.f32 %v2282_v25, %v2115_v23  ;;  %v3085_v14 = vld [vmem:[%s3165_s18 + $0x4d0] sm:$0xff]  ;;  %v2476_v61 = vadd.f32 %v2282_v25, %v2116_v63 }
 0x2ba   : > { %2668 = vst [vmem:[%s5556_s28 + $0x430] sm:$0xff] %v2458_v34  ;;  %v2118_v22 = vmul.f32 %v3085_v14, %v5541_v42  ;;  %v3086_v34 = vld [vmem:[%s3165_s18 + $0x4d8] sm:$0xff]  ;;  %v2477_v62 = vadd.f32 %v2282_v25, %v2117_v24  ;;  %v2297_v5 = vpop.permute.xlu1 %2296  ;;  %v3097_v25 = vld [vmem:[%s3165_s18 + $0x568] sm:$0xff] }
 0x2bb   : > { %2669 = vst [vmem:[%s5556_s28 + $0x438] sm:$0xff] %v2459_v50  ;;  %v2119_v57 = vmul.f32 %v3086_v34, %v5541_v42  ;;  %v2120_v50 = vmul.f32 %v3087_v52, %v5541_v42  ;;  %v2137_v3 = vmul.f32 %v3097_v25, %v5572_v47  ;;  %v2495_v46 = vadd.f32 %v2297_v5, %v2135_v26  ;;  %v3106_v52 = vld [vmem:[%s3165_s18 + $0x5e8] sm:$0xff]  ;;  %v3117_v25 = vld [vmem:[%s3165_s18 + $0x640] sm:$0xff] }
 0x2bc   : > { %2670 = vst [vmem:[%s5556_s28 + $0x440] sm:$0xff] %v2460_v4  ;;  %v2478_v38 = vadd.f32 %v2287_v35, %v2118_v22  ;;  %v2121_v4 = vmul.f32 %v3088_v37, %v5541_v42  ;;  %v2496_v45 = vadd.f32 %v2297_v5, %v2136_v18  ;;  %v3105_v22 = vld [vmem:[%s3165_s18 + $0x5a8] sm:$0xff]  ;;  %v3107_v37 = vld [vmem:[%s3165_s18 + $0x5f0] sm:$0xff]  ;;  %v2163_v18 = vmul.f32 %v3116_v31, %v5594_v60 }
 0x2bd   : > { %2671 = vst [vmem:[%s5556_s28 + $0x448] sm:$0xff] %v2461_v7  ;;  %v2479_v17 = vadd.f32 %v2287_v35, %v2119_v57  ;;  %v2122_v7 = vmul.f32 %v3089_v1, %v5541_v42  ;;  %v2480_v10 = vadd.f32 %v2287_v35, %v2120_v50  ;;  %v2153_v50 = vmul.f32 %v3106_v52, %v5608_v48 }
 0x2be   : > { %2672 = vst [vmem:[%s5556_s28 + $0x450] sm:$0xff] %v2462_v43  ;;  %v3090_v43 = vld [vmem:[%s3165_s18 + $0x4f8] sm:$0xff]  ;;  %v2481_v58 = vadd.f32 %v2287_v35, %v2121_v4  ;;  %v2154_v4 = vmul.f32 %v3107_v37, %v5608_v48 }
 0x2bf   : > { %2673 = vst.msk [vmem:[%s5556_s28 + $0x458] sm:$0xff] %vm438_vm0, %v2463_v20  ;;  %v2123_v30 = vmul.f32 %v3090_v43, %v5541_v42  ;;  %v3091_v20 = vld [vmem:[%s3165_s18 + $0x500] sm:$0xff]  ;;  %v2482_v27 = vadd.f32 %v2287_v35, %v2122_v7 }
 0x2c0   : > { %2737 = vst [vmem:[%s5556_s28 + $0x658] sm:$0xff] %v2527_v12  ;;  %v2124_v39 = vmul.f32 %v3091_v20, %v5541_v42  ;;  %v2132_v12 = vmul.f32 %v3092_v53, %v5572_v47  ;;  %v3094_v42 = vld [vmem:[%s3165_s18 + $0x550] sm:$0xff]  ;;  %v3109_v7 = vld [vmem:[%s3165_s18 + $0x600] sm:$0xff]  ;;  %v3112_v53 = vld [vmem:[%s3165_s18 + $0x618] sm:$0xff] }
 0x2c1   : > { %2738 = vst [vmem:[%s5556_s28 + $0x660] sm:$0xff] %v2528_v49  ;;  %v2483_v21 = vadd.f32 %v2287_v35, %v2123_v30  ;;  %v2133_v49 = vmul.f32 %v3093_v56, %v5572_v47  ;;  %v2134_v41 = vmul.f32 %v3094_v42, %v5572_v47  ;;  %v3110_v30 = vld [vmem:[%s3165_s18 + $0x608] sm:$0xff] }
 0x2c2   : > { %2739 = vst [vmem:[%s5556_s28 + $0x668] sm:$0xff] %v2529_v0  ;;  %v2484_v44 = vadd.f32 %v2287_v35, %v2124_v39  ;;  %v2492_v0 = vadd.f32 %v2297_v5, %v2132_v12  ;;  %v2312_v57 = vpop.permute.xlu1 %2311  ;;  %v3111_v39 = vld [vmem:[%s3165_s18 + $0x610] sm:$0xff]  ;;  %v2159_v12 = vmul.f32 %v3112_v53, %v5608_v48 }
 0x2c3   : > { %2740 = vst [vmem:[%s5556_s28 + $0x670] sm:$0xff] %v2530_v55  ;;  %v2493_v55 = vadd.f32 %v2297_v5, %v2133_v49  ;;  %v2513_v1 = vadd.f32 %v2312_v57, %v2153_v50  ;;  %v2514_v43 = vadd.f32 %v2312_v57, %v2154_v4 }
 0x2c4   : > { %2741 = vst [vmem:[%s5556_s28 + $0x678] sm:$0xff] %v2531_v13  ;;  %v2494_v13 = vadd.f32 %v2297_v5, %v2134_v41  ;;  %v2519_v41 = vadd.f32 %v2312_v57, %v2159_v12 }
 0x2c5   : > { %2742 = vst [vmem:[%s5556_s28 + $0x680] sm:$0xff] %v2532_v15  ;;  %v3098_v15 = vld [vmem:[%s3165_s18 + $0x570] sm:$0xff] }
 0x2c6   : > { %2743 = vst.msk [vmem:[%s5556_s28 + $0x688] sm:$0xff] %vm438_vm0, %v2533_v11  ;;  %v2138_v6 = vmul.f32 %v3098_v15, %v5572_v47  ;;  %v2302_v11 = vpop.permute.xlu0 %2301  ;;  %v3101_v47 = vld [vmem:[%s3165_s18 + $0x588] sm:$0xff] }
 0x2c7   : > { %2681 = vst [vmem:[%s5556_s28 + $0x498] sm:$0xff] %v2471_v32  ;;  %v2497_v32 = vadd.f32 %v2297_v5, %v2137_v3  ;;  %v2141_v51 = vmul.f32 %v3101_v47, %v5564_v8  ;;  %v2499_v23 = vadd.f32 %v2302_v11, %v2139_v54  ;;  %v2500_v63 = vadd.f32 %v2302_v11, %v2140_v29  ;;  %v3118_v15 = vld [vmem:[%s3165_s18 + $0x648] sm:$0xff] }
 0x2c8   : > { %2682 = vst [vmem:[%s5556_s28 + $0x4a0] sm:$0xff] %v2472_v40  ;;  %v2498_v40 = vadd.f32 %v2297_v5, %v2138_v6  ;;  %v2164_v3 = vmul.f32 %v3117_v25, %v5594_v60  ;;  %v2165_v6 = vmul.f32 %v3118_v15, %v5594_v60 }
 0x2c9   : > { %2683 = vst [vmem:[%s5556_s28 + $0x4a8] sm:$0xff] %v2473_v9  ;;  %v3102_v9 = vld [vmem:[%s3165_s18 + $0x590] sm:$0xff]  ;;  %v2501_v24 = vadd.f32 %v2302_v11, %v2141_v51 }
 0x2ca   : > { %2684 = vst [vmem:[%s5556_s28 + $0x4b0] sm:$0xff] %v2474_v19  ;;  %v2142_v2 = vmul.f32 %v3102_v9, %v5564_v8  ;;  %v3103_v19 = vld [vmem:[%s3165_s18 + $0x598] sm:$0xff] }
 0x2cb   : > { %2685 = vst [vmem:[%s5556_s28 + $0x4b8] sm:$0xff] %v2475_v28  ;;  %v2143_v16 = vmul.f32 %v3103_v19, %v5564_v8  ;;  %v3104_v28 = vld [vmem:[%s3165_s18 + $0x5a0] sm:$0xff] }
 0x2cc   : > { %2686 = vst [vmem:[%s5556_s28 + $0x4c0] sm:$0xff] %v2476_v61  ;;  %v2144_v35 = vmul.f32 %v3104_v28, %v5564_v8  ;;  %v2502_v14 = vadd.f32 %v2302_v11, %v2142_v2  ;;  %v2145_v61 = vmul.f32 %v3105_v22, %v5564_v8  ;;  %v3108_v8 = vld [vmem:[%s3165_s18 + $0x5f8] sm:$0xff] }
 0x2cd   : > { %2687 = vst.msk [vmem:[%s5556_s28 + $0x4c8] sm:$0xff] %vm438_vm0, %v2477_v62  ;;  %v2503_v34 = vadd.f32 %v2302_v11, %v2143_v16 }
 0x2ce   : > { %2688 = vst [vmem:[%s5556_s28 + $0x4d0] sm:$0xff] %v2478_v38  ;;  %v2504_v62 = vadd.f32 %v2302_v11, %v2144_v35  ;;  %v2505_v38 = vadd.f32 %v2302_v11, %v2145_v61  ;;  %v2317_v56 = vpop.permute.xlu0 %2316  ;;  %v3119_v11 = vld [vmem:[%s3165_s18 + $0x650] sm:$0xff] }
 0x2cf   : > { %2689 = vst [vmem:[%s5556_s28 + $0x4d8] sm:$0xff] %v2479_v17  ;;  %v2155_v17 = vmul.f32 %v3108_v8, %v5608_v48  ;;  %v2166_v33 = vmul.f32 %v3119_v11, %v5594_v60  ;;  %v2524_v54 = vadd.f32 %v2317_v56, %v2164_v3 }
 0x2d0   : > { %2690 = vst [vmem:[%s5556_s28 + $0x4e0] sm:$0xff] %v2480_v10  ;;  %v2156_v10 = vmul.f32 %v3109_v7, %v5608_v48 }
 0x2d1   : > { %2691 = vst [vmem:[%s5556_s28 + $0x4e8] sm:$0xff] %v2481_v58  ;;  %v2157_v58 = vmul.f32 %v3110_v30, %v5608_v48  ;;  %v2515_v20 = vadd.f32 %v2312_v57, %v2155_v17  ;;  %v2526_v59 = vadd.f32 %v2317_v56, %v2166_v33 }
 0x2d2   : > { %2692 = vst [vmem:[%s5556_s28 + $0x4f0] sm:$0xff] %v2482_v27  ;;  %v2158_v27 = vmul.f32 %v3111_v39, %v5608_v48  ;;  %v2516_v5 = vadd.f32 %v2312_v57, %v2156_v10  ;;  %v3115_v48 = vld [vmem:[%s3165_s18 + $0x630] sm:$0xff] }
 0x2d3   : > { %2693 = vst [vmem:[%s5556_s28 + $0x4f8] sm:$0xff] %v2483_v21  ;;  %v2517_v21 = vadd.f32 %v2312_v57, %v2157_v58  ;;  %v2162_v26 = vmul.f32 %v3115_v48, %v5594_v60 }
 0x2d4   : > { %2694 = vst.msk [vmem:[%s5556_s28 + $0x500] sm:$0xff] %vm438_vm0, %v2484_v44  ;;  %v2518_v49 = vadd.f32 %v2312_v57, %v2158_v27  ;;  %v3113_v44 = vld [vmem:[%s3165_s18 + $0x620] sm:$0xff] }
 0x2d5   : > { %2702 = vst [vmem:[%s5556_s28 + $0x540] sm:$0xff] %v2492_v0  ;;  %v2160_v42 = vmul.f32 %v3113_v44, %v5594_v60  ;;  %v3114_v0 = vld [vmem:[%s3165_s18 + $0x628] sm:$0xff] }
 0x2d6   : > { %2703 = vst [vmem:[%s5556_s28 + $0x548] sm:$0xff] %v2493_v55  ;;  %v2161_v36 = vmul.f32 %v3114_v0, %v5594_v60 }
 0x2d7   : > { %2704 = vst [vmem:[%s5556_s28 + $0x550] sm:$0xff] %v2494_v13  ;;  %v2520_v55 = vadd.f32 %v2317_v56, %v2160_v42 }
 0x2d8   : > { %2705 = vst [vmem:[%s5556_s28 + $0x558] sm:$0xff] %v2495_v46  ;;  %v2521_v13 = vadd.f32 %v2317_v56, %v2161_v36  ;;  %v2522_v46 = vadd.f32 %v2317_v56, %v2162_v26 }
 0x2d9   : > { %2706 = vst [vmem:[%s5556_s28 + $0x560] sm:$0xff] %v2496_v45  ;;  %v2523_v45 = vadd.f32 %v2317_v56, %v2163_v18 }
 0x2da   : > { %2707 = vst [vmem:[%s5556_s28 + $0x568] sm:$0xff] %v2497_v32  ;;  %v2525_v32 = vadd.f32 %v2317_v56, %v2165_v6 }
 0x2db   : > { %2708 = vst.msk [vmem:[%s5556_s28 + $0x570] sm:$0xff] %vm438_vm0, %v2498_v40 }
 0x2dc   : > { %2709 = vst [vmem:[%s5556_s28 + $0x578] sm:$0xff] %v2499_v23 }
 0x2dd   : > { %2710 = vst [vmem:[%s5556_s28 + $0x580] sm:$0xff] %v2500_v63 }
 0x2de   : > { %2711 = vst [vmem:[%s5556_s28 + $0x588] sm:$0xff] %v2501_v24 }
 0x2df   : > { %2712 = vst [vmem:[%s5556_s28 + $0x590] sm:$0xff] %v2502_v14 }
 0x2e0   : > { %2713 = vst [vmem:[%s5556_s28 + $0x598] sm:$0xff] %v2503_v34 }
 0x2e1   : > { %2714 = vst [vmem:[%s5556_s28 + $0x5a0] sm:$0xff] %v2504_v62 }
 0x2e2   : > { %2715 = vst.msk [vmem:[%s5556_s28 + $0x5a8] sm:$0xff] %vm438_vm0, %v2505_v38 }
 0x2e3   : > { %2723 = vst [vmem:[%s5556_s28 + $0x5e8] sm:$0xff] %v2513_v1 }
 0x2e4   : > { %2724 = vst [vmem:[%s5556_s28 + $0x5f0] sm:$0xff] %v2514_v43 }
 0x2e5   : > { %2725 = vst [vmem:[%s5556_s28 + $0x5f8] sm:$0xff] %v2515_v20 }
 0x2e6   : > { %2726 = vst [vmem:[%s5556_s28 + $0x600] sm:$0xff] %v2516_v5 }
 0x2e7   : > { %2727 = vst [vmem:[%s5556_s28 + $0x608] sm:$0xff] %v2517_v21 }
 0x2e8   : > { %2728 = vst [vmem:[%s5556_s28 + $0x610] sm:$0xff] %v2518_v49 }
 0x2e9   : > { %2729 = vst.msk [vmem:[%s5556_s28 + $0x618] sm:$0xff] %vm438_vm0, %v2519_v41 }
 0x2ea   : > { %2730 = vst [vmem:[%s5556_s28 + $0x620] sm:$0xff] %v2520_v55 }
 0x2eb   : > { %2731 = vst [vmem:[%s5556_s28 + $0x628] sm:$0xff] %v2521_v13 }
 0x2ec   : > { %2732 = vst [vmem:[%s5556_s28 + $0x630] sm:$0xff] %v2522_v46 }
 0x2ed   : > { %2733 = vst [vmem:[%s5556_s28 + $0x638] sm:$0xff] %v2523_v45 }
 0x2ee   : > { %2734 = vst [vmem:[%s5556_s28 + $0x640] sm:$0xff] %v2524_v54 }
 0x2ef   : > { %2735 = vst [vmem:[%s5556_s28 + $0x648] sm:$0xff] %v2525_v32 }
 0x2f0   : > { %2736 = vst.msk [vmem:[%s5556_s28 + $0x650] sm:$0xff] %vm438_vm0, %v2526_v59 }
 0x2f1 PF: > { %s13_s12 = sadd.s32 1, %s3126_s12  }
 0x2f2   : > { %p10_p4 = scmp.ge.s32.totalorder %s13_s12, 4  }
 0x2f4   :  { %12 = sbr.rel (!%p10_p4) target bundleno = 1 (0x1), region = 68 }

</bundles_post_ra>
